<compile_context>
chip_gen: v6e
topology: v6e:2x2x1
jax: 0.10.0
libtpu: 0.0.40
codegen_flags: <defaults>
</compile_context>

<pallas_src>
import functools

import jax
import jax.numpy as jnp
from jax import lax
from jax.experimental import pallas as pl
from jax.experimental.pallas import tpu as pltpu


def _pick_row_tile(OH, OW, target_rows=1024):
    """Largest divisor TH of OH such that TH*OW <= target_rows (>= 1)."""
    th_max = max(1, min(OH, target_rows // max(OW, 1)))
    th = 1
    for cand in range(1, OH + 1):
        if OH % cand == 0 and cand <= th_max:
            th = cand
    return th


def conv2dn_forward(x, conv_w, conv_b, bn_gamma, bn_beta, *, stride, padding,
                    eps=1e-5):
    """Forward of Conv2DN.  x: (N, Cin, H, W) NCHW.  Returns (N, Cout, OH, OW)."""
    del conv_b  # Cancelled exactly by the BN mean subtraction (see header).

    N, Cin, H, W = x.shape
    Cout, _, K, _ = conv_w.shape
    s, p = stride, padding

    Hp, Wp = H + 2 * p, W + 2 * p
    OH = (Hp - K) // s + 1
    OW = (Wp - K) // s + 1

    # ---- layout prep (NHWC, bf16 MXU stream) --------------------------------
    x_nhwc = jnp.transpose(x, (0, 2, 3, 1))
    xp = jnp.pad(x_nhwc, ((0, 0), (p, p), (p, p), (0, 0))).astype(jnp.bfloat16)

    TH = _pick_row_tile(OH, OW)          # output rows per grid step
    nh = OH // TH                        # row tiles per image
    NT = N * nh                          # grid size
    HB = (TH - 1) * s + K                # input rows needed per band
    TROWS = TH * OW                      # conv-output rows per tile

    # Overlapping row bands (amplification (K-s)/(TH*s) << im2col's K*K).
    if nh == 1:
        x_bands = xp[:, :HB]
    else:
        h_idx = jnp.arange(nh)[:, None] * (TH * s) + jnp.arange(HB)[None, :]
        x_bands = xp[:, h_idx]                       # (N, nh, HB, Wp, Cin)
    x_bands = x_bands.reshape(NT, HB, Wp, Cin)

    # Weights: (Cout, Cin, KH, KW) -> (KH, KW, Cin, Cout_pad), bf16, lane-padded.
    Cp = ((Cout + 127) // 128) * 128
    w4 = jnp.transpose(conv_w, (2, 3, 1, 0))
    w4 = jnp.pad(w4, ((0, 0), (0, 0), (0, 0), (0, Cp - Cout))).astype(jnp.bfloat16)

    # ---- kernels (constants closed over) ------------------------------------
    def conv_tile(xb_ref, w_ref):
        """One row-band of the conv: (TROWS, Cp) f32 accumulator."""
        xb = xb_ref[0]                               # (HB, Wp, Cin) bf16
        acc = jnp.zeros((TROWS, Cp), jnp.float32)
        for kh in range(K):
            for kw in range(K):
                xs = lax.slice(
                    xb,
                    (kh, kw, 0),
                    (kh + (TH - 1) * s + 1, kw + (OW - 1) * s + 1, Cin),
                    (s, s, 1))                       # (TH, OW, Cin)
                xs = xs.reshape(TROWS, Cin)
                acc = acc + jnp.dot(xs, w_ref[kh, kw],
                                    preferred_element_type=jnp.float32)
        return acc

    def stats_kernel(xb_ref, w_ref, sum_ref, sq_ref):
        acc = conv_tile(xb_ref, w_ref)
        sum_ref[...] = jnp.sum(acc, axis=0, keepdims=True).reshape(1, 1, Cp)
        sq_ref[...] = jnp.sum(acc * acc, axis=0, keepdims=True).reshape(1, 1, Cp)

    def norm_kernel(xb_ref, w_ref, scale_ref, shift_ref, out_ref):
        acc = conv_tile(xb_ref, w_ref)
        y = acc * scale_ref[...] + shift_ref[...]    # f32 epilogue
        out_ref[...] = y[:, :Cout].astype(out_ref.dtype).reshape(1, TROWS, Cout)

    # ---- specs ----------------------------------------------------------------
    band_spec = pl.BlockSpec((1, HB, Wp, Cin), lambda i: (i, 0, 0, 0))
    w_spec = pl.BlockSpec((K, K, Cin, Cp), lambda i: (0, 0, 0, 0))   # resident
    stat_spec = pl.BlockSpec((1, 1, Cp), lambda i: (i, 0, 0))
    vec_spec = pl.BlockSpec((1, Cp), lambda i: (0, 0))
    out_spec = pl.BlockSpec((1, TROWS, Cout), lambda i: (i, 0, 0))

    cparams = pltpu.CompilerParams(
        dimension_semantics=("parallel",),           # v7x: both TCs share rows
        vmem_limit_bytes=32 * 1024 * 1024)

    conv_flops = 2 * NT * TROWS * (K * K * Cin) * Cp
    band_bytes = NT * HB * Wp * Cin * 2
    w_bytes = K * K * Cin * Cp * 2

    # ---- pass 1: conv + per-tile partial sum / sumsq --------------------------
    sums, sqs = pl.pallas_call(
        stats_kernel,
        grid=(NT,),
        in_specs=[band_spec, w_spec],
        out_specs=[stat_spec, stat_spec],
        out_shape=[jax.ShapeDtypeStruct((NT, 1, Cp), jnp.float32),
                   jax.ShapeDtypeStruct((NT, 1, Cp), jnp.float32)],
        compiler_params=cparams,
        cost_estimate=pl.CostEstimate(
            flops=conv_flops, transcendentals=0,
            bytes_accessed=band_bytes + w_bytes + 2 * NT * Cp * 4),
    )(x_bands, w4)

    # ---- tiny O(Cout) reduce + fold BN into a single scale/shift --------------
    R = N * OH * OW
    total = jnp.sum(sums[:, 0, :], axis=0)
    total_sq = jnp.sum(sqs[:, 0, :], axis=0)
    mean = total / R
    var = jnp.maximum(total_sq / R - mean * mean, 0.0)   # biased var (PyTorch BN)
    inv_std = lax.rsqrt(var + eps)
    gamma_p = jnp.pad(bn_gamma.astype(jnp.float32), (0, Cp - Cout))
    beta_p = jnp.pad(bn_beta.astype(jnp.float32), (0, Cp - Cout))
    scale = (gamma_p * inv_std).reshape(1, Cp)
    shift = (beta_p - mean * gamma_p * inv_std).reshape(1, Cp)

    # ---- pass 2: conv recompute + fused normalize ------------------------------
    out_nt = pl.pallas_call(
        norm_kernel,
        grid=(NT,),
        in_specs=[band_spec, w_spec, vec_spec, vec_spec],
        out_specs=out_spec,
        out_shape=jax.ShapeDtypeStruct((NT, TROWS, Cout), jnp.float32),
        compiler_params=cparams,
        cost_estimate=pl.CostEstimate(
            flops=conv_flops + 2 * NT * TROWS * Cp, transcendentals=0,
            bytes_accessed=band_bytes + w_bytes + 2 * Cp * 4
            + NT * TROWS * Cout * 4),
    )(x_bands, w4, scale, shift)

    # (NT, TH*OW, Cout) -> (N, OH, OW, Cout) -> NCHW (PyTorch convention).
    out_nhwc = out_nt.reshape(N, nh, TH, OW, Cout).reshape(N, OH, OW, Cout)
    return jnp.transpose(out_nhwc, (0, 3, 1, 2))


def _reference(x, conv_w, conv_b, bn_gamma, bn_beta, *, stride, padding):
    """Pure-JAX reference: lax conv (with bias) + training-mode batchnorm."""
    y = lax.conv_general_dilated(
        x.astype(jnp.float32), conv_w.astype(jnp.float32),
        window_strides=(stride, stride),
        padding=[(padding, padding), (padding, padding)],
        dimension_numbers=("NCHW", "OIHW", "NCHW"),
    ) + conv_b.reshape(1, -1, 1, 1)
    mean = jnp.mean(y, axis=(0, 2, 3), keepdims=True)
    var = jnp.mean((y - mean) ** 2, axis=(0, 2, 3), keepdims=True)
    return (y - mean) * lax.rsqrt(var + 1e-5) * bn_gamma.reshape(1, -1, 1, 1) \
        + bn_beta.reshape(1, -1, 1, 1)


if __name__ == "__main__":
    # Module config: Conv2DN(in_chan=4, out_chan=8, kernel_size=3, stride=1, padding=1)
    N, Cin, H, W = 2, 4, 16, 16
    Cout, K, stride, padding = 8, 3, 1, 1

    key = jax.random.PRNGKey(0)
    k_x, k_w, k_b = jax.random.split(key, 3)

    x = jax.random.normal(k_x, (N, Cin, H, W), dtype=jnp.float32)
    conv_w = jax.random.normal(k_w, (Cout, Cin, K, K), dtype=jnp.float32) * 0.1
    conv_b = jax.random.normal(k_b, (Cout,), dtype=jnp.float32) * 0.1
    bn_gamma = jnp.ones((Cout,), dtype=jnp.float32)   # PyTorch BN default weight
    bn_beta = jnp.zeros((Cout,), dtype=jnp.float32)   # PyTorch BN default bias

    fwd = jax.jit(functools.partial(conv2dn_forward, stride=stride, padding=padding))
    out = fwd(x, conv_w, conv_b, bn_gamma, bn_beta)
    out = jax.block_until_ready(out)

    ref = _reference(x, conv_w, conv_b, bn_gamma, bn_beta,
                     stride=stride, padding=padding)
    assert out.shape == (N, Cout, H, W)
    # Tolerance reflects bf16 MXU inputs (f32 accumulation / f32 BN epilogue).
    assert jnp.allclose(out, ref, atol=2e-2, rtol=2e-2), "mismatch vs reference"

    print("KERNEL_OK")
</pallas_src>

<mosaic_0001>
module attributes {stable_mosaic.version = 11 : i64} {
  func.func @stats_kernel(%arg0: i32, %arg1: memref<1x18x18x4xbf16, #tpu.memory_space<vmem>>, %arg2: memref<3x3x4x128xbf16, #tpu.memory_space<vmem>>, %arg3: memref<1x1x128xf32, #tpu.memory_space<vmem>>, %arg4: memref<1x1x128xf32, #tpu.memory_space<vmem>>) attributes {dimension_semantics = [#tpu.dimension_semantics<parallel>], iteration_bounds = array<i64: 2>, scalar_prefetch = 0 : i64, scratch_operands = 0 : i64, tpu.core_type = #tpu.core_type<tc>, window_params = [{transform_indices = @transform_0, window_bounds = array<i64: 1, 18, 18, 4>}, {pipeline_mode = #tpu.pipeline_mode<synchronous>, transform_indices = @transform_1, window_bounds = array<i64: 3, 3, 4, 128>}, {transform_indices = @transform_2, window_bounds = array<i64: 1, 1, 128>}, {transform_indices = @transform_3, window_bounds = array<i64: 1, 1, 128>}]} {
    %c0 = arith.constant 0 : index
    %c0_0 = arith.constant 0 : index
    %c0_1 = arith.constant 0 : index
    %c0_2 = arith.constant 0 : index
    %0 = vector.load %arg1[%c0, %c0_0, %c0_1, %c0_2] : memref<1x18x18x4xbf16, #tpu.memory_space<vmem>>, vector<1x18x18x4xbf16>
    %1 = vector.shape_cast %0 : vector<1x18x18x4xbf16> to vector<18x18x4xbf16>
    %cst = arith.constant 0.000000e+00 : f32
    %2 = vector.broadcast %cst : f32 to vector<256x128xf32>
    %3 = vector.extract_strided_slice %1 {offsets = [0, 0, 0], sizes = [16, 16, 4], strides = [1, 1, 1]} : vector<18x18x4xbf16> to vector<16x16x4xbf16>
    %4 = vector.shape_cast %3 : vector<16x16x4xbf16> to vector<256x4xbf16>
    %c0_3 = arith.constant 0 : index
    %c0_4 = arith.constant 0 : index
    %c0_5 = arith.constant 0 : index
    %c0_6 = arith.constant 0 : index
    %5 = vector.load %arg2[%c0_3, %c0_4, %c0_5, %c0_6] : memref<3x3x4x128xbf16, #tpu.memory_space<vmem>>, vector<1x1x4x128xbf16>
    %6 = vector.shape_cast %5 : vector<1x1x4x128xbf16> to vector<4x128xbf16>
    %cst_7 = arith.constant dense<0.000000e+00> : vector<256x128xf32>
    %7 = tpu.matmul %4, %6, %cst_7 {dimension_numbers = #tpu.dot_dimension_numbers<[1], [0], [0], [1], [0, 0, 1, 1], [], []>} : vector<256x4xbf16>, vector<4x128xbf16>, vector<256x128xf32> -> vector<256x128xf32>
    %8 = arith.addf %2, %7 : vector<256x128xf32>
    %9 = vector.extract_strided_slice %1 {offsets = [0, 1, 0], sizes = [16, 16, 4], strides = [1, 1, 1]} : vector<18x18x4xbf16> to vector<16x16x4xbf16>
    %10 = vector.shape_cast %9 : vector<16x16x4xbf16> to vector<256x4xbf16>
    %c0_8 = arith.constant 0 : index
    %c1 = arith.constant 1 : index
    %c0_9 = arith.constant 0 : index
    %c0_10 = arith.constant 0 : index
    %11 = vector.load %arg2[%c0_8, %c1, %c0_9, %c0_10] : memref<3x3x4x128xbf16, #tpu.memory_space<vmem>>, vector<1x1x4x128xbf16>
    %12 = vector.shape_cast %11 : vector<1x1x4x128xbf16> to vector<4x128xbf16>
    %cst_11 = arith.constant dense<0.000000e+00> : vector<256x128xf32>
    %13 = tpu.matmul %10, %12, %cst_11 {dimension_numbers = #tpu.dot_dimension_numbers<[1], [0], [0], [1], [0, 0, 1, 1], [], []>} : vector<256x4xbf16>, vector<4x128xbf16>, vector<256x128xf32> -> vector<256x128xf32>
    %14 = arith.addf %8, %13 : vector<256x128xf32>
    %15 = vector.extract_strided_slice %1 {offsets = [0, 2, 0], sizes = [16, 16, 4], strides = [1, 1, 1]} : vector<18x18x4xbf16> to vector<16x16x4xbf16>
    %16 = vector.shape_cast %15 : vector<16x16x4xbf16> to vector<256x4xbf16>
    %c0_12 = arith.constant 0 : index
    %c2 = arith.constant 2 : index
    %c0_13 = arith.constant 0 : index
    %c0_14 = arith.constant 0 : index
    %17 = vector.load %arg2[%c0_12, %c2, %c0_13, %c0_14] : memref<3x3x4x128xbf16, #tpu.memory_space<vmem>>, vector<1x1x4x128xbf16>
    %18 = vector.shape_cast %17 : vector<1x1x4x128xbf16> to vector<4x128xbf16>
    %cst_15 = arith.constant dense<0.000000e+00> : vector<256x128xf32>
    %19 = tpu.matmul %16, %18, %cst_15 {dimension_numbers = #tpu.dot_dimension_numbers<[1], [0], [0], [1], [0, 0, 1, 1], [], []>} : vector<256x4xbf16>, vector<4x128xbf16>, vector<256x128xf32> -> vector<256x128xf32>
    %20 = arith.addf %14, %19 : vector<256x128xf32>
    %21 = vector.extract_strided_slice %1 {offsets = [1, 0, 0], sizes = [16, 16, 4], strides = [1, 1, 1]} : vector<18x18x4xbf16> to vector<16x16x4xbf16>
    %22 = vector.shape_cast %21 : vector<16x16x4xbf16> to vector<256x4xbf16>
    %c1_16 = arith.constant 1 : index
    %c0_17 = arith.constant 0 : index
    %c0_18 = arith.constant 0 : index
    %c0_19 = arith.constant 0 : index
    %23 = vector.load %arg2[%c1_16, %c0_17, %c0_18, %c0_19] : memref<3x3x4x128xbf16, #tpu.memory_space<vmem>>, vector<1x1x4x128xbf16>
    %24 = vector.shape_cast %23 : vector<1x1x4x128xbf16> to vector<4x128xbf16>
    %cst_20 = arith.constant dense<0.000000e+00> : vector<256x128xf32>
    %25 = tpu.matmul %22, %24, %cst_20 {dimension_numbers = #tpu.dot_dimension_numbers<[1], [0], [0], [1], [0, 0, 1, 1], [], []>} : vector<256x4xbf16>, vector<4x128xbf16>, vector<256x128xf32> -> vector<256x128xf32>
    %26 = arith.addf %20, %25 : vector<256x128xf32>
    %27 = vector.extract_strided_slice %1 {offsets = [1, 1, 0], sizes = [16, 16, 4], strides = [1, 1, 1]} : vector<18x18x4xbf16> to vector<16x16x4xbf16>
    %28 = vector.shape_cast %27 : vector<16x16x4xbf16> to vector<256x4xbf16>
    %c1_21 = arith.constant 1 : index
    %c1_22 = arith.constant 1 : index
    %c0_23 = arith.constant 0 : index
    %c0_24 = arith.constant 0 : index
    %29 = vector.load %arg2[%c1_21, %c1_22, %c0_23, %c0_24] : memref<3x3x4x128xbf16, #tpu.memory_space<vmem>>, vector<1x1x4x128xbf16>
    %30 = vector.shape_cast %29 : vector<1x1x4x128xbf16> to vector<4x128xbf16>
    %cst_25 = arith.constant dense<0.000000e+00> : vector<256x128xf32>
    %31 = tpu.matmul %28, %30, %cst_25 {dimension_numbers = #tpu.dot_dimension_numbers<[1], [0], [0], [1], [0, 0, 1, 1], [], []>} : vector<256x4xbf16>, vector<4x128xbf16>, vector<256x128xf32> -> vector<256x128xf32>
    %32 = arith.addf %26, %31 : vector<256x128xf32>
    %33 = vector.extract_strided_slice %1 {offsets = [1, 2, 0], sizes = [16, 16, 4], strides = [1, 1, 1]} : vector<18x18x4xbf16> to vector<16x16x4xbf16>
    %34 = vector.shape_cast %33 : vector<16x16x4xbf16> to vector<256x4xbf16>
    %c1_26 = arith.constant 1 : index
    %c2_27 = arith.constant 2 : index
    %c0_28 = arith.constant 0 : index
    %c0_29 = arith.constant 0 : index
    %35 = vector.load %arg2[%c1_26, %c2_27, %c0_28, %c0_29] : memref<3x3x4x128xbf16, #tpu.memory_space<vmem>>, vector<1x1x4x128xbf16>
    %36 = vector.shape_cast %35 : vector<1x1x4x128xbf16> to vector<4x128xbf16>
    %cst_30 = arith.constant dense<0.000000e+00> : vector<256x128xf32>
    %37 = tpu.matmul %34, %36, %cst_30 {dimension_numbers = #tpu.dot_dimension_numbers<[1], [0], [0], [1], [0, 0, 1, 1], [], []>} : vector<256x4xbf16>, vector<4x128xbf16>, vector<256x128xf32> -> vector<256x128xf32>
    %38 = arith.addf %32, %37 : vector<256x128xf32>
    %39 = vector.extract_strided_slice %1 {offsets = [2, 0, 0], sizes = [16, 16, 4], strides = [1, 1, 1]} : vector<18x18x4xbf16> to vector<16x16x4xbf16>
    %40 = vector.shape_cast %39 : vector<16x16x4xbf16> to vector<256x4xbf16>
    %c2_31 = arith.constant 2 : index
    %c0_32 = arith.constant 0 : index
    %c0_33 = arith.constant 0 : index
    %c0_34 = arith.constant 0 : index
    %41 = vector.load %arg2[%c2_31, %c0_32, %c0_33, %c0_34] : memref<3x3x4x128xbf16, #tpu.memory_space<vmem>>, vector<1x1x4x128xbf16>
    %42 = vector.shape_cast %41 : vector<1x1x4x128xbf16> to vector<4x128xbf16>
    %cst_35 = arith.constant dense<0.000000e+00> : vector<256x128xf32>
    %43 = tpu.matmul %40, %42, %cst_35 {dimension_numbers = #tpu.dot_dimension_numbers<[1], [0], [0], [1], [0, 0, 1, 1], [], []>} : vector<256x4xbf16>, vector<4x128xbf16>, vector<256x128xf32> -> vector<256x128xf32>
    %44 = arith.addf %38, %43 : vector<256x128xf32>
    %45 = vector.extract_strided_slice %1 {offsets = [2, 1, 0], sizes = [16, 16, 4], strides = [1, 1, 1]} : vector<18x18x4xbf16> to vector<16x16x4xbf16>
    %46 = vector.shape_cast %45 : vector<16x16x4xbf16> to vector<256x4xbf16>
    %c2_36 = arith.constant 2 : index
    %c1_37 = arith.constant 1 : index
    %c0_38 = arith.constant 0 : index
    %c0_39 = arith.constant 0 : index
    %47 = vector.load %arg2[%c2_36, %c1_37, %c0_38, %c0_39] : memref<3x3x4x128xbf16, #tpu.memory_space<vmem>>, vector<1x1x4x128xbf16>
    %48 = vector.shape_cast %47 : vector<1x1x4x128xbf16> to vector<4x128xbf16>
    %cst_40 = arith.constant dense<0.000000e+00> : vector<256x128xf32>
    %49 = tpu.matmul %46, %48, %cst_40 {dimension_numbers = #tpu.dot_dimension_numbers<[1], [0], [0], [1], [0, 0, 1, 1], [], []>} : vector<256x4xbf16>, vector<4x128xbf16>, vector<256x128xf32> -> vector<256x128xf32>
    %50 = arith.addf %44, %49 : vector<256x128xf32>
    %51 = vector.extract_strided_slice %1 {offsets = [2, 2, 0], sizes = [16, 16, 4], strides = [1, 1, 1]} : vector<18x18x4xbf16> to vector<16x16x4xbf16>
    %52 = vector.shape_cast %51 : vector<16x16x4xbf16> to vector<256x4xbf16>
    %c2_41 = arith.constant 2 : index
    %c2_42 = arith.constant 2 : index
    %c0_43 = arith.constant 0 : index
    %c0_44 = arith.constant 0 : index
    %53 = vector.load %arg2[%c2_41, %c2_42, %c0_43, %c0_44] : memref<3x3x4x128xbf16, #tpu.memory_space<vmem>>, vector<1x1x4x128xbf16>
    %54 = vector.shape_cast %53 : vector<1x1x4x128xbf16> to vector<4x128xbf16>
    %cst_45 = arith.constant dense<0.000000e+00> : vector<256x128xf32>
    %55 = tpu.matmul %52, %54, %cst_45 {dimension_numbers = #tpu.dot_dimension_numbers<[1], [0], [0], [1], [0, 0, 1, 1], [], []>} : vector<256x4xbf16>, vector<4x128xbf16>, vector<256x128xf32> -> vector<256x128xf32>
    %56 = arith.addf %50, %55 : vector<256x128xf32>
    %cst_46 = arith.constant dense<0.000000e+00> : vector<128xf32>
    %57 = vector.multi_reduction <add>, %56, %cst_46 [0] : vector<256x128xf32> to vector<128xf32>
    %58 = vector.shape_cast %57 : vector<128xf32> to vector<1x128xf32>
    %59 = vector.shape_cast %58 : vector<1x128xf32> to vector<1x1x128xf32>
    %c0_47 = arith.constant 0 : index
    %c0_48 = arith.constant 0 : index
    %c0_49 = arith.constant 0 : index
    %60 = vector.load %arg3[%c0_47, %c0_48, %c0_49] : memref<1x1x128xf32, #tpu.memory_space<vmem>>, vector<1x1x128xf32>
    tpu.vector_store %arg3[%c0_47, %c0_48, %c0_49], %59 {strides = array<i32>} : memref<1x1x128xf32, #tpu.memory_space<vmem>>, vector<1x1x128xf32>,
    %61 = arith.mulf %56, %56 : vector<256x128xf32>
    %cst_50 = arith.constant dense<0.000000e+00> : vector<128xf32>
    %62 = vector.multi_reduction <add>, %61, %cst_50 [0] : vector<256x128xf32> to vector<128xf32>
    %63 = vector.shape_cast %62 : vector<128xf32> to vector<1x128xf32>
    %64 = vector.shape_cast %63 : vector<1x128xf32> to vector<1x1x128xf32>
    %c0_51 = arith.constant 0 : index
    %c0_52 = arith.constant 0 : index
    %c0_53 = arith.constant 0 : index
    %65 = vector.load %arg4[%c0_51, %c0_52, %c0_53] : memref<1x1x128xf32, #tpu.memory_space<vmem>>, vector<1x1x128xf32>
    tpu.vector_store %arg4[%c0_51, %c0_52, %c0_53], %64 {strides = array<i32>} : memref<1x1x128xf32, #tpu.memory_space<vmem>>, vector<1x1x128xf32>,
    return
  }
  func.func @transform_0(%arg0: i32) -> (i32, i32, i32, i32) {
    %c0_i32 = arith.constant 0 : i32
    %c0_i32_0 = arith.constant 0 : i32
    %c0_i32_1 = arith.constant 0 : i32
    %c0_i32_2 = arith.constant 0 : i32
    return %arg0, %c0_i32, %c0_i32_0, %c0_i32_1 : i32, i32, i32, i32
  }
  func.func @transform_1(%arg0: i32) -> (i32, i32, i32, i32) {
    %c0_i32 = arith.constant 0 : i32
    %c0_i32_0 = arith.constant 0 : i32
    %c0_i32_1 = arith.constant 0 : i32
    %c0_i32_2 = arith.constant 0 : i32
    %c0_i32_3 = arith.constant 0 : i32
    return %c0_i32, %c0_i32_0, %c0_i32_1, %c0_i32_2 : i32, i32, i32, i32
  }
  func.func @transform_2(%arg0: i32) -> (i32, i32, i32) {
    %c0_i32 = arith.constant 0 : i32
    %c0_i32_0 = arith.constant 0 : i32
    %c0_i32_1 = arith.constant 0 : i32
    return %arg0, %c0_i32, %c0_i32_0 : i32, i32, i32
  }
  func.func @transform_3(%arg0: i32) -> (i32, i32, i32) {
    %c0_i32 = arith.constant 0 : i32
    %c0_i32_0 = arith.constant 0 : i32
    %c0_i32_1 = arith.constant 0 : i32
    return %arg0, %c0_i32, %c0_i32_0 : i32, i32, i32
  }
}

module attributes {stable_mosaic.version = 11 : i64} {
  func.func @norm_kernel(%arg0: i32, %arg1: memref<1x18x18x4xbf16, #tpu.memory_space<vmem>>, %arg2: memref<3x3x4x128xbf16, #tpu.memory_space<vmem>>, %arg3: memref<1x128xf32, #tpu.memory_space<vmem>>, %arg4: memref<1x128xf32, #tpu.memory_space<vmem>>, %arg5: memref<1x256x8xf32, #tpu.memory_space<vmem>>) attributes {dimension_semantics = [#tpu.dimension_semantics<parallel>], iteration_bounds = array<i64: 2>, scalar_prefetch = 0 : i64, scratch_operands = 0 : i64, tpu.core_type = #tpu.core_type<tc>, window_params = [{transform_indices = @transform_0, window_bounds = array<i64: 1, 18, 18, 4>}, {pipeline_mode = #tpu.pipeline_mode<synchronous>, transform_indices = @transform_1, window_bounds = array<i64: 3, 3, 4, 128>}, {pipeline_mode = #tpu.pipeline_mode<synchronous>, transform_indices = @transform_2, window_bounds = array<i64: 1, 128>}, {pipeline_mode = #tpu.pipeline_mode<synchronous>, transform_indices = @transform_3, window_bounds = array<i64: 1, 128>}, {transform_indices = @transform_4, window_bounds = array<i64: 1, 256, 8>}]} {
    %c0 = arith.constant 0 : index
    %c0_0 = arith.constant 0 : index
    %c0_1 = arith.constant 0 : index
    %c0_2 = arith.constant 0 : index
    %0 = vector.load %arg1[%c0, %c0_0, %c0_1, %c0_2] : memref<1x18x18x4xbf16, #tpu.memory_space<vmem>>, vector<1x18x18x4xbf16>
    %1 = vector.shape_cast %0 : vector<1x18x18x4xbf16> to vector<18x18x4xbf16>
    %cst = arith.constant 0.000000e+00 : f32
    %2 = vector.broadcast %cst : f32 to vector<256x128xf32>
    %3 = vector.extract_strided_slice %1 {offsets = [0, 0, 0], sizes = [16, 16, 4], strides = [1, 1, 1]} : vector<18x18x4xbf16> to vector<16x16x4xbf16>
    %4 = vector.shape_cast %3 : vector<16x16x4xbf16> to vector<256x4xbf16>
    %c0_3 = arith.constant 0 : index
    %c0_4 = arith.constant 0 : index
    %c0_5 = arith.constant 0 : index
    %c0_6 = arith.constant 0 : index
    %5 = vector.load %arg2[%c0_3, %c0_4, %c0_5, %c0_6] : memref<3x3x4x128xbf16, #tpu.memory_space<vmem>>, vector<1x1x4x128xbf16>
    %6 = vector.shape_cast %5 : vector<1x1x4x128xbf16> to vector<4x128xbf16>
    %cst_7 = arith.constant dense<0.000000e+00> : vector<256x128xf32>
    %7 = tpu.matmul %4, %6, %cst_7 {dimension_numbers = #tpu.dot_dimension_numbers<[1], [0], [0], [1], [0, 0, 1, 1], [], []>} : vector<256x4xbf16>, vector<4x128xbf16>, vector<256x128xf32> -> vector<256x128xf32>
    %8 = arith.addf %2, %7 : vector<256x128xf32>
    %9 = vector.extract_strided_slice %1 {offsets = [0, 1, 0], sizes = [16, 16, 4], strides = [1, 1, 1]} : vector<18x18x4xbf16> to vector<16x16x4xbf16>
    %10 = vector.shape_cast %9 : vector<16x16x4xbf16> to vector<256x4xbf16>
    %c0_8 = arith.constant 0 : index
    %c1 = arith.constant 1 : index
    %c0_9 = arith.constant 0 : index
    %c0_10 = arith.constant 0 : index
    %11 = vector.load %arg2[%c0_8, %c1, %c0_9, %c0_10] : memref<3x3x4x128xbf16, #tpu.memory_space<vmem>>, vector<1x1x4x128xbf16>
    %12 = vector.shape_cast %11 : vector<1x1x4x128xbf16> to vector<4x128xbf16>
    %cst_11 = arith.constant dense<0.000000e+00> : vector<256x128xf32>
    %13 = tpu.matmul %10, %12, %cst_11 {dimension_numbers = #tpu.dot_dimension_numbers<[1], [0], [0], [1], [0, 0, 1, 1], [], []>} : vector<256x4xbf16>, vector<4x128xbf16>, vector<256x128xf32> -> vector<256x128xf32>
    %14 = arith.addf %8, %13 : vector<256x128xf32>
    %15 = vector.extract_strided_slice %1 {offsets = [0, 2, 0], sizes = [16, 16, 4], strides = [1, 1, 1]} : vector<18x18x4xbf16> to vector<16x16x4xbf16>
    %16 = vector.shape_cast %15 : vector<16x16x4xbf16> to vector<256x4xbf16>
    %c0_12 = arith.constant 0 : index
    %c2 = arith.constant 2 : index
    %c0_13 = arith.constant 0 : index
    %c0_14 = arith.constant 0 : index
    %17 = vector.load %arg2[%c0_12, %c2, %c0_13, %c0_14] : memref<3x3x4x128xbf16, #tpu.memory_space<vmem>>, vector<1x1x4x128xbf16>
    %18 = vector.shape_cast %17 : vector<1x1x4x128xbf16> to vector<4x128xbf16>
    %cst_15 = arith.constant dense<0.000000e+00> : vector<256x128xf32>
    %19 = tpu.matmul %16, %18, %cst_15 {dimension_numbers = #tpu.dot_dimension_numbers<[1], [0], [0], [1], [0, 0, 1, 1], [], []>} : vector<256x4xbf16>, vector<4x128xbf16>, vector<256x128xf32> -> vector<256x128xf32>
    %20 = arith.addf %14, %19 : vector<256x128xf32>
    %21 = vector.extract_strided_slice %1 {offsets = [1, 0, 0], sizes = [16, 16, 4], strides = [1, 1, 1]} : vector<18x18x4xbf16> to vector<16x16x4xbf16>
    %22 = vector.shape_cast %21 : vector<16x16x4xbf16> to vector<256x4xbf16>
    %c1_16 = arith.constant 1 : index
    %c0_17 = arith.constant 0 : index
    %c0_18 = arith.constant 0 : index
    %c0_19 = arith.constant 0 : index
    %23 = vector.load %arg2[%c1_16, %c0_17, %c0_18, %c0_19] : memref<3x3x4x128xbf16, #tpu.memory_space<vmem>>, vector<1x1x4x128xbf16>
    %24 = vector.shape_cast %23 : vector<1x1x4x128xbf16> to vector<4x128xbf16>
    %cst_20 = arith.constant dense<0.000000e+00> : vector<256x128xf32>
    %25 = tpu.matmul %22, %24, %cst_20 {dimension_numbers = #tpu.dot_dimension_numbers<[1], [0], [0], [1], [0, 0, 1, 1], [], []>} : vector<256x4xbf16>, vector<4x128xbf16>, vector<256x128xf32> -> vector<256x128xf32>
    %26 = arith.addf %20, %25 : vector<256x128xf32>
    %27 = vector.extract_strided_slice %1 {offsets = [1, 1, 0], sizes = [16, 16, 4], strides = [1, 1, 1]} : vector<18x18x4xbf16> to vector<16x16x4xbf16>
    %28 = vector.shape_cast %27 : vector<16x16x4xbf16> to vector<256x4xbf16>
    %c1_21 = arith.constant 1 : index
    %c1_22 = arith.constant 1 : index
    %c0_23 = arith.constant 0 : index
    %c0_24 = arith.constant 0 : index
    %29 = vector.load %arg2[%c1_21, %c1_22, %c0_23, %c0_24] : memref<3x3x4x128xbf16, #tpu.memory_space<vmem>>, vector<1x1x4x128xbf16>
    %30 = vector.shape_cast %29 : vector<1x1x4x128xbf16> to vector<4x128xbf16>
    %cst_25 = arith.constant dense<0.000000e+00> : vector<256x128xf32>
    %31 = tpu.matmul %28, %30, %cst_25 {dimension_numbers = #tpu.dot_dimension_numbers<[1], [0], [0], [1], [0, 0, 1, 1], [], []>} : vector<256x4xbf16>, vector<4x128xbf16>, vector<256x128xf32> -> vector<256x128xf32>
    %32 = arith.addf %26, %31 : vector<256x128xf32>
    %33 = vector.extract_strided_slice %1 {offsets = [1, 2, 0], sizes = [16, 16, 4], strides = [1, 1, 1]} : vector<18x18x4xbf16> to vector<16x16x4xbf16>
    %34 = vector.shape_cast %33 : vector<16x16x4xbf16> to vector<256x4xbf16>
    %c1_26 = arith.constant 1 : index
    %c2_27 = arith.constant 2 : index
    %c0_28 = arith.constant 0 : index
    %c0_29 = arith.constant 0 : index
    %35 = vector.load %arg2[%c1_26, %c2_27, %c0_28, %c0_29] : memref<3x3x4x128xbf16, #tpu.memory_space<vmem>>, vector<1x1x4x128xbf16>
    %36 = vector.shape_cast %35 : vector<1x1x4x128xbf16> to vector<4x128xbf16>
    %cst_30 = arith.constant dense<0.000000e+00> : vector<256x128xf32>
    %37 = tpu.matmul %34, %36, %cst_30 {dimension_numbers = #tpu.dot_dimension_numbers<[1], [0], [0], [1], [0, 0, 1, 1], [], []>} : vector<256x4xbf16>, vector<4x128xbf16>, vector<256x128xf32> -> vector<256x128xf32>
    %38 = arith.addf %32, %37 : vector<256x128xf32>
    %39 = vector.extract_strided_slice %1 {offsets = [2, 0, 0], sizes = [16, 16, 4], strides = [1, 1, 1]} : vector<18x18x4xbf16> to vector<16x16x4xbf16>
    %40 = vector.shape_cast %39 : vector<16x16x4xbf16> to vector<256x4xbf16>
    %c2_31 = arith.constant 2 : index
    %c0_32 = arith.constant 0 : index
    %c0_33 = arith.constant 0 : index
    %c0_34 = arith.constant 0 : index
    %41 = vector.load %arg2[%c2_31, %c0_32, %c0_33, %c0_34] : memref<3x3x4x128xbf16, #tpu.memory_space<vmem>>, vector<1x1x4x128xbf16>
    %42 = vector.shape_cast %41 : vector<1x1x4x128xbf16> to vector<4x128xbf16>
    %cst_35 = arith.constant dense<0.000000e+00> : vector<256x128xf32>
    %43 = tpu.matmul %40, %42, %cst_35 {dimension_numbers = #tpu.dot_dimension_numbers<[1], [0], [0], [1], [0, 0, 1, 1], [], []>} : vector<256x4xbf16>, vector<4x128xbf16>, vector<256x128xf32> -> vector<256x128xf32>
    %44 = arith.addf %38, %43 : vector<256x128xf32>
    %45 = vector.extract_strided_slice %1 {offsets = [2, 1, 0], sizes = [16, 16, 4], strides = [1, 1, 1]} : vector<18x18x4xbf16> to vector<16x16x4xbf16>
    %46 = vector.shape_cast %45 : vector<16x16x4xbf16> to vector<256x4xbf16>
    %c2_36 = arith.constant 2 : index
    %c1_37 = arith.constant 1 : index
    %c0_38 = arith.constant 0 : index
    %c0_39 = arith.constant 0 : index
    %47 = vector.load %arg2[%c2_36, %c1_37, %c0_38, %c0_39] : memref<3x3x4x128xbf16, #tpu.memory_space<vmem>>, vector<1x1x4x128xbf16>
    %48 = vector.shape_cast %47 : vector<1x1x4x128xbf16> to vector<4x128xbf16>
    %cst_40 = arith.constant dense<0.000000e+00> : vector<256x128xf32>
    %49 = tpu.matmul %46, %48, %cst_40 {dimension_numbers = #tpu.dot_dimension_numbers<[1], [0], [0], [1], [0, 0, 1, 1], [], []>} : vector<256x4xbf16>, vector<4x128xbf16>, vector<256x128xf32> -> vector<256x128xf32>
    %50 = arith.addf %44, %49 : vector<256x128xf32>
    %51 = vector.extract_strided_slice %1 {offsets = [2, 2, 0], sizes = [16, 16, 4], strides = [1, 1, 1]} : vector<18x18x4xbf16> to vector<16x16x4xbf16>
    %52 = vector.shape_cast %51 : vector<16x16x4xbf16> to vector<256x4xbf16>
    %c2_41 = arith.constant 2 : index
    %c2_42 = arith.constant 2 : index
    %c0_43 = arith.constant 0 : index
    %c0_44 = arith.constant 0 : index
    %53 = vector.load %arg2[%c2_41, %c2_42, %c0_43, %c0_44] : memref<3x3x4x128xbf16, #tpu.memory_space<vmem>>, vector<1x1x4x128xbf16>
    %54 = vector.shape_cast %53 : vector<1x1x4x128xbf16> to vector<4x128xbf16>
    %cst_45 = arith.constant dense<0.000000e+00> : vector<256x128xf32>
    %55 = tpu.matmul %52, %54, %cst_45 {dimension_numbers = #tpu.dot_dimension_numbers<[1], [0], [0], [1], [0, 0, 1, 1], [], []>} : vector<256x4xbf16>, vector<4x128xbf16>, vector<256x128xf32> -> vector<256x128xf32>
    %56 = arith.addf %50, %55 : vector<256x128xf32>
    %c0_46 = arith.constant 0 : index
    %c0_47 = arith.constant 0 : index
    %57 = vector.load %arg3[%c0_46, %c0_47] : memref<1x128xf32, #tpu.memory_space<vmem>>, vector<1x128xf32>
    %58 = vector.broadcast %57 : vector<1x128xf32> to vector<256x128xf32>
    %59 = arith.mulf %56, %58 : vector<256x128xf32>
    %c0_48 = arith.constant 0 : index
    %c0_49 = arith.constant 0 : index
    %60 = vector.load %arg4[%c0_48, %c0_49] : memref<1x128xf32, #tpu.memory_space<vmem>>, vector<1x128xf32>
    %61 = vector.broadcast %60 : vector<1x128xf32> to vector<256x128xf32>
    %62 = arith.addf %59, %61 : vector<256x128xf32>
    %63 = vector.extract_strided_slice %62 {offsets = [0, 0], sizes = [256, 8], strides = [1, 1]} : vector<256x128xf32> to vector<256x8xf32>
    %64 = vector.shape_cast %63 : vector<256x8xf32> to vector<1x256x8xf32>
    %c0_50 = arith.constant 0 : index
    %c0_51 = arith.constant 0 : index
    %c0_52 = arith.constant 0 : index
    %65 = vector.load %arg5[%c0_50, %c0_51, %c0_52] : memref<1x256x8xf32, #tpu.memory_space<vmem>>, vector<1x256x8xf32>
    tpu.vector_store %arg5[%c0_50, %c0_51, %c0_52], %64 {strides = array<i32>} : memref<1x256x8xf32, #tpu.memory_space<vmem>>, vector<1x256x8xf32>,
    return
  }
  func.func @transform_0(%arg0: i32) -> (i32, i32, i32, i32) {
    %c0_i32 = arith.constant 0 : i32
    %c0_i32_0 = arith.constant 0 : i32
    %c0_i32_1 = arith.constant 0 : i32
    %c0_i32_2 = arith.constant 0 : i32
    return %arg0, %c0_i32, %c0_i32_0, %c0_i32_1 : i32, i32, i32, i32
  }
  func.func @transform_1(%arg0: i32) -> (i32, i32, i32, i32) {
    %c0_i32 = arith.constant 0 : i32
    %c0_i32_0 = arith.constant 0 : i32
    %c0_i32_1 = arith.constant 0 : i32
    %c0_i32_2 = arith.constant 0 : i32
    %c0_i32_3 = arith.constant 0 : i32
    return %c0_i32, %c0_i32_0, %c0_i32_1, %c0_i32_2 : i32, i32, i32, i32
  }
  func.func @transform_2(%arg0: i32) -> (i32, i32) {
    %c0_i32 = arith.constant 0 : i32
    %c0_i32_0 = arith.constant 0 : i32
    %c0_i32_1 = arith.constant 0 : i32
    return %c0_i32, %c0_i32_0 : i32, i32
  }
  func.func @transform_3(%arg0: i32) -> (i32, i32) {
    %c0_i32 = arith.constant 0 : i32
    %c0_i32_0 = arith.constant 0 : i32
    %c0_i32_1 = arith.constant 0 : i32
    return %c0_i32, %c0_i32_0 : i32, i32
  }
  func.func @transform_4(%arg0: i32) -> (i32, i32, i32) {
    %c0_i32 = arith.constant 0 : i32
    %c0_i32_0 = arith.constant 0 : i32
    %c0_i32_1 = arith.constant 0 : i32
    return %arg0, %c0_i32, %c0_i32_0 : i32, i32, i32
  }
}

</mosaic_0001>

<bundles_post_ra>
// kernel: conv2dn_forward.2
= control target key start
LH: loop header
LB: loop body
LE: loop exit
PB: predicated region body
PF: predicated region fallthrough
CT: control target
= control target key end

     0   :  { %s3830_s12 = smov 0   ;;  %s5229_s0 = inlined_call_operand.vmem [shape: bf16[2,18,18,4], index: 0, kind: input, shape index: {}]   ;;  %s5230_s1 = inlined_call_operand.vmem [shape: bf16[3,3,4,128], index: 1, kind: input, shape index: {}]   ;;  %s5231_s2 = inlined_call_operand.vmem [shape: f32[2,1,128], index: 2, kind: output, shape index: {0}]   ;;  %s5232_s3 = inlined_call_operand.vmem [shape: f32[2,1,128], index: 3, kind: output, shape index: {1}]  }
   0x1 LB: > { %s3072_s13 = sadd.s32 4294967295, %s3808_s12   ;;  %p3076_p0 = scmp.ge.s32.totalorder %s3808_s12, 1  ;;  %s3808_s12 = sphi %s3830_s12, %s14_s12  }
   0x2   : > { %p140_p1 = scmp.lt.s32.totalorder %s3808_s12, 3 }
   0x4   : > { %p141_p2 = pnand %p3076_p0, %p140_p1 }
   0x6   : > { %144 = sbr.rel (%p141_p2) target bundleno = 572 (0x23c), region = 28 }
   0xb   : > { %v3078_v0 = vld [vmem:[%s5230_s1 + $0x2] sm:$0x3]  ;;  %vm718_vm0 = vcmask 1041408   ;;  %p165_p3 = scmp.lt.s32.totalorder %s3072_s13, 1  ;;  %v231_v2 = vld [vmem:[%s5230_s1] sm:$0x3] }
   0xc   : > { %3766 = vmatprep.subr.msk.bf16.mxu1 %vm718_vm0, %v3078_v0  ;;  %3765 = vmatprep.subr.msk.bf16.mxu0 %vm718_vm0, %v3078_v0  ;;  %v720_v1 = vsel %vm718_vm0, %v3078_v0, 0  ;;  %v3159_v3 = vld [vmem:[%s5230_s1 + $0x4] sm:$0x3]  ;;  %vm232_vm1 = vsmask.f32 3328  ;;  %v3861_v4 = vsel %vm718_vm0, %v231_v2, 0 }
   0xd   : > { %3764 = vmatpush3.bf16.msra.mxu1 %v720_v1  ;;  %3458 = vmatpush3.bf16.msra.mxu0 %v720_v1  ;;  %s5388_s13 = smov (!%p165_p3, %s3072_s13), 1  ;;  %vm233_vm2 = vsmask.f32 7440  ;;  %v3864_v5 = vsel %vm718_vm0, %v3159_v3, 0  ;;  %vm669_vm3 = vcmask 31744   ;;  %v5276_v32 = vmov 0 }
   0xe   : > { %3767 = vmatprep.subr.msk.bf16.mxu1 %vm718_vm0, %v231_v2  ;;  %3768 = vmatprep.subr.msk.bf16.mxu0 %vm718_vm0, %v3159_v3  ;;  %s3775_s20 = smul.u32 216, %s5388_s13  ;;  %vm3903_vm4 = vmor %vm232_vm1, %vm233_vm2  ;;  %vm1191_vm5 = vcmask 1042432   ;;  %vm1192_vm6 = vcmask 1046532   ;;  %s172_s11 = scalar_lea.vmem %s5231_s2, %s5388_s13 }
   0xf   : > { %v5277_v32 = vsel %vm3903_vm4, 4294967295, %v5276_v32  ;;  %vm4226_vm7 = vmor %vm1191_vm5, %vm1192_vm6  ;;  %s175_s16 = scalar_lea.vmem %s5232_s3, %s5388_s13 }
  0x10   : > { %s3858_s23 = scalar_lea.vmem %s5229_s0, %s3775_s20  ;;  %5278 = vst [vmem:[#allocation2_spill] sm:$0xff] %v5277_v32 }
  0x11   : > { %v3867_v6 = vld [vmem:[%s3858_s23] sm:$0xf]  ;;  %v3870_v7 = vld [vmem:[%s3858_s23 + $0x4] sm:$0xf]  ;;  %v3873_v8 = vld [vmem:[%s3858_s23 + $0x8] sm:$0x1] }
  0x12   : > { %v236_v9 = vshrl.u32 %v3867_v6, 16  ;;  %v239_v10 = vshll.u32 %v3867_v6, 16  ;;  %v245_v11 = vshll.u32 %v3870_v7, 16  ;;  %v249_v12 = vshrl.u32 %v3870_v7, 16  ;;  %v3880_v13 = vld [vmem:[%s3858_s23 + $0x60] sm:$0xf] }
  0x13   : > { %v255_v14 = vshll.u32 %v3873_v8, 16  ;;  %v3885_v16 = vld [vmem:[%s3858_s23 + $0x64] sm:$0xf]  ;;  %v3888_v17 = vld [vmem:[%s3858_s23 + $0x68] sm:$0x1]  ;;  %v428_v23 = vshrl.u32 %v3880_v13, 16 }
  0x14   : > { %v238_v18 = vrot.slane %v236_v9, 4  ;;  %v241_v19 = vrot.slane %v239_v10, 5  ;;  %v247_v20 = vrot.slane %v245_v11, 5  ;;  %v251_v21 = vrot.slane %v249_v12, 4  ;;  %v3896_v30 = vld [vmem:[%s3858_s23 + $0xc] sm:$0xf] }
  0x15   : > { %v257_v22 = vrot.slane %v255_v14, 5  ;;  %v431_v24 = vshll.u32 %v3880_v13, 16  ;;  %v437_v25 = vshll.u32 %v3885_v16, 16  ;;  %v441_v28 = vshrl.u32 %v3885_v16, 16  ;;  %v3899_v31 = vld [vmem:[%s3858_s23 + $0x10] sm:$0xf] }
  0x16   : > { %v242_v26 = vor.u32 %v241_v19, %v238_v18  ;;  %v252_v27 = vor.u32 %v251_v21, %v247_v20  ;;  %v447_v29 = vshll.u32 %v3888_v17, 16  ;;  %v430_v33 = vrot.slane %v428_v23, 4  ;;  %v3910_v42 = vld [vmem:[%s3858_s23 + $0x14] sm:$0x1]  ;;  %v3921_v54 = vld [vmem:[%s3858_s23 + $0x6c] sm:$0xf] }
  0x17   : > { %v433_v34 = vrot.slane %v431_v24, 5  ;;  %v439_v35 = vrot.slane %v437_v25, 5  ;;  %v443_v39 = vrot.slane %v441_v28, 4  ;;  %v260_v43 = vshrl.u32 %v3896_v30, 16  ;;  %5279 = vst [vmem:[#allocation3_spill] sm:$0xff] %v3921_v54 }
  0x18   : > { %v243_v37 = vrot.slane %v242_v26, 4  ;;  %v253_v38 = vrot.slane %v252_v27, 4  ;;  %v449_v40 = vrot.slane %v447_v29, 5  ;;  %v263_v44 = vshll.u32 %v3896_v30, 16  ;;  %v3925_v59 = vld [vmem:[%s3858_s23 + $0x70] sm:$0xf] }
  0x19   : > { %v434_v41 = vor.u32 %v433_v34, %v430_v33  ;;  %v269_v45 = vshll.u32 %v3899_v31, 16  ;;  %v444_v48 = vor.u32 %v443_v39, %v439_v35  ;;  %v273_v49 = vshrl.u32 %v3899_v31, 16  ;;  %v3933_v0 = vld [vmem:[%s3858_s23 + $0x74] sm:$0x1]  ;;  %v3939_v10 = vld [vmem:[%s3858_s23 + $0x18] sm:$0xf] }
  0x1a   : > { %v248_v46 = vsel %vm3903_vm4, %v243_v37, %v247_v20  ;;  %v258_v47 = vsel %vm3903_vm4, %v253_v38, %v257_v22  ;;  %v262_v52 = vrot.slane %v260_v43, 4  ;;  %v265_v53 = vrot.slane %v263_v44, 5  ;;  %5280 = vst [vmem:[#allocation4_spill] sm:$0xff] %v3933_v0  ;;  %v3948_v23 = vld [vmem:[%s3858_s23 + $0x1c] sm:$0xf] }
  0x1b   : > { %v3079_v50 = vcombine.low %v248_v46, %v258_v47  ;;  %v435_v51 = vrot.slane %v434_v41, 4  ;;  %v445_v55 = vrot.slane %v444_v48, 4  ;;  %v271_v56 = vrot.slane %v269_v45, 5  ;;  %v3955_v27 = vld [vmem:[%s3858_s23 + $0x20] sm:$0x1] }
  0x1c   : > { %v275_v57 = vrot.slane %v273_v49, 4  ;;  %v279_v58 = vshll.u32 %v3910_v42, 16  ;;  %v266_v61 = vor.u32 %v265_v53, %v262_v52  ;;  %v452_v9 = vshrl.u32 %v3921_v54, 16  ;;  %v3962_v37 = vld [vmem:[%s3858_s23 + $0x78] sm:$0xf] }
  0x1d   : > { %3459 = vmatprep.mubr.msk.bf16.mxu0 %vm669_vm3, %v3079_v50  ;;  %v440_v60 = vsel %vm3903_vm4, %v435_v51, %v439_v35  ;;  %v450_v1 = vsel %vm3903_vm4, %v445_v55, %v449_v40  ;;  %v455_v14 = vshll.u32 %v3921_v54, 16  ;;  %v461_v18 = vshll.u32 %v3925_v59, 16  ;;  %5282 = vst [vmem:[#allocation6_spill] sm:$0xff] %v3962_v37  ;;  %v3970_v43 = vld [vmem:[%s5230_s1 + $0x8] sm:$0x3] }
  0x1e   : > { %v276_v2 = vor.u32 %v275_v57, %v271_v56  ;;  %v281_v3 = vrot.slane %v279_v58, 5  ;;  %v3941_v11 = vcombine.low %v440_v60, %v450_v1  ;;  %v267_v12 = vrot.slane %v266_v61, 4  ;;  %v3975_v48 = vld [vmem:[%s3858_s23 + $0x7c] sm:$0xf]  ;;  %v3983_v58 = vld [vmem:[%s3858_s23 + $0x80] sm:$0x1] }
  0x1f   : > { %v454_v20 = vrot.slane %v452_v9, 4  ;;  %v465_v21 = vshrl.u32 %v3925_v59, 16  ;;  %v471_v22 = vshll.u32 %v3933_v0, 16  ;;  %v457_v25 = vrot.slane %v455_v14, 5  ;;  %5284 = vst [vmem:[#allocation8_spill] sm:$0xff] %v3975_v48  ;;  %5285 = vst [vmem:[#allocation9_spill] sm:$0xff] %v3983_v58 }
  0x20   : > { %5281 = vst [vmem:[#allocation5_spill] sm:$0xff] %v3941_v11  ;;  %v277_v19 = vrot.slane %v276_v2, 4  ;;  %3475 = vmatprep.mubr.msk.bf16.mxu1 %vm669_vm3, %v3941_v11  ;;  %v272_v24 = vsel %vm3903_vm4, %v267_v12, %v271_v56  ;;  %v463_v26 = vrot.slane %v461_v18, 5  ;;  %v284_v28 = vshrl.u32 %v3939_v10, 16  ;;  %v3997_v18 = vld [vmem:[%s3858_s23 + $0x28] sm:$0xf] }
  0x21   : > { %v467_v33 = vrot.slane %v465_v21, 4  ;;  %v473_v34 = vrot.slane %v471_v22, 5  ;;  %v287_v35 = vshll.u32 %v3939_v10, 16  ;;  %v458_v39 = vor.u32 %v457_v25, %v454_v20 }
  0x22   : > { %v282_v29 = vsel %vm3903_vm4, %v277_v19, %v281_v3  ;;  %v286_v40 = vrot.slane %v284_v28, 4  ;;  %v293_v41 = vshll.u32 %v3948_v23, 16  ;;  %v297_v46 = vshrl.u32 %v3948_v23, 16  ;;  %v3989_v3 = vld [vmem:[%s3858_s23 + $0x24] sm:$0xf] }
  0x23   : > { %v3964_v38 = vcombine.low %v272_v24, %v282_v29  ;;  %v468_v44 = vor.u32 %v467_v33, %v463_v26  ;;  %v289_v45 = vrot.slane %v287_v35, 5  ;;  %v303_v47 = vshll.u32 %v3955_v27, 16  ;;  %v4005_v24 = vld [vmem:[%s5230_s1 + $0x6] sm:$0x3]  ;;  %v4010_v29 = vld [vmem:[%s3858_s23 + $0x2c] sm:$0x1] }
  0x24   : > { %v459_v49 = vrot.slane %v458_v39, 4  ;;  %v295_v50 = vrot.slane %v293_v41, 5  ;;  %v476_v51 = vshrl.u32 %v3962_v37, 16  ;;  %v479_v52 = vshll.u32 %v3962_v37, 16  ;;  %v4018_v41 = vld [vmem:[%s3858_s23 + $0x84] sm:$0xf] }
  0x25   : > { %5283 = vst [vmem:[#allocation7_spill] sm:$0xff] %v3964_v38  ;;  %3460 = vmatmul.mubr.msk.bf16.vlgmr.msra.gmra.mxu0 %vm669_vm3, %v3964_v38  ;;  %v469_v53 = vrot.slane %v468_v44, 4  ;;  %v290_v55 = vor.u32 %v289_v45, %v286_v40  ;;  %v299_v56 = vrot.slane %v297_v46, 4  ;;  %v305_v57 = vrot.slane %v303_v47, 5  ;;  %v4165_v38 = vld [vmem:[%s3858_s23 + $0xb0] sm:$0x1] }
  0x26   : > { %3526 = vmatpush3.bf16.msra.mxu0 %v3864_v5  ;;  %v464_v60 = vsel %vm3903_vm4, %v459_v49, %v463_v26  ;;  %v478_v61 = vrot.slane %v476_v51, 4  ;;  %v481_v1 = vrot.slane %v479_v52, 5  ;;  %v485_v2 = vshll.u32 %v3975_v48, 16  ;;  %v4025_v49 = vld [vmem:[%s3858_s23 + $0x88] sm:$0xf]  ;;  %5297 = vst [vmem:[#allocation21_spill] sm:$0xff] %v4165_v38 }
  0x27   : > { %3770 = vmatprep.subr.msk.bf16.mxu0 %vm718_vm0, %v3970_v43  ;;  %v474_v5 = vsel %vm3903_vm4, %v469_v53, %v473_v34  ;;  %v291_v9 = vrot.slane %v290_v55, 4  ;;  %v300_v12 = vor.u32 %v299_v56, %v295_v50  ;;  %v489_v14 = vshrl.u32 %v3975_v48, 16  ;;  %v4187_v48 = vld [vmem:[%s3858_s23 + $0x5c] sm:$0x1] }
  0x28   : > { %v3999_v19 = vcombine.low %v464_v60, %v474_v5  ;;  %v482_v20 = vor.u32 %v481_v1, %v478_v61  ;;  %v487_v21 = vrot.slane %v485_v2, 5  ;;  %v495_v22 = vshll.u32 %v3983_v58, 16 }
  0x29   : > { %v296_v25 = vsel %vm3903_vm4, %v291_v9, %v295_v50  ;;  %v301_v26 = vrot.slane %v300_v12, 4  ;;  %v491_v28 = vrot.slane %v489_v14, 4  ;;  %v308_v33 = vshrl.u32 %v3989_v3, 16  ;;  %v4044_v9 = vld [vmem:[%s3858_s23 + $0x30] sm:$0xf] }
  0x2a   : > { %5286 = vst [vmem:[#allocation10_spill] sm:$0xff] %v3999_v19  ;;  %3476 = vmatmul.mubr.msk.bf16.vlgmr.msra.gmra.mxu1 %vm669_vm3, %v3999_v19  ;;  %v483_v34 = vrot.slane %v482_v20, 4  ;;  %v497_v35 = vrot.slane %v495_v22, 5  ;;  %v311_v39 = vshll.u32 %v3989_v3, 16  ;;  %v317_v40 = vshll.u32 %v3997_v18, 16 }
  0x2b   : > { %3492 = vmatpush3.bf16.msra.mxu1 %v3861_v4  ;;  %v306_v44 = vsel %vm3903_vm4, %v301_v26, %v305_v57  ;;  %v492_v45 = vor.u32 %v491_v28, %v487_v21  ;;  %v310_v46 = vrot.slane %v308_v33, 4  ;;  %v321_v47 = vshrl.u32 %v3997_v18, 16  ;;  %v4035_v57 = vld [vmem:[%s3858_s23 + $0x8c] sm:$0x1]  ;;  %v4049_v22 = vld [vmem:[%s3858_s23 + $0x34] sm:$0xf] }
  0x2c   : > { %v4027_v50 = vcombine.low %v296_v25, %v306_v44  ;;  %v488_v51 = vsel %vm3903_vm4, %v483_v34, %v487_v21  ;;  %v313_v52 = vrot.slane %v311_v39, 5  ;;  %v319_v53 = vrot.slane %v317_v40, 5  ;;  %3769 = vmatprep.subr.msk.bf16.mxu1 %vm718_vm0, %v4005_v24 }
  0x2d   : > { %v493_v4 = vrot.slane %v492_v45, 4  ;;  %v323_v55 = vrot.slane %v321_v47, 4  ;;  %v327_v56 = vshll.u32 %v4010_v29, 16  ;;  %v500_v60 = vshrl.u32 %v4018_v41, 16 }
  0x2e   : > { %5287 = vst [vmem:[#allocation11_spill] sm:$0xff] %v4027_v50  ;;  %3463 = vmatprep.mubr.msk.bf16.mxu0 %vm669_vm3, %v4027_v50  ;;  %v314_v61 = vor.u32 %v313_v52, %v310_v46  ;;  %v503_v1 = vshll.u32 %v4018_v41, 16  ;;  %v509_v2 = vshll.u32 %v4025_v49, 16  ;;  %v513_v5 = vshrl.u32 %v4025_v49, 16  ;;  %v4060_v46 = vld [vmem:[%s3858_s23 + $0x38] sm:$0x1] }
  0x2f   : > { %v498_v12 = vsel %vm3903_vm4, %v493_v4, %v497_v35  ;;  %v324_v14 = vor.u32 %v323_v55, %v319_v53  ;;  %v329_v20 = vrot.slane %v327_v56, 5  ;;  %v502_v21 = vrot.slane %v500_v60, 4  ;;  %v4065_v52 = vld [vmem:[%s3858_s23 + $0x90] sm:$0xf] }
  0x30   : > { %v4051_v25 = vcombine.low %v488_v51, %v498_v12  ;;  %v315_v26 = vrot.slane %v314_v61, 4  ;;  %v505_v28 = vrot.slane %v503_v1, 5  ;;  %v511_v33 = vrot.slane %v509_v2, 5  ;;  %v4070_v61 = vld [vmem:[%s3858_s23 + $0x94] sm:$0xf] }
  0x31   : > { %v325_v34 = vrot.slane %v324_v14, 4  ;;  %v515_v39 = vrot.slane %v513_v5, 4  ;;  %v519_v40 = vshll.u32 %v4035_v57, 16  ;;  %v332_v44 = vshrl.u32 %v4044_v9, 16 }
  0x32   : > { %5288 = vst [vmem:[#allocation12_spill] sm:$0xff] %v4051_v25  ;;  %3479 = vmatprep.mubr.msk.bf16.mxu1 %vm669_vm3, %v4051_v25  ;;  %v320_v35 = vsel %vm3903_vm4, %v315_v26, %v319_v53  ;;  %v506_v45 = vor.u32 %v505_v28, %v502_v21  ;;  %v335_v47 = vshll.u32 %v4044_v9, 16  ;;  %v341_v51 = vshll.u32 %v4049_v22, 16  ;;  %v4116_v25 = vld [vmem:[%s3858_s23 + $0xa0] sm:$0xf] }
  0x33   : > { %v330_v4 = vsel %vm3903_vm4, %v325_v34, %v329_v20  ;;  %v516_v55 = vor.u32 %v515_v39, %v511_v33  ;;  %v521_v56 = vrot.slane %v519_v40, 5  ;;  %v334_v60 = vrot.slane %v332_v44, 4  ;;  %v4082_v34 = vld [vmem:[%s3858_s23 + $0x98] sm:$0x1]  ;;  %v4087_v44 = vld [vmem:[%s3858_s23 + $0x3c] sm:$0xf] }
  0x34   : > { %v4072_v53 = vcombine.low %v320_v35, %v330_v4  ;;  %v507_v1 = vrot.slane %v506_v45, 4  ;;  %v337_v2 = vrot.slane %v335_v47, 5  ;;  %v343_v5 = vrot.slane %v341_v51, 5  ;;  %v4092_v4 = vld [vmem:[%s3858_s23 + $0x40] sm:$0xf] }
  0x35   : > { %v517_v12 = vrot.slane %v516_v55, 4  ;;  %v345_v14 = vshrl.u32 %v4049_v22, 16  ;;  %v351_v21 = vshll.u32 %v4060_v46, 16  ;;  %v524_v20 = vshrl.u32 %v4065_v52, 16 }
  0x36   : > { %5289 = vst [vmem:[#allocation13_spill] sm:$0xff] %v4072_v53  ;;  %3464 = vmatmul.mubr.msk.bf16.gmra.mxu0 %vm669_vm3, %v4072_v53  ;;  %v512_v26 = vsel %vm3903_vm4, %v507_v1, %v511_v33  ;;  %v338_v28 = vor.u32 %v337_v2, %v334_v60  ;;  %v527_v39 = vshll.u32 %v4065_v52, 16  ;;  %v533_v40 = vshll.u32 %v4070_v61, 16 }
  0x37   : > { %v522_v35 = vsel %vm3903_vm4, %v517_v12, %v521_v56  ;;  %v347_v45 = vrot.slane %v345_v14, 4  ;;  %v353_v47 = vrot.slane %v351_v21, 5  ;;  %v526_v51 = vrot.slane %v524_v20, 4  ;;  %v4104_v14 = vld [vmem:[%s3858_s23 + $0x44] sm:$0x1] }
  0x38   : > { %v4094_v33 = vcombine.low %v512_v26, %v522_v35  ;;  %v339_v55 = vrot.slane %v338_v28, 4  ;;  %v529_v60 = vrot.slane %v527_v39, 5  ;;  %v535_v1 = vrot.slane %v533_v40, 5  ;;  %v4109_v26 = vld [vmem:[%s3858_s23 + $0x9c] sm:$0xf] }
  0x39   : > { %v348_v2 = vor.u32 %v347_v45, %v343_v5  ;;  %v537_v36 = vshrl.u32 %v4070_v61, 16  ;;  %v543_v63 = vshll.u32 %v4082_v34, 16  ;;  %v356_v15 = vshrl.u32 %v4087_v44, 16 }
  0x3a   : > { %5290 = vst [vmem:[#allocation14_spill] sm:$0xff] %v4094_v33  ;;  %3480 = vmatmul.mubr.msk.bf16.gmra.mxu1 %vm669_vm3, %v4094_v33  ;;  %v344_v56 = vsel %vm3903_vm4, %v339_v55, %v343_v5  ;;  %v530_v12 = vor.u32 %v529_v60, %v526_v51  ;;  %v359_v21 = vshll.u32 %v4087_v44, 16  ;;  %v365_v20 = vshll.u32 %v4092_v4, 16 }
  0x3b   : > { %v349_v28 = vrot.slane %v348_v2, 4  ;;  %v539_v39 = vrot.slane %v537_v36, 4  ;;  %v545_v40 = vrot.slane %v543_v63, 5  ;;  %v358_v35 = vrot.slane %v356_v15, 4 }
  0x3c   : > { %v531_v45 = vrot.slane %v530_v12, 4  ;;  %v361_v62 = vrot.slane %v359_v21, 5  ;;  %v367_v33 = vrot.slane %v365_v20, 5  ;;  %v369_v5 = vshrl.u32 %v4092_v4, 16  ;;  %v4124_v21 = vld [vmem:[%s3858_s23 + $0xa4] sm:$0x1] }
  0x3d   : > { %v354_v51 = vsel %vm3903_vm4, %v349_v28, %v353_v47  ;;  %v540_v55 = vor.u32 %v539_v39, %v535_v1  ;;  %v375_v60 = vshll.u32 %v4104_v14, 16  ;;  %v548_v2 = vshrl.u32 %v4109_v26, 16  ;;  %5292 = vst [vmem:[#allocation16_spill] sm:$0xff] %v4124_v21  ;;  %v4127_v20 = vld [vmem:[%s3858_s23 + $0x48] sm:$0xf] }
  0x3e   : > { %v4119_v36 = vcombine.low %v344_v56, %v354_v51  ;;  %v536_v15 = vsel %vm3903_vm4, %v531_v45, %v535_v1  ;;  %v362_v63 = vor.u32 %v361_v62, %v358_v35  ;;  %v371_v12 = vrot.slane %v369_v5, 4 }
  0x3f   : > { %v541_v47 = vrot.slane %v540_v55, 4  ;;  %v377_v28 = vrot.slane %v375_v60, 5  ;;  %v550_v39 = vrot.slane %v548_v2, 4  ;;  %v551_v19 = vshll.u32 %v4109_v26, 16  ;;  %v4138_v55 = vld [vmem:[%s3858_s23 + $0x4c] sm:$0xf] }
  0x40   : > { %5291 = vst [vmem:[#allocation15_spill] sm:$0xff] %v4119_v36  ;;  %3467 = vmatprep.mubr.msk.bf16.mxu0 %vm669_vm3, %v4119_v36  ;;  %v363_v56 = vrot.slane %v362_v63, 4  ;;  %v372_v51 = vor.u32 %v371_v12, %v367_v33  ;;  %v557_v1 = vshll.u32 %v4116_v25, 16  ;;  %v561_v62 = vshrl.u32 %v4116_v25, 16  ;;  %v4146_v36 = vld [vmem:[%s3858_s23 + $0x50] sm:$0x1] }
  0x41   : > { %v546_v35 = vsel %vm3903_vm4, %v541_v47, %v545_v40  ;;  %v553_v45 = vrot.slane %v551_v19, 5  ;;  %v567_v5 = vshll.u32 %v4124_v21, 16  ;;  %v380_v60 = vshrl.u32 %v4127_v20, 16  ;;  %v4149_v47 = vld [vmem:[%s3858_s23 + $0xa8] sm:$0xf] }
  0x42   : > { %v4141_v2 = vcombine.low %v536_v15, %v546_v35  ;;  %v368_v63 = vsel %vm3903_vm4, %v363_v56, %v367_v33  ;;  %v373_v12 = vrot.slane %v372_v51, 4  ;;  %v559_v11 = vrot.slane %v557_v1, 5  ;;  %5294 = vst [vmem:[#allocation18_spill] sm:$0xff] %v4149_v47 }
  0x43   : > { %v554_v53 = vor.u32 %v553_v45, %v550_v39  ;;  %v563_v50 = vrot.slane %v561_v62, 4  ;;  %v569_v40 = vrot.slane %v567_v5, 5  ;;  %v382_v19 = vrot.slane %v380_v60, 4  ;;  %v4162_v45 = vld [vmem:[%s3858_s23 + $0xac] sm:$0xf] }
  0x44   : > { %5293 = vst [vmem:[#allocation17_spill] sm:$0xff] %v4141_v2  ;;  %3483 = vmatprep.mubr.msk.bf16.mxu1 %vm669_vm3, %v4141_v2  ;;  %v378_v15 = vsel %vm3903_vm4, %v373_v12, %v377_v28  ;;  %v383_v33 = vshll.u32 %v4127_v20, 16  ;;  %v389_v56 = vshll.u32 %v4138_v55, 16  ;;  %v393_v51 = vshrl.u32 %v4138_v55, 16  ;;  %5296 = vst [vmem:[#allocation20_spill] sm:$0xff] %v4162_v45 }
  0x45   : > { %v4158_v1 = vcombine.low %v368_v63, %v378_v15  ;;  %v555_v39 = vrot.slane %v554_v53, 4  ;;  %v564_v62 = vor.u32 %v563_v50, %v559_v11  ;;  %v399_v35 = vshll.u32 %v4146_v36, 16 }
  0x46   : > { %v385_v5 = vrot.slane %v383_v33, 5  ;;  %v391_v60 = vrot.slane %v389_v56, 5  ;;  %v395_v2 = vrot.slane %v393_v51, 4  ;;  %v572_v28 = vshrl.u32 %v4149_v47, 16  ;;  %v4175_v51 = vld [vmem:[%s3858_s23 + $0x54] sm:$0xf] }
  0x47   : > { %5295 = vst [vmem:[#allocation19_spill] sm:$0xff] %v4158_v1  ;;  %3468 = vmatmul.mubr.msk.bf16.gmra.mxu0 %vm669_vm3, %v4158_v1  ;;  %v560_v53 = vsel %vm3903_vm4, %v555_v39, %v559_v11  ;;  %v565_v50 = vrot.slane %v564_v62, 4  ;;  %v401_v63 = vrot.slane %v399_v35, 5  ;;  %v575_v12 = vshll.u32 %v4149_v47, 16  ;;  %v4182_v62 = vld [vmem:[%s3858_s23 + $0x58] sm:$0xf] }
  0x48   : > { %v386_v15 = vor.u32 %v385_v5, %v382_v19  ;;  %v396_v58 = vor.u32 %v395_v2, %v391_v60  ;;  %v574_v33 = vrot.slane %v572_v28, 4  ;;  %v581_v56 = vshll.u32 %v4162_v45, 16 }
  0x49   : > { %v570_v1 = vsel %vm3903_vm4, %v565_v50, %v569_v40  ;;  %v577_v37 = vrot.slane %v575_v12, 5  ;;  %v585_v11 = vshrl.u32 %v4162_v45, 16  ;;  %v591_v39 = vshll.u32 %v4165_v38, 16 }
  0x4a   : > { %v4184_v2 = vcombine.low %v560_v53, %v570_v1  ;;  %v387_v19 = vrot.slane %v386_v15, 4  ;;  %v397_v35 = vrot.slane %v396_v58, 4  ;;  %v583_v5 = vrot.slane %v581_v56, 5 }
  0x4b   : > { %v578_v28 = vor.u32 %v577_v37, %v574_v33  ;;  %v587_v0 = vrot.slane %v585_v11, 4  ;;  %v593_v54 = vrot.slane %v591_v39, 5  ;;  %v404_v40 = vshrl.u32 %v4175_v51, 16  ;;  %v4199_v37 = vld [vmem:[%s3858_s23 + $0xb4] sm:$0xf] }
  0x4c   : > { %5298 = vst [vmem:[#allocation22_spill] sm:$0xff] %v4184_v2  ;;  %3484 = vmatmul.mubr.msk.bf16.gmra.mxu1 %vm669_vm3, %v4184_v2  ;;  %v392_v50 = vsel %vm3903_vm4, %v387_v19, %v391_v60  ;;  %v402_v1 = vsel %vm3903_vm4, %v397_v35, %v401_v63  ;;  %v407_v58 = vshll.u32 %v4175_v51, 16  ;;  %v413_v53 = vshll.u32 %v4182_v62, 16  ;;  %5299 = vst [vmem:[#allocation23_spill] sm:$0xff] %v4199_v37  ;;  %v4204_v11 = vld [vmem:[%s3858_s23 + $0xb8] sm:$0xf] }
  0x4d   : > { %v4201_v12 = vcombine.low %v392_v50, %v402_v1  ;;  %v579_v15 = vrot.slane %v578_v28, 4  ;;  %v588_v33 = vor.u32 %v587_v0, %v583_v5  ;;  %v406_v56 = vrot.slane %v404_v40, 4 }
  0x4e   : > { %v409_v39 = vrot.slane %v407_v58, 5  ;;  %v415_v2 = vrot.slane %v413_v53, 5  ;;  %v417_v60 = vshrl.u32 %v4182_v62, 16  ;;  %v423_v63 = vshll.u32 %v4187_v48, 16  ;;  %v4215_v58 = vld [vmem:[%s3858_s23 + $0xbc] sm:$0x1] }
  0x4f   : > { %5300 = vst [vmem:[#allocation24_spill] sm:$0xff] %v4201_v12  ;;  %3471 = vmatprep.mubr.msk.bf16.mxu0 %vm669_vm3, %v4201_v12  ;;  %v584_v19 = vsel %vm3903_vm4, %v579_v15, %v583_v5  ;;  %v589_v35 = vrot.slane %v588_v33, 4  ;;  %v596_v28 = vshrl.u32 %v4199_v37, 16  ;;  %v599_v0 = vshll.u32 %v4199_v37, 16 }
  0x50   : > { %v410_v40 = vor.u32 %v409_v39, %v406_v56  ;;  %v419_v50 = vrot.slane %v417_v60, 4  ;;  %v425_v1 = vrot.slane %v423_v63, 5  ;;  %v605_v53 = vshll.u32 %v4204_v11, 16 }
  0x51   : > { %v594_v38 = vsel %vm3903_vm4, %v589_v35, %v593_v54  ;;  %v598_v47 = vrot.slane %v596_v28, 4  ;;  %v601_v12 = vrot.slane %v599_v0, 5  ;;  %v609_v45 = vshrl.u32 %v4204_v11, 16 }
  0x52   : > { %v4221_v5 = vcombine.low %v584_v19, %v594_v38  ;;  %v411_v15 = vrot.slane %v410_v40, 4  ;;  %v420_v33 = vor.u32 %v419_v50, %v415_v2  ;;  %v607_v21 = vrot.slane %v605_v53, 5 }
  0x53   : > { %v602_v37 = vor.u32 %v601_v12, %v598_v47  ;;  %v611_v56 = vrot.slane %v609_v45, 4  ;;  %v615_v39 = vshll.u32 %v4215_v58, 16  ;;  %v3143_v54 = vrot.slane %v3867_v6, 9 }
  0x54   : > { %3487 = vmatprep.mubr.msk.bf16.mxu1 %vm669_vm3, %v4221_v5  ;;  %v416_v38 = vsel %vm3903_vm4, %v411_v15, %v415_v2  ;;  %v421_v63 = vrot.slane %v420_v33, 4  ;;  %v1196_v47 = vrot.slane %v3870_v7, 5  ;;  %v4238_v45 = vcombine.low %v3896_v30, %v3899_v31 }
  0x55   : > { %v603_v12 = vrot.slane %v602_v37, 4  ;;  %v612_v19 = vor.u32 %v611_v56, %v607_v21  ;;  %v617_v35 = vrot.slane %v615_v39, 5  ;;  %v3144_v28 = vrot.slane %v3896_v30, 9 }
  0x56   : > { %v426_v0 = vsel %vm3903_vm4, %v421_v63, %v425_v1  ;;  %v1197_v40 = vsel %vm4226_vm7, %v3143_v54, %v1196_v47  ;;  %v1198_v50 = vrot.slane %v1196_v47, 4  ;;  %v5303_v2 = vrot.slane %v3899_v31, 5 }
  0x57   : > { %v4247_v15 = vcombine.low %v416_v38, %v426_v0  ;;  %v608_v33 = vsel %vm3903_vm4, %v603_v12, %v607_v21  ;;  %v613_v37 = vrot.slane %v612_v19, 4  ;;  %v5305_v1 = vrot.slane %v3873_v8, 5 }
  0x58   : > { %v1205_v53 = vrot.slane %v5303_v2, 4  ;;  %v5304_v56 = vmov %v5303_v2  ;;  %v5306_v54 = vrot.slane %v3910_v42, 5  ;;  %v4265_v63 = vcombine.low %v3939_v10, %v3948_v23 }
  0x59   : > { %v1204_v30 = vsel %vm4226_vm7, %v3144_v28, %v5304_v56  ;;  %v1200_v39 = vsel %vm4226_vm7, %v1198_v50, %v5305_v1  ;;  %v3145_v21 = vrot.slane %v3939_v10, 9  ;;  %3472 = vmatmul.mubr.msk.bf16.gmra.mxu0 %vm669_vm3, %v4247_v15  ;;  %v618_v8 = vsel %vm3903_vm4, %v613_v37, %v617_v35 }
  0x5a   : > { %v1207_v38 = vsel %vm4226_vm7, %v1205_v53, %v5306_v54  ;;  %v3160_v31 = vcombine.low %v1197_v40, %v1200_v39  ;;  %v1210_v42 = vrot.slane %v3948_v23, 5  ;;  %v4275_v12 = vcombine.low %v608_v33, %v618_v8 }
  0x5b   : > { %v4272_v47 = vcombine.low %v1204_v30, %v1207_v38  ;;  %v1213_v19 = vrot.slane %v3955_v27, 5  ;;  %v1217_v0 = vrot.slane %v3997_v18, 5  ;;  %v3146_v35 = vrot.slane %v3989_v3, 9 }
  0x5c   : > { %5307 = vst [vmem:[#allocation25_spill] sm:$0xff] %v4275_v12  ;;  %3527 = vmatprep.mubr.msk.bf16.mxu0 %vm669_vm3, %v3160_v31  ;;  %v1211_v10 = vsel %vm4226_vm7, %v3145_v21, %v1210_v42  ;;  %v1212_v28 = vrot.slane %v1210_v42, 4  ;;  %3488 = vmatmul.mubr.msk.bf16.gmra.mxu1 %vm669_vm3, %v4275_v12  ;;  %v3147_v40 = vrot.slane %v4044_v9, 9  ;;  %v1224_v23 = vrot.slane %v4049_v22, 5 }
  0x5d   : > { %v5308_v27 = vcombine.low %v3867_v6, %v3870_v7  ;;  %v1219_v2 = vrot.slane %v1217_v0, 4  ;;  %v1220_v53 = vrot.slane %v4010_v29, 5  ;;  %v1227_v33 = vrot.slane %v4060_v46, 5  ;;  %v4310_v46 = vld [vmem:[%s5230_s1 + $0xc] sm:$0x3] }
  0x5e   : > { %v1214_v50 = vsel %vm4226_vm7, %v1212_v28, %v1213_v19  ;;  %v1226_v56 = vrot.slane %v1224_v23, 4  ;;  %v1839_v30 = vsel %vm718_vm0, %v3970_v43, 0  ;;  %v1231_v1 = vrot.slane %v4092_v4, 5  ;;  %v4327_v19 = vld [vmem:[%s5230_s1 + $0xa] sm:$0x3] }
  0x5f   : > { %3493 = vmatprep.mubr.msk.bf16.mxu1 %vm669_vm3, %v5308_v27  ;;  %v4295_v37 = vcombine.low %v1211_v10, %v1214_v50  ;;  %v1611_v6 = vsel %vm718_vm0, %v4005_v24, 0  ;;  %v1218_v7 = vsel %vm4226_vm7, %v3146_v35, %v1217_v0  ;;  %v1225_v39 = vsel %vm4226_vm7, %v3147_v40, %v1224_v23 }
  0x60   : > { %v1238_v29 = vrot.slane %v4138_v55, 5  ;;  %v1221_v43 = vsel %vm4226_vm7, %v1219_v2, %v1220_v53  ;;  %v1228_v24 = vsel %vm4226_vm7, %v1226_v56, %v1227_v33  ;;  %v3148_v54 = vrot.slane %v4087_v44, 9 }
  0x61   : > { %3528 = vmatmul.mubr.msk.bf16.vlgmr.msra.gmra.mxu0 %vm669_vm3, %v4272_v47  ;;  %v1234_v38 = vrot.slane %v4104_v14, 5  ;;  %v1233_v21 = vrot.slane %v1231_v1, 4  ;;  %v3149_v8 = vrot.slane %v4127_v20, 9  ;;  %v1241_v42 = vrot.slane %v4146_v36, 5 }
  0x62   : > { %3594 = vmatpush3.bf16.msra.mxu0 %v1839_v30  ;;  %3531 = vmatprep.mubr.msk.bf16.mxu0 %vm669_vm3, %v4295_v37  ;;  %v1240_v31 = vrot.slane %v1238_v29, 4  ;;  %v4335_v14 = vcombine.low %v1218_v7, %v1221_v43  ;;  %v4337_v10 = vcombine.low %v1225_v39, %v1228_v24  ;;  %v1232_v36 = vsel %vm4226_vm7, %v3148_v54, %v1231_v1 }
  0x63   : > { %3772 = vmatprep.subr.msk.bf16.mxu0 %vm718_vm0, %v4310_v46  ;;  %v1235_v28 = vsel %vm4226_vm7, %v1233_v21, %v1234_v38  ;;  %v1239_v0 = vsel %vm4226_vm7, %v3149_v8, %v1238_v29  ;;  %v1245_v40 = vrot.slane %v4182_v62, 5  ;;  %v1255_v23 = vrot.slane %v3888_v17, 5  ;;  %v5309_v8 = vld [vmem:[#allocation16_spill] sm:$0xff] }
  0x64   : > { %3494 = vmatmul.mubr.msk.bf16.vlgmr.msra.gmra.mxu1 %vm669_vm3, %v4238_v45  ;;  %v1242_v35 = vsel %vm4226_vm7, %v1240_v31, %v1241_v42  ;;  %v3150_v27 = vrot.slane %v4175_v51, 9  ;;  %v3151_v50 = vrot.slane %v3880_v13, 9  ;;  %v1252_v2 = vrot.slane %v3885_v16, 5  ;;  %v5310_v42 = vld [vmem:[#allocation20_spill] sm:$0xff] }
  0x65   : > { %3560 = vmatpush3.bf16.msra.mxu1 %v1611_v6  ;;  %3497 = vmatprep.mubr.msk.bf16.mxu1 %vm669_vm3, %v4265_v63  ;;  %v4356_v53 = vcombine.low %v3989_v3, %v3997_v18  ;;  %v4360_v33 = vcombine.low %v4044_v9, %v4049_v22  ;;  %v4364_v56 = vcombine.low %v4087_v44, %v4092_v4  ;;  %v1248_v3 = vrot.slane %v4187_v48, 5 }
  0x66   : > { %3771 = vmatprep.subr.msk.bf16.mxu1 %vm718_vm0, %v4327_v19  ;;  %v4368_v17 = vcombine.low %v4127_v20, %v4138_v55  ;;  %v4372_v30 = vcombine.low %v1232_v36, %v1235_v28  ;;  %v4374_v1 = vcombine.low %v1239_v0, %v1242_v35  ;;  %v4379_v18 = vcombine.low %v4018_v41, %v4025_v49  ;;  %v5311_v36 = vld [vmem:[#allocation18_spill] sm:$0xff] }
  0x67   : > { %v1247_v9 = vrot.slane %v1245_v40, 4  ;;  %v3154_v22 = vrot.slane %v4018_v41, 9  ;;  %v1273_v44 = vrot.slane %v4025_v49, 5  ;;  %v1276_v4 = vrot.slane %v4035_v57, 5 }
  0x68   : > { %v1246_v20 = vsel %vm4226_vm7, %v3150_v27, %v1245_v40  ;;  %v1253_v48 = vsel %vm4226_vm7, %v3151_v50, %v1252_v2  ;;  %v1254_v55 = vrot.slane %v1252_v2, 4  ;;  %v4392_v6 = vcombine.low %v4065_v52, %v4070_v61  ;;  %v5312_v40 = vld [vmem:[#allocation21_spill] sm:$0xff] }
  0x69   : > { %3532 = vmatmul.mubr.msk.bf16.gmra.mxu0 %vm669_vm3, %v4335_v14  ;;  %v1274_v41 = vsel %vm4226_vm7, %v3154_v22, %v1273_v44  ;;  %v1275_v49 = vrot.slane %v1273_v44, 4  ;;  %v3155_v57 = vrot.slane %v4065_v52, 9  ;;  %v1280_v7 = vrot.slane %v4070_v61, 5 }
  0x6a   : > { %3535 = vmatprep.mubr.msk.bf16.mxu0 %vm669_vm3, %v4337_v10  ;;  %v1259_v39 = vrot.slane %v3925_v59, 5  ;;  %v1283_v29 = vrot.slane %v4082_v34, 5  ;;  %v4406_v43 = vcombine.low %v4109_v26, %v4116_v25  ;;  %v3156_v24 = vrot.slane %v4109_v26, 9 }
  0x6b   : > { %v1249_v54 = vsel %vm4226_vm7, %v1247_v9, %v1248_v3  ;;  %v1277_v52 = vsel %vm4226_vm7, %v1275_v49, %v1276_v4  ;;  %v1281_v61 = vsel %vm4226_vm7, %v3155_v57, %v1280_v7  ;;  %v1282_v38 = vrot.slane %v1280_v7, 4  ;;  %v5313_v3 = vld [vmem:[#allocation23_spill] sm:$0xff]  ;;  %v5314_v57 = vld [vmem:[#allocation8_spill] sm:$0xff] }
  0x6c   : > { %3498 = vmatmul.mubr.msk.bf16.gmra.mxu1 %vm669_vm3, %v4356_v53  ;;  %v4415_v21 = vcombine.low %v1274_v41, %v1277_v52  ;;  %v1287_v34 = vrot.slane %v4116_v25, 5  ;;  %v1290_v31 = vrot.slane %v5309_v8, 5  ;;  %v4421_v28 = vcombine.low %v5311_v36, %v5310_v42 }
  0x6d   : > { %3501 = vmatprep.mubr.msk.bf16.mxu1 %vm669_vm3, %v4360_v33  ;;  %v1284_v26 = vsel %vm4226_vm7, %v1282_v38, %v1283_v29  ;;  %v3157_v0 = vrot.slane %v5311_v36, 9  ;;  %v1294_v35 = vrot.slane %v5310_v42, 5  ;;  %v1297_v27 = vrot.slane %v5312_v40, 5  ;;  %v5316_v42 = vld [vmem:[#allocation4_spill] sm:$0xff] }
  0x6e   : > { %v4430_v50 = vcombine.low %v1281_v61, %v1284_v26  ;;  %v1288_v25 = vsel %vm4226_vm7, %v3156_v24, %v1287_v34  ;;  %v1289_v2 = vrot.slane %v1287_v34, 4  ;;  %v4436_v9 = vcombine.low %v5313_v3, %v4204_v11 }
  0x6f   : > { %v1295_v22 = vsel %vm4226_vm7, %v3157_v0, %v1294_v35  ;;  %v1296_v44 = vrot.slane %v1294_v35, 4  ;;  %v3158_v4 = vrot.slane %v5313_v3, 9  ;;  %v1301_v41 = vrot.slane %v4204_v11, 5  ;;  %v5317_v0 = vld [vmem:[#allocation6_spill] sm:$0xff] }
  0x70   : > { %v1256_v49 = vsel %vm4226_vm7, %v1254_v55, %v1255_v23  ;;  %v1266_v7 = vrot.slane %v5314_v57, 5  ;;  %v1291_v29 = vsel %vm4226_vm7, %v1289_v2, %v1290_v31  ;;  %v1304_v24 = vrot.slane %v4215_v58, 5  ;;  %v5315_v55 = vld [vmem:[#allocation3_spill] sm:$0xff] }
  0x71   : > { %3536 = vmatmul.mubr.msk.bf16.gmra.mxu0 %vm669_vm3, %v4372_v30  ;;  %v4452_v52 = vcombine.low %v1288_v25, %v1291_v29  ;;  %v1298_v61 = vsel %vm4226_vm7, %v1296_v44, %v1297_v27  ;;  %v1302_v11 = vsel %vm4226_vm7, %v3158_v4, %v1301_v41  ;;  %v1303_v38 = vrot.slane %v1301_v41, 4  ;;  %v5318_v27 = vld [vmem:[#allocation9_spill] sm:$0xff]  ;;  %v4539_v4 = vld [vmem:[%s3858_s23 + $0xc0] sm:$0xf]  ;;  %v227_v41 = vld [vmem:[%s3858_s23 + $0xc8] sm:$0x1] }
  0x72   : > { %3539 = vmatprep.mubr.msk.bf16.mxu0 %vm669_vm3, %v4374_v1  ;;  %v4460_v23 = vcombine.low %v1246_v20, %v1249_v54  ;;  %v3152_v34 = vrot.slane %v5315_v55, 9  ;;  %v4463_v58 = vcombine.low %v1295_v22, %v1298_v61  ;;  %v4465_v8 = vcombine.low %v1253_v48, %v1256_v49  ;;  %v5319_v61 = vld [vmem:[#allocation7_spill] sm:$0xff] }
  0x73   : > { %v1261_v31 = vrot.slane %v1259_v39, 4  ;;  %v1262_v36 = vrot.slane %v5316_v42, 5  ;;  %v1305_v26 = vsel %vm4226_vm7, %v1303_v38, %v1304_v24  ;;  %v3153_v35 = vrot.slane %v5317_v0, 9  ;;  %v5321_v42 = vld [vmem:[#allocation13_spill] sm:$0xff] }
  0x74   : > { %3502 = vmatmul.mubr.msk.bf16.gmra.mxu1 %vm669_vm3, %v4364_v56  ;;  %v1268_v40 = vrot.slane %v1266_v7, 4  ;;  %v1269_v25 = vrot.slane %v5318_v27, 5  ;;  %v4472_v2 = vcombine.low %v1302_v11, %v1305_v26  ;;  %v4476_v20 = vcombine.low %v4175_v51, %v4182_v62  ;;  %v5325_v26 = vld [vmem:[#allocation5_spill] sm:$0xff] }
  0x75   : > { %3505 = vmatprep.mubr.msk.bf16.mxu1 %vm669_vm3, %v4368_v17  ;;  %v4482_v48 = vcombine.low %v3880_v13, %v3885_v16  ;;  %v1260_v54 = vsel %vm4226_vm7, %v3152_v34, %v1259_v39  ;;  %v1263_v3 = vsel %vm4226_vm7, %v1261_v31, %v1262_v36  ;;  %v1267_v51 = vsel %vm4226_vm7, %v3153_v35, %v1266_v7  ;;  %v5320_v34 = vld [vmem:[#allocation11_spill] sm:$0xff]  ;;  %v5324_v36 = vld [vmem:[#allocation24_spill] sm:$0xff] }
  0x76   : > { %v1270_v62 = vsel %vm4226_vm7, %v1268_v40, %v1269_v25  ;;  %v4498_v13 = vcombine.low %v1260_v54, %v1263_v3  ;;  %v4504_v39 = vcombine.low %v5315_v55, %v3925_v59  ;;  %v4510_v22 = vcombine.low %v5317_v0, %v5314_v57  ;;  %v4533_v59 = vld [vmem:[%s3858_s23 + $0xc4] sm:$0xf]  ;;  %v3284_v55 = vld [vmem:[%s5230_s1 + $0x10] sm:$0x3] }
  0x77   : > { %v4500_v16 = vcombine.low %v1267_v51, %v1270_v62  ;;  %v2037_v44 = vrot.slane %v4533_v59, 5  ;;  %v3228_v49 = vrot.slane %v4539_v4, 9  ;;  %v2040_v7 = vrot.slane %v227_v41, 5  ;;  %v5326_v0 = vld [vmem:[#allocation10_spill] sm:$0xff]  ;;  %v5327_v35 = vld [vmem:[#allocation12_spill] sm:$0xff] }
  0x78   : > { %v2257_v38 = vsel %vm718_vm0, %v4310_v46, 0  ;;  %v2051_v31 = vsel %vm718_vm0, %v4327_v19, 0  ;;  %v5322_v46 = vld [vmem:[#allocation15_spill] sm:$0xff]  ;;  %v5328_v40 = vld [vmem:[#allocation14_spill] sm:$0xff]  ;;  %v1807_v27 = vshrl.u32 %v4539_v4, 16  ;;  %v1810_v25 = vshll.u32 %v4539_v4, 16 }
  0x79   : > { %3540 = vmatmul.mubr.msk.bf16.gmra.mxu0 %vm669_vm3, %v4460_v23  ;;  %v2039_v57 = vrot.slane %v2037_v44, 4  ;;  %v2038_v29 = vsel %vm4226_vm7, %v3228_v49, %v2037_v44  ;;  %v5323_v19 = vld [vmem:[#allocation19_spill] sm:$0xff]  ;;  %v1820_v54 = vshrl.u32 %v4533_v59, 16  ;;  %v1816_v3 = vshll.u32 %v4533_v59, 16 }
  0x7a   : > { %3543 = vmatprep.mubr.msk.bf16.mxu0 %vm669_vm3, %v4465_v8  ;;  %v1809_v51 = vrot.slane %v1807_v27, 4  ;;  %v1812_v62 = vrot.slane %v1810_v25, 5 }
  0x7b   : > { %v2041_v24 = vsel %vm4226_vm7, %v2039_v57, %v2040_v7  ;;  %v1818_v44 = vrot.slane %v1816_v3, 5  ;;  %v1822_v49 = vrot.slane %v1820_v54, 4  ;;  %v5329_v57 = vld [vmem:[#allocation17_spill] sm:$0xff]  ;;  %v5330_v7 = vld [vmem:[#allocation22_spill] sm:$0xff]  ;;  %v3193_v3 = vcombine.low %v4539_v4, %v4533_v59 }
  0x7c   : > { %3506 = vmatmul.mubr.msk.bf16.gmra.mxu1 %vm669_vm3, %v4476_v20  ;;  %v4551_v11 = vcombine.low %v2038_v29, %v2041_v24  ;;  %v1813_v29 = vor.u32 %v1812_v62, %v1809_v51  ;;  %v2697_v51 = vsel %vm718_vm0, %v3284_v55, 0 }
  0x7d   : > { %3509 = vmatprep.mubr.msk.bf16.mxu1 %vm669_vm3, %v4482_v48  ;;  %v1823_v24 = vor.u32 %v1822_v49, %v1818_v44 }
  0x81   : > { %3544 = vmatmul.mubr.msk.bf16.gmra.mxu0 %vm669_vm3, %v4498_v13 }
  0x82   : > { %3547 = vmatprep.mubr.msk.bf16.mxu0 %vm669_vm3, %v4500_v16 }
  0x84   : > { %3510 = vmatmul.mubr.msk.bf16.gmra.mxu1 %vm669_vm3, %v4504_v39 }
  0x85   : > { %3513 = vmatprep.mubr.msk.bf16.mxu1 %vm669_vm3, %v4510_v22 }
  0x89   : > { %3548 = vmatmul.mubr.msk.bf16.gmra.mxu0 %vm669_vm3, %v4415_v21 }
  0x8a   : > { %3551 = vmatprep.mubr.msk.bf16.mxu0 %vm669_vm3, %v4430_v50 }
  0x8c   : > { %3514 = vmatmul.mubr.msk.bf16.gmra.mxu1 %vm669_vm3, %v4379_v18 }
  0x8d   : > { %3517 = vmatprep.mubr.msk.bf16.mxu1 %vm669_vm3, %v4392_v6 }
  0x91   : > { %3552 = vmatmul.mubr.msk.bf16.gmra.mxu0 %vm669_vm3, %v4452_v52 }
  0x92   : > { %3555 = vmatprep.mubr.msk.bf16.mxu0 %vm669_vm3, %v4463_v58 }
  0x94   : > { %3518 = vmatmul.mubr.msk.bf16.gmra.mxu1 %vm669_vm3, %v4406_v43 }
  0x95   : > { %3521 = vmatprep.mubr.msk.bf16.mxu1 %vm669_vm3, %v4421_v28 }
  0x99   : > { %3556 = vmatmul.mubr.msk.bf16.gmra.mxu0 %vm669_vm3, %v4472_v2 }
  0x9a   : > { %3595 = vmatprep.mubr.msk.bf16.mxu0 %vm669_vm3, %v5319_v61  ;;  %v1826_v61 = vshll.u32 %v227_v41, 16 }
  0x9c   : > { %3522 = vmatmul.mubr.msk.bf16.gmra.mxu1 %vm669_vm3, %v4436_v9  ;;  %v1828_v27 = vrot.slane %v1826_v61, 5  ;;  %v4743_v61 = vld [vmem:[%s3858_s23 + $0xd0] sm:$0xf] }
  0x9d   : > { %3561 = vmatprep.mubr.msk.bf16.mxu1 %vm669_vm3, %v4238_v45  ;;  %v3265_v45 = vld [vmem:[%s5230_s1 + $0xe] sm:$0x3] }
  0x9e   : > { %v2485_v62 = vsel %vm718_vm0, %v3265_v45, 0 }
  0xa1   : > { %3596 = vmatmul.mubr.msk.bf16.vlgmr.msra.gmra.mxu0 %vm669_vm3, %v5320_v34 }
  0xa2   : > { %3662 = vmatpush3.bf16.msra.mxu0 %v2257_v38  ;;  %3599 = vmatprep.mubr.msk.bf16.mxu0 %vm669_vm3, %v5321_v42  ;;  %v1814_v38 = vrot.slane %v1813_v29, 4 }
  0xa3   : > { %3774 = vmatprep.subr.msk.bf16.mxu0 %vm718_vm0, %v3284_v55 }
  0xa4   : > { %3562 = vmatmul.mubr.msk.bf16.vlgmr.msra.gmra.mxu1 %vm669_vm3, %v4265_v63  ;;  %v1819_v25 = vsel %vm3903_vm4, %v1814_v38, %v1818_v44 }
  0xa5   : > { %3628 = vmatpush3.bf16.msra.mxu1 %v2051_v31  ;;  %3565 = vmatprep.mubr.msk.bf16.mxu1 %vm669_vm3, %v4356_v53  ;;  %v1824_v31 = vrot.slane %v1823_v24, 4 }
  0xa6   : > { %3773 = vmatprep.subr.msk.bf16.mxu1 %vm718_vm0, %v3265_v45 }
  0xa7   : > { %v1829_v41 = vsel %vm3903_vm4, %v1824_v31, %v1828_v27 }
  0xa8   : > { %v4633_v54 = vcombine.low %v1819_v25, %v1829_v41 }
  0xa9   : > { %3600 = vmatmul.mubr.msk.bf16.gmra.mxu0 %vm669_vm3, %v5322_v46 }
  0xaa   : > { %3603 = vmatprep.mubr.msk.bf16.mxu0 %vm669_vm3, %v5323_v19  ;;  %5331 = vst [vmem:[#allocation16_spill] sm:$0xff] %v4633_v54 }
  0xac   : > { %3566 = vmatmul.mubr.msk.bf16.gmra.mxu1 %vm669_vm3, %v4360_v33 }
  0xad   : > { %3569 = vmatprep.mubr.msk.bf16.mxu1 %vm669_vm3, %v4364_v56 }
  0xb1   : > { %3604 = vmatmul.mubr.msk.bf16.gmra.mxu0 %vm669_vm3, %v5324_v36 }
  0xb2   : > { %3607 = vmatprep.mubr.msk.bf16.mxu0 %vm669_vm3, %v4247_v15 }
  0xb4   : > { %3570 = vmatmul.mubr.msk.bf16.gmra.mxu1 %vm669_vm3, %v4368_v17 }
  0xb5   : > { %3573 = vmatprep.mubr.msk.bf16.mxu1 %vm669_vm3, %v4476_v20 }
  0xb9   : > { %3608 = vmatmul.mubr.msk.bf16.gmra.mxu0 %vm669_vm3, %v5325_v26 }
  0xba   : > { %3611 = vmatprep.mubr.msk.bf16.mxu0 %vm669_vm3, %v5326_v0 }
  0xbc   : > { %3574 = vmatmul.mubr.msk.bf16.gmra.mxu1 %vm669_vm3, %v4482_v48 }
  0xbd   : > { %3577 = vmatprep.mubr.msk.bf16.mxu1 %vm669_vm3, %v4504_v39 }
  0xc1   : > { %3612 = vmatmul.mubr.msk.bf16.gmra.mxu0 %vm669_vm3, %v5327_v35 }
  0xc2   : > { %3615 = vmatprep.mubr.msk.bf16.mxu0 %vm669_vm3, %v5328_v40 }
  0xc4   : > { %3578 = vmatmul.mubr.msk.bf16.gmra.mxu1 %vm669_vm3, %v4510_v22 }
  0xc5   : > { %3581 = vmatprep.mubr.msk.bf16.mxu1 %vm669_vm3, %v4379_v18 }
  0xc9   : > { %3616 = vmatmul.mubr.msk.bf16.gmra.mxu0 %vm669_vm3, %v5329_v57 }
  0xca   : > { %3619 = vmatprep.mubr.msk.bf16.mxu0 %vm669_vm3, %v5330_v7 }
  0xcc   : > { %3582 = vmatmul.mubr.msk.bf16.gmra.mxu1 %vm669_vm3, %v4392_v6 }
  0xcd   : > { %3585 = vmatprep.mubr.msk.bf16.mxu1 %vm669_vm3, %v4406_v43 }
  0xd1   : > { %3620 = vmatmul.mubr.msk.bf16.gmra.mxu0 %vm669_vm3, %v4221_v5 }
  0xd2   : > { %3623 = vmatprep.mubr.msk.bf16.mxu0 %vm669_vm3, %v4275_v12 }
  0xd4   : > { %3586 = vmatmul.mubr.msk.bf16.gmra.mxu1 %vm669_vm3, %v4421_v28 }
  0xd5   : > { %3589 = vmatprep.mubr.msk.bf16.mxu1 %vm669_vm3, %v4436_v9 }
  0xd9   : > { %3624 = vmatmul.mubr.msk.bf16.gmra.mxu0 %vm669_vm3, %v4633_v54 }
  0xda   : > { %3663 = vmatprep.mubr.msk.bf16.mxu0 %vm669_vm3, %v4265_v63 }
  0xdc   : > { %3590 = vmatmul.mubr.msk.bf16.gmra.mxu1 %vm669_vm3, %v3193_v3 }
  0xdd   : > { %3629 = vmatprep.mubr.msk.bf16.mxu1 %vm669_vm3, %v4272_v47 }
  0xe1   : > { %3664 = vmatmul.mubr.msk.bf16.vlgmr.msra.gmra.mxu0 %vm669_vm3, %v4356_v53 }
  0xe2   : > { %3730 = vmatpush3.bf16.msra.mxu0 %v2697_v51  ;;  %3667 = vmatprep.mubr.msk.bf16.mxu0 %vm669_vm3, %v4360_v33 }
  0xe4   : > { %3630 = vmatmul.mubr.msk.bf16.vlgmr.msra.gmra.mxu1 %vm669_vm3, %v4295_v37 }
  0xe5   : > { %3696 = vmatpush3.bf16.msra.mxu1 %v2485_v62  ;;  %3633 = vmatprep.mubr.msk.bf16.mxu1 %vm669_vm3, %v4335_v14  ;;  %v4656_v63 = vpop.f32.mrf.mxu0 }
  0xe7   : > { %v4666_v53 = vpop.f32.mrf.mxu0 }
  0xe9   : > { %3668 = vmatmul.mubr.msk.bf16.gmra.mxu0 %vm669_vm3, %v4364_v56  ;;  %v4672_v56 = vpop.f32.mrf.mxu0 }
  0xea   : > { %3671 = vmatprep.mubr.msk.bf16.mxu0 %vm669_vm3, %v4368_v17  ;;  %v4662_v47 = vpop.f32.mrf.mxu1 }
  0xeb   : > { %v4682_v59 = vpop.f32.mrf.mxu0 }
  0xec   : > { %3634 = vmatmul.mubr.msk.bf16.gmra.mxu1 %vm669_vm3, %v4337_v10  ;;  %v4668_v33 = vpop.f32.mrf.mxu1 }
  0xed   : > { %3637 = vmatprep.mubr.msk.bf16.mxu1 %vm669_vm3, %v4372_v30 }
  0xee   : > { %v4678_v17 = vpop.f32.mrf.mxu1 }
  0xf0   : > { %v4684_v4 = vpop.f32.mrf.mxu1 }
  0xf1   : > { %3672 = vmatmul.mubr.msk.bf16.gmra.mxu0 %vm669_vm3, %v4476_v20 }
  0xf2   : > { %3675 = vmatprep.mubr.msk.bf16.mxu0 %vm669_vm3, %v4482_v48 }
  0xf4   : > { %3638 = vmatmul.mubr.msk.bf16.gmra.mxu1 %vm669_vm3, %v4374_v1 }
  0xf5   : > { %3641 = vmatprep.mubr.msk.bf16.mxu1 %vm669_vm3, %v4460_v23 }
  0xf6   : > { %v4688_v20 = vpop.f32.mrf.mxu0 }
  0xf8   : > { %v4698_v55 = vpop.f32.mrf.mxu0 }
  0xf9   : > { %3676 = vmatmul.mubr.msk.bf16.gmra.mxu0 %vm669_vm3, %v4504_v39 }
  0xfa   : > { %3679 = vmatprep.mubr.msk.bf16.mxu0 %vm669_vm3, %v4510_v22  ;;  %v4694_v48 = vpop.f32.mrf.mxu1  ;;  %v4704_v39 = vpop.f32.mrf.mxu0 }
  0xfc   : > { %3642 = vmatmul.mubr.msk.bf16.gmra.mxu1 %vm669_vm3, %v4465_v8  ;;  %v4700_v45 = vpop.f32.mrf.mxu1  ;;  %v4714_v44 = vpop.f32.mrf.mxu0 }
  0xfd   : > { %3645 = vmatprep.mubr.msk.bf16.mxu1 %vm669_vm3, %v4498_v13 }
  0xfe   : > { %v4710_v22 = vpop.f32.mrf.mxu1 }
 0x100   : > { %v4716_v49 = vpop.f32.mrf.mxu1 }
 0x101   : > { %3680 = vmatmul.mubr.msk.bf16.gmra.mxu0 %vm669_vm3, %v4379_v18 }
 0x102   : > { %3683 = vmatprep.mubr.msk.bf16.mxu0 %vm669_vm3, %v4392_v6 }
 0x104   : > { %3646 = vmatmul.mubr.msk.bf16.gmra.mxu1 %vm669_vm3, %v4500_v16 }
 0x105   : > { %3649 = vmatprep.mubr.msk.bf16.mxu1 %vm669_vm3, %v4415_v21 }
 0x107   : > { %v4720_v18 = vpop.f32.mrf.mxu0 }
 0x109   : > { %3684 = vmatmul.mubr.msk.bf16.gmra.mxu0 %vm669_vm3, %v4406_v43  ;;  %v4730_v29 = vpop.f32.mrf.mxu0 }
 0x10a   : > { %3687 = vmatprep.mubr.msk.bf16.mxu0 %vm669_vm3, %v4421_v28  ;;  %v4740_v28 = vld [vmem:[%s3858_s23 + $0xcc] sm:$0xf] }
 0x10b   : > { %v4736_v43 = vpop.f32.mrf.mxu0 }
 0x10c   : > { %3650 = vmatmul.mubr.msk.bf16.gmra.mxu1 %vm669_vm3, %v4430_v50  ;;  %v4726_v6 = vpop.f32.mrf.mxu1 }
 0x10d   : > { %5332 = vst [vmem:[#allocation20_spill] sm:$0xff] %v4726_v6  ;;  %3653 = vmatprep.mubr.msk.bf16.mxu1 %vm669_vm3, %v4452_v52  ;;  %v4749_v31 = vpop.f32.mrf.mxu0 }
 0x10e   : > { %v4732_v24 = vpop.f32.mrf.mxu1 }
 0x10f   : > { %5333 = vst [vmem:[#allocation18_spill] sm:$0xff] %v4732_v24 }
 0x110   : > { %v4747_v38 = vpop.f32.mrf.mxu1 }
 0x111   : > { %3688 = vmatmul.mubr.msk.bf16.gmra.mxu0 %vm669_vm3, %v4436_v9  ;;  %5334 = vst [vmem:[#allocation21_spill] sm:$0xff] %v4747_v38  ;;  %v3248_v9 = vcombine.low %v4740_v28, %v4743_v61 }
 0x112   : > { %3691 = vmatprep.mubr.msk.bf16.mxu0 %vm669_vm3, %v3193_v3  ;;  %v4755_v27 = vpop.f32.mrf.mxu1 }
 0x113   : > { %5335 = vst [vmem:[#allocation23_spill] sm:$0xff] %v4755_v27 }
 0x114   : > { %3654 = vmatmul.mubr.msk.bf16.gmra.mxu1 %vm669_vm3, %v4463_v58 }
 0x115   : > { %3657 = vmatprep.mubr.msk.bf16.mxu1 %vm669_vm3, %v4472_v2 }
 0x119   : > { %v4757_v25 = vpop.f32.mrf.mxu0  ;;  %3692 = vmatmul.mubr.msk.bf16.gmra.mxu0 %vm669_vm3, %v3248_v9 }
 0x11a   : > { %3731 = vmatprep.mubr.msk.bf16.mxu0 %vm669_vm3, %v4295_v37 }
 0x11b   : > { %v4762_v41 = vpop.f32.mrf.mxu0 }
 0x11c   : > { %v4764_v3 = vpop.f32.mrf.mxu1  ;;  %3658 = vmatmul.mubr.msk.bf16.gmra.mxu1 %vm669_vm3, %v4551_v11 }
 0x11d   : > { %5336 = vst [vmem:[#allocation8_spill] sm:$0xff] %v4764_v3  ;;  %v4768_v51 = vpop.f32.mrf.mxu0  ;;  %3697 = vmatprep.mubr.msk.bf16.mxu1 %vm669_vm3, %v5320_v34 }
 0x11e   : > { %v4772_v62 = vpop.f32.mrf.mxu1 }
 0x11f   : > { %5337 = vst [vmem:[#allocation3_spill] sm:$0xff] %v4772_v62  ;;  %v4774_v27 = vpop.f32.mrf.mxu0 }
 0x120   : > { %v4776_v9 = vpop.f32.mrf.mxu1 }
 0x121   : > { %5338 = vst [vmem:[#allocation4_spill] sm:$0xff] %v4776_v9  ;;  %v3529_v38 = vpop.f32.mrf.mxu0  ;;  %3732 = vmatmul.mubr.msk.bf16.vlgmr.msra.gmra.mxu0 %vm669_vm3, %v4335_v14 }
 0x122   : > { %v4780_v37 = vpop.f32.mrf.mxu1  ;;  %3735 = vmatprep.mubr.msk.bf16.mxu0 %vm669_vm3, %v4337_v10 }
 0x123   : > { %5339 = vst [vmem:[#allocation6_spill] sm:$0xff] %v4780_v37  ;;  %v1441_v3 = vpop.f32.mrf.mxu0 }
 0x124   : > { %v3495_v24 = vpop.f32.mrf.mxu1  ;;  %3698 = vmatmul.mubr.msk.bf16.vlgmr.msra.gmra.mxu1 %vm669_vm3, %v5321_v42 }
 0x125   : > { %v1057_v34 = vadd.f32 %v3495_v24, %v4656_v63  ;;  %v3530_v62 = vpop.f32.mrf.mxu0  ;;  %3701 = vmatprep.mubr.msk.bf16.mxu1 %vm669_vm3, %v5322_v46 }
 0x126   : > { %v1048_v9 = vpop.f32.mrf.mxu1 }
 0x127   : > { %v4789_v54 = vadd.f32 %v3529_v38, %v1057_v34  ;;  %v1049_v14 = vadd.f32 %v1048_v9, %v4666_v53  ;;  %v1444_v37 = vpop.f32.mrf.mxu0 }
 0x128   : > { %v3496_v6 = vpop.f32.mrf.mxu1 }
 0x129   : > { %v4792_v32 = vadd.f32 %v1441_v3, %v1049_v14  ;;  %v1060_v10 = vadd.f32 %v3496_v6, %v4672_v56  ;;  %v3533_v12 = vpop.f32.mrf.mxu0  ;;  %3736 = vmatmul.mubr.msk.bf16.gmra.mxu0 %vm669_vm3, %v4372_v30 }
 0x12a   : > { %v1051_v42 = vpop.f32.mrf.mxu1  ;;  %3739 = vmatprep.mubr.msk.bf16.mxu0 %vm669_vm3, %v4374_v1 }
 0x12b   : > { %v4799_v46 = vadd.f32 %v3530_v62, %v1060_v10  ;;  %v1052_v63 = vadd.f32 %v1051_v42, %v4682_v59  ;;  %v1457_v24 = vpop.f32.mrf.mxu0 }
 0x12c   : > { %v3499_v53 = vpop.f32.mrf.mxu1  ;;  %3702 = vmatmul.mubr.msk.bf16.gmra.mxu1 %vm669_vm3, %v5323_v19 }
 0x12d   : > { %v4804_v38 = vadd.f32 %v1444_v37, %v1052_v63  ;;  %v1073_v56 = vadd.f32 %v3499_v53, %v4688_v20  ;;  %v3534_v6 = vpop.f32.mrf.mxu0  ;;  %3705 = vmatprep.mubr.msk.bf16.mxu1 %vm669_vm3, %v5324_v36 }
 0x12e   : > { %v1064_v30 = vpop.f32.mrf.mxu1 }
 0x12f   : > { %v4809_v3 = vadd.f32 %v3533_v12, %v1073_v56  ;;  %v1065_v1 = vadd.f32 %v1064_v30, %v4698_v55  ;;  %v1460_v62 = vpop.f32.mrf.mxu0 }
 0x130   : > { %v3500_v59 = vpop.f32.mrf.mxu1 }
 0x131   : > { %v4812_v9 = vadd.f32 %v1457_v24, %v1065_v1  ;;  %v1076_v34 = vadd.f32 %v3500_v59, %v4704_v39  ;;  %v3537_v19 = vpop.f32.mrf.mxu0  ;;  %3740 = vmatmul.mubr.msk.bf16.gmra.mxu0 %vm669_vm3, %v4460_v23 }
 0x132   : > { %v1067_v20 = vpop.f32.mrf.mxu1  ;;  %3743 = vmatprep.mubr.msk.bf16.mxu0 %vm669_vm3, %v4465_v8 }
 0x133   : > { %v4819_v36 = vadd.f32 %v3534_v6, %v1076_v34  ;;  %v1068_v12 = vadd.f32 %v1067_v20, %v4714_v44  ;;  %v1473_v37 = vpop.f32.mrf.mxu0 }
 0x134   : > { %v3503_v55 = vpop.f32.mrf.mxu1  ;;  %3706 = vmatmul.mubr.msk.bf16.gmra.mxu1 %vm669_vm3, %v4247_v15 }
 0x135   : > { %v4824_v14 = vadd.f32 %v1460_v62, %v1068_v12  ;;  %v1089_v39 = vadd.f32 %v3503_v55, %v4720_v18  ;;  %v3538_v10 = vpop.f32.mrf.mxu0  ;;  %3709 = vmatprep.mubr.msk.bf16.mxu1 %vm669_vm3, %v5325_v26 }
 0x136   : > { %v1080_v23 = vpop.f32.mrf.mxu1 }
 0x137   : > { %v4829_v42 = vadd.f32 %v3537_v19, %v1089_v39  ;;  %v1081_v8 = vadd.f32 %v1080_v23, %v4730_v29  ;;  %v1476_v63 = vpop.f32.mrf.mxu0 }
 0x138   : > { %v3504_v44 = vpop.f32.mrf.mxu1 }
 0x139   : > { %v4832_v24 = vadd.f32 %v1473_v37, %v1081_v8  ;;  %v1092_v53 = vadd.f32 %v3504_v44, %v4736_v43  ;;  %v3541_v15 = vpop.f32.mrf.mxu0  ;;  %3744 = vmatmul.mubr.msk.bf16.gmra.mxu0 %vm669_vm3, %v4498_v13  ;;  %v2456_v37 = vshll.u32 %v4740_v28, 16 }
 0x13a   : > { %v1083_v18 = vpop.f32.mrf.mxu1  ;;  %3747 = vmatprep.mubr.msk.bf16.mxu0 %vm669_vm3, %v4500_v16 }
 0x13b   : > { %v4839_v26 = vadd.f32 %v3538_v10, %v1092_v53  ;;  %v1084_v56 = vadd.f32 %v1083_v18, %v4749_v31  ;;  %v1489_v6 = vpop.f32.mrf.mxu0  ;;  %v2458_v44 = vrot.slane %v2456_v37, 5 }
 0x13c   : > { %v3507_v29 = vpop.f32.mrf.mxu1  ;;  %3710 = vmatmul.mubr.msk.bf16.gmra.mxu1 %vm669_vm3, %v5326_v0 }
 0x13d   : > { %v4844_v30 = vadd.f32 %v1476_v63, %v1084_v56  ;;  %v1105_v43 = vadd.f32 %v3507_v29, %v4757_v25  ;;  %v3542_v1 = vpop.f32.mrf.mxu0  ;;  %3713 = vmatprep.mubr.msk.bf16.mxu1 %vm669_vm3, %v5327_v35 }
 0x13e   : > { %v1096_v13 = vpop.f32.mrf.mxu1 }
 0x13f   : > { %v4849_v62 = vadd.f32 %v3541_v15, %v1105_v43  ;;  %v1097_v16 = vadd.f32 %v1096_v13, %v4762_v41  ;;  %v1492_v59 = vpop.f32.mrf.mxu0  ;;  %v2453_v41 = vshrl.u32 %v4740_v28, 16 }
 0x140   : > { %v3508_v31 = vpop.f32.mrf.mxu1 }
 0x141   : > { %v4852_v34 = vadd.f32 %v1489_v6, %v1097_v16  ;;  %v1108_v19 = vadd.f32 %v3508_v31, %v4768_v51  ;;  %v3545_v0 = vpop.f32.mrf.mxu0  ;;  %3748 = vmatmul.mubr.msk.bf16.gmra.mxu0 %vm669_vm3, %v4415_v21  ;;  %v2462_v51 = vshll.u32 %v4743_v61, 16  ;;  %v2466_v21 = vshrl.u32 %v4743_v61, 16 }
 0x142   : > { %v1099_v25 = vpop.f32.mrf.mxu1  ;;  %3751 = vmatprep.mubr.msk.bf16.mxu0 %vm669_vm3, %v4430_v50 }
 0x143   : > { %v4859_v35 = vadd.f32 %v3542_v1, %v1108_v19  ;;  %v1100_v20 = vadd.f32 %v1099_v25, %v4774_v27  ;;  %v1505_v12 = vpop.f32.mrf.mxu0  ;;  %v2464_v15 = vrot.slane %v2462_v51, 5  ;;  %v2468_v18 = vrot.slane %v2466_v21, 4 }
 0x144   : > { %v3511_v55 = vpop.f32.mrf.mxu1  ;;  %3714 = vmatmul.mubr.msk.bf16.gmra.mxu1 %vm669_vm3, %v5328_v40  ;;  %v2455_v40 = vrot.slane %v2453_v41, 4  ;;  %v3283_v19 = vrot.slane %v4740_v28, 9 }
 0x145   : > { %v4868_v39 = vadd.f32 %v1492_v59, %v1100_v20  ;;  %v1121_v50 = vadd.f32 %v3511_v55, %v4662_v47  ;;  %v3546_v10 = vpop.f32.mrf.mxu0  ;;  %3717 = vmatprep.mubr.msk.bf16.mxu1 %vm669_vm3, %v5329_v57  ;;  %v2683_v57 = vrot.slane %v4743_v61, 5 }
 0x146   : > { %v1112_v27 = vpop.f32.mrf.mxu1 }
 0x147   : > { %v4873_v23 = vadd.f32 %v3545_v0, %v1121_v50  ;;  %v1113_v8 = vadd.f32 %v1112_v27, %v4668_v33  ;;  %v1508_v63 = vpop.f32.mrf.mxu0  ;;  %v230_v33 = vld [vmem:[%s3858_s23 + $0xd4] sm:$0x1] }
 0x148   : > { %v3512_v53 = vpop.f32.mrf.mxu1  ;;  %v2472_v31 = vshll.u32 %v230_v33, 16  ;;  %v2686_v25 = vrot.slane %v230_v33, 5 }
 0x149   : > { %v4876_v56 = vadd.f32 %v1505_v12, %v1113_v8  ;;  %v1124_v47 = vadd.f32 %v3512_v53, %v4678_v17  ;;  %v3549_v6 = vpop.f32.mrf.mxu0  ;;  %3752 = vmatmul.mubr.msk.bf16.gmra.mxu0 %vm669_vm3, %v4452_v52  ;;  %v2459_v17 = vor.u32 %v2458_v44, %v2455_v40 }
 0x14a   : > { %v1115_v29 = vpop.f32.mrf.mxu1  ;;  %3755 = vmatprep.mubr.msk.bf16.mxu0 %vm669_vm3, %v4463_v58  ;;  %v2469_v58 = vor.u32 %v2468_v18, %v2464_v15  ;;  %v2474_v28 = vrot.slane %v2472_v31, 5 }
 0x14b   : > { %v4885_v43 = vadd.f32 %v3546_v10, %v1124_v47  ;;  %v1116_v1 = vadd.f32 %v1115_v29, %v4684_v4  ;;  %v1521_v13 = vpop.f32.mrf.mxu0  ;;  %v2685_v4 = vrot.slane %v2683_v57, 4  ;;  %v2460_v37 = vrot.slane %v2459_v17, 4  ;;  %v5343_v47 = vld [vmem:[#allocation16_spill] sm:$0xff]  ;;  %v5344_v29 = vld [vmem:[#allocation18_spill] sm:$0xff]  ;;  %v5345_v17 = vld [vmem:[#allocation21_spill] sm:$0xff] }
 0x14c   : > { %v3515_v16 = vpop.f32.mrf.mxu1  ;;  %3718 = vmatmul.mubr.msk.bf16.gmra.mxu1 %vm669_vm3, %v5330_v7 }
 0x14d   : > { %v4890_v59 = vadd.f32 %v1508_v63, %v1116_v1  ;;  %v1137_v52 = vadd.f32 %v3515_v16, %v4694_v48  ;;  %v3550_v61 = vpop.f32.mrf.mxu0  ;;  %3721 = vmatprep.mubr.msk.bf16.mxu1 %vm669_vm3, %v4221_v5  ;;  %v2470_v5 = vrot.slane %v2469_v58, 4  ;;  %v2687_v50 = vsel %vm4226_vm7, %v2685_v4, %v2686_v25  ;;  %v5340_v63 = vld [vmem:[#allocation25_spill] sm:$0xff] }
 0x14e   : > { %v1128_v0 = vpop.f32.mrf.mxu1  ;;  %v2465_v40 = vsel %vm3903_vm4, %v2460_v37, %v2464_v15 }
 0x14f   : > { %v4896_v20 = vadd.f32 %v3549_v6, %v1137_v52  ;;  %v1129_v7 = vadd.f32 %v1128_v0, %v4700_v45  ;;  %v1524_v12 = vpop.f32.mrf.mxu0  ;;  %v2684_v45 = vsel %vm4226_vm7, %v3283_v19, %v2683_v57  ;;  %v2475_v60 = vsel %vm3903_vm4, %v2470_v5, %v2474_v28  ;;  %v5346_v19 = vld [vmem:[#allocation23_spill] sm:$0xff] }
 0x150   : > { %v3516_v41 = vpop.f32.mrf.mxu1  ;;  %v3266_v15 = vcombine.low %v2465_v40, %v2475_v60  ;;  %v5348_v5 = vld [vmem:[#allocation3_spill] sm:$0xff]  ;;  %v5350_v40 = vld [vmem:[#allocation6_spill] sm:$0xff] }
 0x151   : > { %v4899_v55 = vadd.f32 %v1521_v13, %v1129_v7  ;;  %v1140_v48 = vadd.f32 %v3516_v41, %v4710_v22  ;;  %v3553_v51 = vpop.f32.mrf.mxu0  ;;  %3756 = vmatmul.mubr.msk.bf16.gmra.mxu0 %vm669_vm3, %v4472_v2 }
 0x152   : > { %v1131_v21 = vpop.f32.mrf.mxu1  ;;  %3759 = vmatprep.mubr.msk.bf16.mxu0 %vm669_vm3, %v4551_v11  ;;  %v5342_v11 = vld [vmem:[#allocation20_spill] sm:$0xff] }
 0x153   : > { %v4910_v10 = vadd.f32 %v3550_v61, %v1140_v48  ;;  %v1132_v22 = vadd.f32 %v1131_v21, %v4716_v49  ;;  %v1537_v27 = vpop.f32.mrf.mxu0  ;;  %v3285_v49 = vcombine.low %v2684_v45, %v2687_v50 }
 0x154   : > { %v3519_v8 = vpop.f32.mrf.mxu1  ;;  %3722 = vmatmul.mubr.msk.bf16.gmra.mxu1 %vm669_vm3, %v5340_v63 }
 0x155   : > { %v4917_v44 = vadd.f32 %v1524_v12, %v1132_v22  ;;  %v1153_v53 = vadd.f32 %v3519_v8, %v5342_v11  ;;  %v3554_v18 = vpop.f32.mrf.mxu0  ;;  %3725 = vmatprep.mubr.msk.bf16.mxu1 %vm669_vm3, %v5343_v47  ;;  %v5347_v12 = vld [vmem:[#allocation8_spill] sm:$0xff] }
 0x156   : > { %v1144_v6 = vpop.f32.mrf.mxu1  ;;  %v5349_v22 = vld [vmem:[#allocation4_spill] sm:$0xff] }
 0x157   : > { %v4924_v57 = vadd.f32 %v3553_v51, %v1153_v53  ;;  %v1145_v33 = vadd.f32 %v1144_v6, %v5344_v29  ;;  %v1540_v1 = vpop.f32.mrf.mxu0 }
 0x158   : > { %v3520_v13 = vpop.f32.mrf.mxu1 }
 0x159   : > { %v4927_v16 = vadd.f32 %v1537_v27, %v1145_v33  ;;  %v1156_v52 = vadd.f32 %v3520_v13, %v5345_v17  ;;  %v3557_v61 = vpop.f32.mrf.mxu0  ;;  %3760 = vmatmul.mubr.msk.bf16.gmra.mxu0 %vm669_vm3, %v3285_v49 }
 0x15a   : > { %v1147_v58 = vpop.f32.mrf.mxu1 }
 0x15b   : > { %v4931_v31 = vadd.f32 %v3554_v18, %v1156_v52  ;;  %v1148_v0 = vadd.f32 %v1147_v58, %v5346_v19  ;;  %v1553_v4 = vpop.f32.mrf.mxu0 }
 0x15c   : > { %v3523_v25 = vpop.f32.mrf.mxu1  ;;  %3726 = vmatmul.mubr.msk.bf16.gmra.mxu1 %vm669_vm3, %v3266_v15 }
 0x15d   : > { %v4935_v7 = vadd.f32 %v1540_v1, %v1148_v0  ;;  %v1169_v41 = vadd.f32 %v3523_v25, %v5347_v12  ;;  %v3558_v37 = vpop.f32.mrf.mxu0 }
 0x15e   : > { %v1160_v48 = vpop.f32.mrf.mxu1 }
 0x15f   : > { %v4938_v51 = vadd.f32 %v3557_v61, %v1169_v41  ;;  %v1161_v28 = vadd.f32 %v1160_v48, %v5348_v5  ;;  %v1556_v21 = vpop.f32.mrf.mxu0 }
 0x160   : > { %v3524_v45 = vpop.f32.mrf.mxu1 }
 0x161   : > { %v4941_v50 = vadd.f32 %v1553_v4, %v1161_v28  ;;  %v1172_v27 = vadd.f32 %v3524_v45, %v5349_v22  ;;  %v3597_v8 = vpop.f32.mrf.mxu0 }
 0x162   : > { %v1163_v63 = vpop.f32.mrf.mxu1 }
 0x163   : > { %v4944_v2 = vadd.f32 %v3558_v37, %v1172_v27  ;;  %v1164_v11 = vadd.f32 %v1163_v63, %v5350_v40  ;;  %v1875_v53 = vpop.f32.mrf.mxu0 }
 0x164   : > { %v3563_v18 = vpop.f32.mrf.mxu1 }
 0x165   : > { %v4947_v47 = vadd.f32 %v1556_v21, %v1164_v11  ;;  %v1776_v60 = vadd.f32 %v3563_v18, %v4789_v54  ;;  %v3598_v49 = vpop.f32.mrf.mxu0 }
 0x166   : > { %v1647_v6 = vpop.f32.mrf.mxu1 }
 0x167   : > { %v4950_v29 = vadd.f32 %v3597_v8, %v1776_v60  ;;  %v1774_v33 = vadd.f32 %v1647_v6, %v4792_v32  ;;  %v1878_v1 = vpop.f32.mrf.mxu0 }
 0x168   : > { %v3564_v13 = vpop.f32.mrf.mxu1 }
 0x169   : > { %v4953_v15 = vadd.f32 %v1875_v53, %v1774_v33  ;;  %v1777_v17 = vadd.f32 %v3564_v13, %v4799_v46  ;;  %v3601_v52 = vpop.f32.mrf.mxu0 }
 0x16a   : > { %v1650_v61 = vpop.f32.mrf.mxu1 }
 0x16b   : > { %v4956_v58 = vadd.f32 %v3598_v49, %v1777_v17  ;;  %v1775_v19 = vadd.f32 %v1650_v61, %v4804_v38  ;;  %v1891_v0 = vpop.f32.mrf.mxu0 }
 0x16c   : > { %v3567_v54 = vpop.f32.mrf.mxu1 }
 0x16d   : > { %v4959_v4 = vadd.f32 %v1878_v1, %v1775_v19  ;;  %v1780_v25 = vadd.f32 %v3567_v54, %v4809_v3  ;;  %v3602_v12 = vpop.f32.mrf.mxu0 }
 0x16e   : > { %v1663_v32 = vpop.f32.mrf.mxu1 }
 0x16f   : > { %v4962_v41 = vadd.f32 %v3601_v52, %v1780_v25  ;;  %v1778_v37 = vadd.f32 %v1663_v32, %v4812_v9  ;;  %v1894_v48 = vpop.f32.mrf.mxu0 }
 0x170   : > { %v3568_v46 = vpop.f32.mrf.mxu1 }
 0x171   : > { %v4965_v5 = vadd.f32 %v1891_v0, %v1778_v37  ;;  %v1781_v28 = vadd.f32 %v3568_v46, %v4819_v36  ;;  %v3605_v21 = vpop.f32.mrf.mxu0 }
 0x172   : > { %v1666_v38 = vpop.f32.mrf.mxu1 }
 0x173   : > { %v4968_v45 = vadd.f32 %v3602_v12, %v1781_v28  ;;  %v1779_v22 = vadd.f32 %v1666_v38, %v4824_v14  ;;  %v1907_v27 = vpop.f32.mrf.mxu0 }
 0x174   : > { %v3571_v3 = vpop.f32.mrf.mxu1 }
 0x175   : > { %v4971_v8 = vadd.f32 %v1894_v48, %v1779_v22  ;;  %v1784_v63 = vadd.f32 %v3571_v3, %v4829_v42  ;;  %v3606_v40 = vpop.f32.mrf.mxu0 }
 0x176   : > { %v1679_v9 = vpop.f32.mrf.mxu1 }
 0x177   : > { %v4974_v11 = vadd.f32 %v3605_v21, %v1784_v63  ;;  %v1782_v53 = vadd.f32 %v1679_v9, %v4832_v24  ;;  %v1910_v18 = vpop.f32.mrf.mxu0 }
 0x178   : > { %v3572_v36 = vpop.f32.mrf.mxu1 }
 0x179   : > { %v4977_v60 = vadd.f32 %v1907_v27, %v1782_v53  ;;  %v1785_v49 = vadd.f32 %v3572_v36, %v4839_v26  ;;  %v3609_v6 = vpop.f32.mrf.mxu0 }
 0x17a   : > { %v1682_v14 = vpop.f32.mrf.mxu1 }
 0x17b   : > { %v4980_v33 = vadd.f32 %v3606_v40, %v1785_v49  ;;  %v1783_v1 = vadd.f32 %v1682_v14, %v4844_v30  ;;  %v1923_v13 = vpop.f32.mrf.mxu0 }
 0x17c   : > { %v3575_v42 = vpop.f32.mrf.mxu1 }
 0x17d   : > { %v4983_v17 = vadd.f32 %v1910_v18, %v1783_v1  ;;  %v1788_v52 = vadd.f32 %v3575_v42, %v4849_v62  ;;  %v3610_v61 = vpop.f32.mrf.mxu0 }
 0x17e   : > { %v1695_v24 = vpop.f32.mrf.mxu1 }
 0x17f   : > { %v4986_v19 = vadd.f32 %v3609_v6, %v1788_v52  ;;  %v1786_v0 = vadd.f32 %v1695_v24, %v4852_v34  ;;  %v1926_v54 = vpop.f32.mrf.mxu0 }
 0x180   : > { %v3576_v26 = vpop.f32.mrf.mxu1 }
 0x181   : > { %v4989_v25 = vadd.f32 %v1923_v13, %v1786_v0  ;;  %v1789_v12 = vadd.f32 %v3576_v26, %v4859_v35  ;;  %v3613_v32 = vpop.f32.mrf.mxu0 }
 0x182   : > { %v1698_v30 = vpop.f32.mrf.mxu1 }
 0x183   : > { %v4992_v37 = vadd.f32 %v3610_v61, %v1789_v12  ;;  %v1787_v48 = vadd.f32 %v1698_v30, %v4868_v39  ;;  %v1939_v46 = vpop.f32.mrf.mxu0 }
 0x184   : > { %v3579_v62 = vpop.f32.mrf.mxu1 }
 0x185   : > { %v4995_v28 = vadd.f32 %v1926_v54, %v1787_v48  ;;  %v1792_v21 = vadd.f32 %v3579_v62, %v4873_v23  ;;  %v3614_v38 = vpop.f32.mrf.mxu0 }
 0x186   : > { %v1711_v34 = vpop.f32.mrf.mxu1 }
 0x187   : > { %v4998_v22 = vadd.f32 %v3613_v32, %v1792_v21  ;;  %v1790_v27 = vadd.f32 %v1711_v34, %v4876_v56  ;;  %v1942_v3 = vpop.f32.mrf.mxu0 }
 0x188   : > { %v3580_v35 = vpop.f32.mrf.mxu1 }
 0x189   : > { %v5001_v63 = vadd.f32 %v1939_v46, %v1790_v27  ;;  %v1793_v40 = vadd.f32 %v3580_v35, %v4885_v43  ;;  %v3617_v9 = vpop.f32.mrf.mxu0 }
 0x18a   : > { %v1714_v39 = vpop.f32.mrf.mxu1 }
 0x18b   : > { %v5004_v53 = vadd.f32 %v3614_v38, %v1793_v40  ;;  %v1791_v18 = vadd.f32 %v1714_v39, %v4890_v59  ;;  %v1955_v36 = vpop.f32.mrf.mxu0 }
 0x18c   : > { %v3583_v23 = vpop.f32.mrf.mxu1 }
 0x18d   : > { %v5007_v49 = vadd.f32 %v1942_v3, %v1791_v18  ;;  %v1796_v6 = vadd.f32 %v3583_v23, %v4896_v20  ;;  %v3618_v14 = vpop.f32.mrf.mxu0 }
 0x18e   : > { %v1727_v56 = vpop.f32.mrf.mxu1 }
 0x18f   : > { %v5010_v1 = vadd.f32 %v3617_v9, %v1796_v6  ;;  %v1794_v13 = vadd.f32 %v1727_v56, %v4899_v55  ;;  %v1958_v42 = vpop.f32.mrf.mxu0 }
 0x190   : > { %v3584_v43 = vpop.f32.mrf.mxu1 }
 0x191   : > { %v5013_v52 = vadd.f32 %v1955_v36, %v1794_v13  ;;  %v1797_v61 = vadd.f32 %v3584_v43, %v4910_v10  ;;  %v3621_v24 = vpop.f32.mrf.mxu0 }
 0x192   : > { %v1730_v59 = vpop.f32.mrf.mxu1 }
 0x193   : > { %v5016_v0 = vadd.f32 %v3618_v14, %v1797_v61  ;;  %v1795_v54 = vadd.f32 %v1730_v59, %v4917_v44  ;;  %v1971_v26 = vpop.f32.mrf.mxu0 }
 0x194   : > { %v3587_v20 = vpop.f32.mrf.mxu1 }
 0x195   : > { %v5019_v12 = vadd.f32 %v1958_v42, %v1795_v54  ;;  %v1800_v32 = vadd.f32 %v3587_v20, %v4924_v57  ;;  %v3622_v30 = vpop.f32.mrf.mxu0 }
 0x196   : > { %v1743_v55 = vpop.f32.mrf.mxu1 }
 0x197   : > { %v5022_v48 = vadd.f32 %v3621_v24, %v1800_v32  ;;  %v1798_v46 = vadd.f32 %v1743_v55, %v4927_v16  ;;  %v1974_v62 = vpop.f32.mrf.mxu0 }
 0x198   : > { %v3588_v10 = vpop.f32.mrf.mxu1 }
 0x199   : > { %v5025_v21 = vadd.f32 %v1971_v26, %v1798_v46  ;;  %v1801_v38 = vadd.f32 %v3588_v10, %v4931_v31  ;;  %v3625_v34 = vpop.f32.mrf.mxu0 }
 0x19a   : > { %v1746_v44 = vpop.f32.mrf.mxu1 }
 0x19b   : > { %5351 = vst [vmem:[#allocation9_spill] sm:$0xff] %v5025_v21  ;;  %v5028_v27 = vadd.f32 %v3622_v30, %v1801_v38  ;;  %v1799_v3 = vadd.f32 %v1746_v44, %v4935_v7  ;;  %v1987_v35 = vpop.f32.mrf.mxu0 }
 0x19c   : > { %v3591_v57 = vpop.f32.mrf.mxu1 }
 0x19d   : > { %v5031_v40 = vadd.f32 %v1974_v62, %v1799_v3  ;;  %v1804_v9 = vadd.f32 %v3591_v57, %v4938_v51  ;;  %v3626_v39 = vpop.f32.mrf.mxu0 }
 0x19e   : > { %v1759_v16 = vpop.f32.mrf.mxu1 }
 0x19f   : > { %5352 = vst [vmem:[#allocation7_spill] sm:$0xff] %v5031_v40  ;;  %v5034_v18 = vadd.f32 %v3625_v34, %v1804_v9  ;;  %v1802_v36 = vadd.f32 %v1759_v16, %v4941_v50  ;;  %v1990_v23 = vpop.f32.mrf.mxu0 }
 0x1a0   : > { %v3592_v31 = vpop.f32.mrf.mxu1 }
 0x1a1   : > { %v5037_v6 = vadd.f32 %v1987_v35, %v1802_v36  ;;  %v1805_v14 = vadd.f32 %v3592_v31, %v4944_v2  ;;  %v3665_v56 = vpop.f32.mrf.mxu0 }
 0x1a2   : > { %v1762_v7 = vpop.f32.mrf.mxu1 }
 0x1a3   : > { %5353 = vst [vmem:[#allocation11_spill] sm:$0xff] %v5037_v6  ;;  %v5040_v13 = vadd.f32 %v3626_v39, %v1805_v14  ;;  %v1803_v42 = vadd.f32 %v1762_v7, %v4947_v47  ;;  %v2293_v43 = vpop.f32.mrf.mxu0 }
 0x1a4   : > { %v3631_v51 = vpop.f32.mrf.mxu1 }
 0x1a5   : > { %v5043_v61 = vadd.f32 %v1990_v23, %v1803_v42  ;;  %v2216_v24 = vadd.f32 %v3631_v51, %v4950_v29  ;;  %v3666_v59 = vpop.f32.mrf.mxu0 }
 0x1a6   : > { %v2087_v50 = vpop.f32.mrf.mxu1 }
 0x1a7   : > { %5354 = vst [vmem:[#allocation13_spill] sm:$0xff] %v5043_v61  ;;  %v5046_v54 = vadd.f32 %v3665_v56, %v2216_v24  ;;  %v2214_v26 = vadd.f32 %v2087_v50, %v4953_v15  ;;  %v5049_v20 = vpop.f32.mrf.mxu0 }
 0x1a8   : > { %v3632_v2 = vpop.f32.mrf.mxu1 }
 0x1a9   : > { %v5051_v32 = vadd.f32 %v2293_v43, %v2214_v26  ;;  %v2217_v30 = vadd.f32 %v3632_v2, %v4956_v58  ;;  %v3669_v47 = vpop.f32.mrf.mxu0 }
 0x1aa   : > { %v5054_v55 = vpop.f32.mrf.mxu1 }
 0x1ab   : > { %v5056_v46 = vadd.f32 %v3666_v59, %v2217_v30  ;;  %v5058_v62 = vpop.f32.mrf.mxu0 }
 0x1ac   : > { %v3635_v29 = vpop.f32.mrf.mxu1 }
 0x1ad   : > { %v2220_v10 = vadd.f32 %v3635_v29, %v4962_v41  ;;  %v3670_v38 = vpop.f32.mrf.mxu0 }
 0x1ae   : > { %v5061_v34 = vpop.f32.mrf.mxu1 }
 0x1af   : > { %v5063_v15 = vadd.f32 %v3669_v47, %v2220_v10  ;;  %v5065_v44 = vpop.f32.mrf.mxu0 }
 0x1b0   : > { %v3636_v3 = vpop.f32.mrf.mxu1 }
 0x1b1   : > { %v2221_v58 = vadd.f32 %v3636_v3, %v4968_v45  ;;  %v3673_v35 = vpop.f32.mrf.mxu0 }
 0x1b2   : > { %v5068_v57 = vpop.f32.mrf.mxu1 }
 0x1b3   : > { %v5070_v9 = vadd.f32 %v3670_v38, %v2221_v58  ;;  %v5072_v39 = vpop.f32.mrf.mxu0 }
 0x1b4   : > { %v3639_v16 = vpop.f32.mrf.mxu1 }
 0x1b5   : > { %v2224_v41 = vadd.f32 %v3639_v16, %v4974_v11  ;;  %v3674_v36 = vpop.f32.mrf.mxu0 }
 0x1b6   : > { %v5075_v23 = vpop.f32.mrf.mxu1 }
 0x1b7   : > { %v5077_v31 = vadd.f32 %v3673_v35, %v2224_v41  ;;  %v5079_v14 = vpop.f32.mrf.mxu0 }
 0x1b8   : > { %v3640_v56 = vpop.f32.mrf.mxu1 }
 0x1b9   : > { %v2225_v45 = vadd.f32 %v3640_v56, %v4980_v33  ;;  %v3677_v7 = vpop.f32.mrf.mxu0 }
 0x1ba   : > { %v5082_v42 = vpop.f32.mrf.mxu1 }
 0x1bb   : > { %v5084_v43 = vadd.f32 %v3674_v36, %v2225_v45  ;;  %v5086_v51 = vpop.f32.mrf.mxu0 }
 0x1bc   : > { %v3643_v24 = vpop.f32.mrf.mxu1 }
 0x1bd   : > { %v2228_v11 = vadd.f32 %v3643_v24, %v4986_v19  ;;  %v3678_v59 = vpop.f32.mrf.mxu0 }
 0x1be   : > { %v5089_v50 = vpop.f32.mrf.mxu1 }
 0x1bf   : > { %v5091_v26 = vadd.f32 %v3677_v7, %v2228_v11  ;;  %v5093_v2 = vpop.f32.mrf.mxu0 }
 0x1c0   : > { %v3644_v30 = vpop.f32.mrf.mxu1 }
 0x1c1   : > { %v2229_v33 = vadd.f32 %v3644_v30, %v4992_v37  ;;  %v3681_v47 = vpop.f32.mrf.mxu0 }
 0x1c2   : > { %v5096_v29 = vpop.f32.mrf.mxu1 }
 0x1c3   : > { %v5098_v10 = vadd.f32 %v3678_v59, %v2229_v33  ;;  %v5100_v38 = vpop.f32.mrf.mxu0 }
 0x1c4   : > { %v3647_v3 = vpop.f32.mrf.mxu1 }
 0x1c5   : > { %v2232_v19 = vadd.f32 %v3647_v3, %v4998_v22  ;;  %v3682_v58 = vpop.f32.mrf.mxu0 }
 0x1c6   : > { %v5103_v35 = vpop.f32.mrf.mxu1 }
 0x1c7   : > { %v5105_v16 = vadd.f32 %v3681_v47, %v2232_v19  ;;  %v5107_v41 = vpop.f32.mrf.mxu0 }
 0x1c8   : > { %v3648_v36 = vpop.f32.mrf.mxu1 }
 0x1c9   : > { %v2233_v37 = vadd.f32 %v3648_v36, %v5004_v53  ;;  %v3685_v56 = vpop.f32.mrf.mxu0 }
 0x1ca   : > { %v5110_v45 = vpop.f32.mrf.mxu1 }
 0x1cb   : > { %v5112_v7 = vadd.f32 %v3682_v58, %v2233_v37  ;;  %v5114_v24 = vpop.f32.mrf.mxu0 }
 0x1cc   : > { %v3651_v11 = vpop.f32.mrf.mxu1 }
 0x1cd   : > { %v2236_v22 = vadd.f32 %v3651_v11, %v5010_v1  ;;  %v3686_v59 = vpop.f32.mrf.mxu0 }
 0x1ce   : > { %v5117_v30 = vpop.f32.mrf.mxu1 }
 0x1cf   : > { %v5119_v33 = vadd.f32 %v3685_v56, %v2236_v22  ;;  %v5121_v47 = vpop.f32.mrf.mxu0 }
 0x1d0   : > { %v3652_v3 = vpop.f32.mrf.mxu1 }
 0x1d1   : > { %5355 = vst [vmem:[#allocation15_spill] sm:$0xff] %v5119_v33  ;;  %v2237_v53 = vadd.f32 %v3652_v3, %v5016_v0  ;;  %v3689_v19 = vpop.f32.mrf.mxu0 }
 0x1d2   : > { %v5124_v36 = vpop.f32.mrf.mxu1 }
 0x1d3   : > { %v5126_v58 = vadd.f32 %v3686_v59, %v2237_v53  ;;  %v5128_v37 = vpop.f32.mrf.mxu0 }
 0x1d4   : > { %5357 = vst [vmem:[#allocation24_spill] sm:$0xff] %v5128_v37  ;;  %v3655_v61 = vpop.f32.mrf.mxu1 }
 0x1d5   : > { %5356 = vst [vmem:[#allocation19_spill] sm:$0xff] %v5126_v58  ;;  %v2240_v1 = vadd.f32 %v3655_v61, %v5022_v48  ;;  %v3690_v11 = vpop.f32.mrf.mxu0 }
 0x1d6   : > { %v5131_v6 = vpop.f32.mrf.mxu1 }
 0x1d7   : > { %5358 = vst [vmem:[#allocation5_spill] sm:$0xff] %v5131_v6  ;;  %v5133_v56 = vadd.f32 %v3689_v19, %v2240_v1  ;;  %v5135_v22 = vpop.f32.mrf.mxu0 }
 0x1d8   : > { %5360 = vst [vmem:[#allocation12_spill] sm:$0xff] %v5135_v22  ;;  %v3656_v40 = vpop.f32.mrf.mxu1 }
 0x1d9   : > { %5359 = vst [vmem:[#allocation10_spill] sm:$0xff] %v5133_v56  ;;  %v2241_v0 = vadd.f32 %v3656_v40, %v5028_v27  ;;  %v3693_v3 = vpop.f32.mrf.mxu0 }
 0x1da   : > { %v5138_v33 = vpop.f32.mrf.mxu1 }
 0x1db   : > { %5361 = vst [vmem:[#allocation14_spill] sm:$0xff] %v5138_v33  ;;  %v5140_v59 = vadd.f32 %v3690_v11, %v2241_v0  ;;  %v5142_v53 = vpop.f32.mrf.mxu0 }
 0x1dc   : > { %5363 = vst [vmem:[#allocation22_spill] sm:$0xff] %v5142_v53  ;;  %v3659_v37 = vpop.f32.mrf.mxu1 }
 0x1dd   : > { %5362 = vst [vmem:[#allocation17_spill] sm:$0xff] %v5140_v59  ;;  %v2244_v48 = vadd.f32 %v3659_v37, %v5034_v18  ;;  %v3694_v61 = vpop.f32.mrf.mxu0  ;;  %v2215_v18 = vadd.f32 %v5054_v55, %v4959_v4  ;;  %v2219_v55 = vadd.f32 %v5068_v57, %v4971_v8 }
 0x1de   : > { %v5145_v58 = vpop.f32.mrf.mxu1 }
 0x1df   : > { %5364 = vst [vmem:[#allocation25_spill] sm:$0xff] %v5145_v58  ;;  %v5147_v19 = vadd.f32 %v3693_v3, %v2244_v48  ;;  %v5149_v1 = vpop.f32.mrf.mxu0 }
 0x1e0   : > { %5366 = vst [vmem:[#allocation20_spill] sm:$0xff] %v5149_v1  ;;  %v3660_v56 = vpop.f32.mrf.mxu1  ;;  %v2421_v1 = vadd.f32 %v5049_v20, %v2215_v18 }
 0x1e1   : > { %5365 = vst [vmem:[#allocation2_spill] sm:$0xff] %v5147_v19  ;;  %v2245_v27 = vadd.f32 %v3660_v56, %v5040_v13  ;;  %v3733_v40 = vpop.f32.mrf.mxu0  ;;  %v2218_v13 = vadd.f32 %v5061_v34, %v4965_v5 }
 0x1e2   : > { %v5152_v22 = vpop.f32.mrf.mxu1 }
 0x1e3   : > { %5367 = vst [vmem:[#allocation16_spill] sm:$0xff] %v5152_v22  ;;  %v5154_v11 = vadd.f32 %v3694_v61, %v2245_v27  ;;  %v2733_v0 = vpop.f32.mrf.mxu0 }
 0x1e4   : > { %v3699_v53 = vpop.f32.mrf.mxu1 }
 0x1e5   : > { %5368 = vst [vmem:[#allocation18_spill] sm:$0xff] %v5154_v11  ;;  %v3734_v37 = vpop.f32.mrf.mxu0  ;;  %v2650_v56 = vadd.f32 %v3699_v53, %v5046_v54 }
 0x1e6   : > { %v2521_v59 = vpop.f32.mrf.mxu1 }
 0x1e7   : > { %v2648_v3 = vadd.f32 %v2521_v59, %v5051_v32  ;;  %v2736_v48 = vpop.f32.mrf.mxu0  ;;  %v2424_v59 = vadd.f32 %v5058_v62, %v2218_v13  ;;  %v2862_v33 = vadd.f32 %v3733_v40, %v2650_v56 }
 0x1e8   : > { %v3700_v19 = vpop.f32.mrf.mxu1 }
 0x1e9   : > { %v3737_v61 = vpop.f32.mrf.mxu0  ;;  %v2651_v27 = vadd.f32 %v3700_v19, %v5056_v46  ;;  %v2860_v22 = vadd.f32 %v2733_v0, %v2648_v3  ;;  %v2425_v19 = vadd.f32 %v5065_v44, %v2219_v55  ;;  %v2932_v0 = vmul.f32 %v2862_v33, %v2862_v33 }
 0x1ea   : > { %v2524_v11 = vpop.f32.mrf.mxu1 }
 0x1eb   : > { %v2649_v58 = vadd.f32 %v2524_v11, %v2421_v1  ;;  %v2749_v4 = vpop.f32.mrf.mxu0  ;;  %v2863_v6 = vadd.f32 %v3734_v37, %v2651_v27  ;;  %v2930_v34 = vmul.f32 %v2860_v22, %v2860_v22 }
 0x1ec   : > { %v3703_v32 = vpop.f32.mrf.mxu1 }
 0x1ed   : > { %v2861_v20 = vadd.f32 %v2736_v48, %v2649_v58  ;;  %v3738_v18 = vpop.f32.mrf.mxu0  ;;  %v2654_v1 = vadd.f32 %v3703_v32, %v5063_v15  ;;  %v2222_v58 = vadd.f32 %v5075_v23, %v4977_v60  ;;  %v2933_v40 = vmul.f32 %v2863_v6, %v2863_v6 }
 0x1ee   : > { %v2537_v5 = vpop.f32.mrf.mxu1  ;;  %v2223_v15 = vadd.f32 %v5082_v42, %v4983_v17 }
 0x1ef   : > { %v2892_v54 = vadd.f32 %v2861_v20, %v2860_v22  ;;  %v2931_v53 = vmul.f32 %v2861_v20, %v2861_v20  ;;  %v2652_v21 = vadd.f32 %v2537_v5, %v2424_v59  ;;  %v2752_v46 = vpop.f32.mrf.mxu0  ;;  %v2866_v44 = vadd.f32 %v3737_v61, %v2654_v1 }
 0x1f0   : > { %v3704_v11 = vpop.f32.mrf.mxu1  ;;  %v2428_v60 = vadd.f32 %v5072_v39, %v2222_v58 }
 0x1f1   : > { %v2893_v8 = vadd.f32 %v2892_v54, %v2862_v33  ;;  %v2962_v57 = vadd.f32 %v2931_v53, %v2930_v34  ;;  %v2864_v3 = vadd.f32 %v2749_v4, %v2652_v21  ;;  %v3741_v62 = vpop.f32.mrf.mxu0  ;;  %v2655_v13 = vadd.f32 %v3704_v11, %v5070_v9 }
 0x1f2   : > { %v2540_v37 = vpop.f32.mrf.mxu1  ;;  %v2226_v54 = vadd.f32 %v5089_v50, %v4989_v25  ;;  %v2429_v53 = vadd.f32 %v5079_v14, %v2223_v15 }
 0x1f3   : > { %v2963_v48 = vadd.f32 %v2962_v57, %v2932_v0  ;;  %v2894_v22 = vadd.f32 %v2893_v8, %v2863_v6  ;;  %v2653_v56 = vadd.f32 %v2540_v37, %v2425_v19  ;;  %v2765_v27 = vpop.f32.mrf.mxu0  ;;  %v2934_v32 = vmul.f32 %v2864_v3, %v2864_v3 }
 0x1f4   : > { %v3707_v55 = vpop.f32.mrf.mxu1  ;;  %v2867_v5 = vadd.f32 %v3738_v18, %v2655_v13  ;;  %v2936_v19 = vmul.f32 %v2866_v44, %v2866_v44  ;;  %v2432_v25 = vadd.f32 %v5086_v51, %v2226_v54  ;;  %v2230_v51 = vadd.f32 %v5103_v35, %v5001_v63 }
 0x1f5   : > { %v2895_v33 = vadd.f32 %v2894_v22, %v2864_v3  ;;  %v2964_v21 = vadd.f32 %v2963_v48, %v2933_v40  ;;  %v2865_v4 = vadd.f32 %v2752_v46, %v2653_v56  ;;  %v3742_v59 = vpop.f32.mrf.mxu0  ;;  %v2658_v17 = vadd.f32 %v3707_v55, %v5077_v31 }
 0x1f6   : > { %v2553_v23 = vpop.f32.mrf.mxu1  ;;  %v2937_v8 = vmul.f32 %v2867_v5, %v2867_v5  ;;  %v2227_v56 = vadd.f32 %v5096_v29, %v4995_v28  ;;  %v2436_v54 = vadd.f32 %v5100_v38, %v2230_v51 }
 0x1f7   : > { %v2965_v20 = vadd.f32 %v2964_v21, %v2934_v32  ;;  %v2896_v6 = vadd.f32 %v2895_v33, %v2865_v4  ;;  %v2935_v34 = vmul.f32 %v2865_v4, %v2865_v4  ;;  %v2768_v9 = vpop.f32.mrf.mxu0  ;;  %v2656_v42 = vadd.f32 %v2553_v23, %v2428_v60 }
 0x1f8   : > { %v3708_v61 = vpop.f32.mrf.mxu1  ;;  %v2870_v31 = vadd.f32 %v3741_v62, %v2658_v17 }
 0x1f9   : > { %v2897_v46 = vadd.f32 %v2896_v6, %v2866_v44  ;;  %v2966_v1 = vadd.f32 %v2965_v20, %v2935_v34  ;;  %v3745_v11 = vpop.f32.mrf.mxu0  ;;  %v2868_v39 = vadd.f32 %v2765_v27, %v2656_v42  ;;  %v2659_v0 = vadd.f32 %v3708_v61, %v5084_v43 }
 0x1fa   : > { %v2556_v18 = vpop.f32.mrf.mxu1  ;;  %v2940_v21 = vmul.f32 %v2870_v31, %v2870_v31  ;;  %v2231_v42 = vadd.f32 %v5110_v45, %v5007_v49 }
 0x1fb   : > { %v2967_v57 = vadd.f32 %v2966_v1, %v2936_v19  ;;  %v2898_v3 = vadd.f32 %v2897_v46, %v2867_v5  ;;  %v2657_v58 = vadd.f32 %v2556_v18, %v2429_v53  ;;  %v2781_v40 = vpop.f32.mrf.mxu0  ;;  %v2938_v48 = vmul.f32 %v2868_v39, %v2868_v39 }
 0x1fc   : > { %v3711_v50 = vpop.f32.mrf.mxu1  ;;  %v2871_v27 = vadd.f32 %v3742_v59, %v2659_v0  ;;  %v2433_v5 = vadd.f32 %v5093_v2, %v2227_v56 }
 0x1fd   : > { %v2899_v37 = vadd.f32 %v2898_v3, %v2868_v39  ;;  %v2968_v14 = vadd.f32 %v2967_v57, %v2937_v8  ;;  %v2869_v22 = vadd.f32 %v2768_v9, %v2657_v58  ;;  %v3746_v13 = vpop.f32.mrf.mxu0  ;;  %v2662_v28 = vadd.f32 %v3711_v50, %v5091_v26 }
 0x1fe   : > { %v2569_v43 = vpop.f32.mrf.mxu1  ;;  %v2941_v59 = vmul.f32 %v2871_v27, %v2871_v27  ;;  %v2234_v58 = vadd.f32 %v5117_v30, %v5013_v52  ;;  %v2235_v52 = vadd.f32 %v5124_v36, %v5019_v12 }
 0x1ff   : > { %v2969_v15 = vadd.f32 %v2968_v14, %v2938_v48  ;;  %v2900_v44 = vadd.f32 %v2899_v37, %v2869_v22  ;;  %v2939_v55 = vmul.f32 %v2869_v22, %v2869_v22  ;;  %v2660_v33 = vadd.f32 %v2569_v43, %v2432_v25  ;;  %v2784_v32 = vpop.f32.mrf.mxu0 }
 0x200   : > { %v3712_v62 = vpop.f32.mrf.mxu1  ;;  %v2874_v46 = vadd.f32 %v3745_v11, %v2662_v28 }
 0x201   : > { %v2901_v4 = vadd.f32 %v2900_v44, %v2870_v31  ;;  %v2970_v60 = vadd.f32 %v2969_v15, %v2939_v55  ;;  %v2872_v23 = vadd.f32 %v2781_v40, %v2660_v33  ;;  %v3749_v20 = vpop.f32.mrf.mxu0  ;;  %v2663_v17 = vadd.f32 %v3712_v62, %v5098_v10 }
 0x202   : > { %v2572_v29 = vpop.f32.mrf.mxu1  ;;  %v2437_v10 = vadd.f32 %v5107_v41, %v2231_v42  ;;  %v2944_v40 = vmul.f32 %v2874_v46, %v2874_v46  ;;  %v2440_v41 = vadd.f32 %v5114_v24, %v2234_v58  ;;  %v5369_v24 = vld [vmem:[#allocation9_spill] sm:$0xff] }
 0x203   : > { %v2971_v6 = vadd.f32 %v2970_v60, %v2940_v21  ;;  %v2902_v34 = vadd.f32 %v2901_v4, %v2871_v27  ;;  %v2797_v9 = vpop.f32.mrf.mxu0  ;;  %v2661_v63 = vadd.f32 %v2572_v29, %v2433_v5  ;;  %v2942_v53 = vmul.f32 %v2872_v23, %v2872_v23  ;;  %v5370_v5 = vld [vmem:[#allocation5_spill] sm:$0xff] }
 0x204   : > { %v3715_v35 = vpop.f32.mrf.mxu1  ;;  %v2875_v8 = vadd.f32 %v3746_v13, %v2663_v17  ;;  %v2238_v28 = vadd.f32 %v5370_v5, %v5369_v24 }
 0x205   : > { %v2903_v61 = vadd.f32 %v2902_v34, %v2872_v23  ;;  %v2972_v19 = vadd.f32 %v2971_v6, %v2941_v59  ;;  %v3750_v2 = vpop.f32.mrf.mxu0  ;;  %v2873_v26 = vadd.f32 %v2784_v32, %v2661_v63  ;;  %v2666_v49 = vadd.f32 %v3715_v35, %v5105_v16  ;;  %v5371_v59 = vld [vmem:[#allocation15_spill] sm:$0xff] }
 0x206   : > { %v2585_v1 = vpop.f32.mrf.mxu1  ;;  %v2945_v14 = vmul.f32 %v2875_v8, %v2875_v8  ;;  %v2441_v23 = vadd.f32 %v5121_v47, %v2235_v52  ;;  %v5373_v47 = vld [vmem:[#allocation24_spill] sm:$0xff] }
 0x207   : > { %v2973_v39 = vadd.f32 %v2972_v19, %v2942_v53  ;;  %v2664_v0 = vadd.f32 %v2585_v1, %v2436_v54  ;;  %v2800_v18 = vpop.f32.mrf.mxu0  ;;  %v2904_v57 = vadd.f32 %v2903_v61, %v2873_v26  ;;  %v2943_v38 = vmul.f32 %v2873_v26, %v2873_v26  ;;  %v5372_v61 = vld [vmem:[#allocation19_spill] sm:$0xff]  ;;  %v5375_v26 = vld [vmem:[#allocation14_spill] sm:$0xff] }
 0x208   : > { %v3716_v3 = vpop.f32.mrf.mxu1  ;;  %v2878_v16 = vadd.f32 %v3749_v20, %v2666_v49 }
 0x209   : > { %v3753_v45 = vpop.f32.mrf.mxu0  ;;  %v2905_v25 = vadd.f32 %v2904_v57, %v2874_v46  ;;  %v2974_v11 = vadd.f32 %v2973_v39, %v2943_v38  ;;  %v2876_v31 = vadd.f32 %v2797_v9, %v2664_v0  ;;  %v2667_v56 = vadd.f32 %v3716_v3, %v5112_v7  ;;  %v5374_v46 = vld [vmem:[#allocation7_spill] sm:$0xff] }
 0x20a   : > { %v2588_v50 = vpop.f32.mrf.mxu1  ;;  %v2948_v12 = vmul.f32 %v2878_v16, %v2878_v16  ;;  %v2239_v1 = vadd.f32 %v5375_v26, %v5374_v46 }
 0x20b   : > { %v2665_v37 = vadd.f32 %v2588_v50, %v2437_v10  ;;  %v2813_v48 = vpop.f32.mrf.mxu0  ;;  %v2975_v22 = vadd.f32 %v2974_v11, %v2944_v40  ;;  %v2906_v13 = vadd.f32 %v2905_v25, %v2875_v8  ;;  %v2946_v44 = vmul.f32 %v2876_v31, %v2876_v31  ;;  %v5376_v50 = vld [vmem:[#allocation12_spill] sm:$0xff] }
 0x20c   : > { %v3719_v27 = vpop.f32.mrf.mxu1  ;;  %v2879_v4 = vadd.f32 %v3750_v2, %v2667_v56  ;;  %v2444_v2 = vadd.f32 %v5373_v47, %v2238_v28  ;;  %v5385_v47 = vld [vmem:[#allocation2_spill] sm:$0xff] }
 0x20d   : > { %v2877_v30 = vadd.f32 %v2800_v18, %v2665_v37  ;;  %v3754_v43 = vpop.f32.mrf.mxu0  ;;  %v2907_v15 = vadd.f32 %v2906_v13, %v2876_v31  ;;  %v2976_v55 = vadd.f32 %v2975_v22, %v2945_v14  ;;  %v2670_v6 = vadd.f32 %v3719_v27, %v5371_v59  ;;  %v5378_v14 = vld [vmem:[#allocation25_spill] sm:$0xff]  ;;  %v5379_v13 = vld [vmem:[#allocation10_spill] sm:$0xff] }
 0x20e   : > { %v2601_v33 = vpop.f32.mrf.mxu1  ;;  %v2949_v63 = vmul.f32 %v2879_v4, %v2879_v4  ;;  %v2445_v37 = vadd.f32 %v5376_v50, %v2239_v1 }
 0x20f   : > { %v2947_v32 = vmul.f32 %v2877_v30, %v2877_v30  ;;  %v2668_v51 = vadd.f32 %v2601_v33, %v2440_v41  ;;  %v2816_v62 = vpop.f32.mrf.mxu0  ;;  %v2977_v21 = vadd.f32 %v2976_v55, %v2946_v44  ;;  %v2908_v60 = vadd.f32 %v2907_v15, %v2877_v30 }
 0x210   : > { %v3720_v7 = vpop.f32.mrf.mxu1  ;;  %v2882_v18 = vadd.f32 %v3753_v45, %v2670_v6 }
 0x211   : > { %v3757_v36 = vpop.f32.mrf.mxu0  ;;  %v2909_v20 = vadd.f32 %v2908_v60, %v2878_v16  ;;  %v2978_v29 = vadd.f32 %v2977_v21, %v2947_v32  ;;  %v2880_v34 = vadd.f32 %v2813_v48, %v2668_v51  ;;  %v2671_v53 = vadd.f32 %v3720_v7, %v5372_v61  ;;  %v5377_v48 = vld [vmem:[#allocation11_spill] sm:$0xff]  ;;  %v5381_v21 = vld [vmem:[#allocation22_spill] sm:$0xff]  ;;  %v5382_v60 = vld [vmem:[#allocation13_spill] sm:$0xff] }
 0x212   : > { %v2604_v9 = vpop.f32.mrf.mxu1  ;;  %v2242_v22 = vadd.f32 %v5378_v14, %v5377_v48  ;;  %v2952_v45 = vmul.f32 %v2882_v18, %v2882_v18  ;;  %v5383_v7 = vld [vmem:[#allocation16_spill] sm:$0xff] }
 0x213   : > { %v2669_v54 = vadd.f32 %v2604_v9, %v2441_v23  ;;  %v2829_v17 = vpop.f32.mrf.mxu0  ;;  %v2979_v35 = vadd.f32 %v2978_v29, %v2948_v12  ;;  %v2910_v42 = vadd.f32 %v2909_v20, %v2879_v4  ;;  %v2950_v57 = vmul.f32 %v2880_v34, %v2880_v34 }
 0x214   : > { %v3723_v19 = vpop.f32.mrf.mxu1  ;;  %v2883_v25 = vadd.f32 %v3754_v43, %v2671_v53  ;;  %v5380_v43 = vld [vmem:[#allocation17_spill] sm:$0xff]  ;;  %v2448_v4 = vadd.f32 %v5381_v21, %v2242_v22  ;;  %v2243_v23 = vadd.f32 %v5383_v7, %v5382_v60 }
 0x215   : > { %v2881_v39 = vadd.f32 %v2816_v62, %v2669_v54  ;;  %v3758_v0 = vpop.f32.mrf.mxu0  ;;  %v2911_v8 = vadd.f32 %v2910_v42, %v2880_v34  ;;  %v2980_v38 = vadd.f32 %v2979_v35, %v2949_v63  ;;  %v2674_v56 = vadd.f32 %v3723_v19, %v5379_v13  ;;  %v5384_v35 = vld [vmem:[#allocation20_spill] sm:$0xff] }
 0x216   : > { %v2617_v3 = vpop.f32.mrf.mxu1  ;;  %v2953_v44 = vmul.f32 %v2883_v25, %v2883_v25  ;;  %v2449_v42 = vadd.f32 %v5384_v35, %v2243_v23 }
 0x217   : > { %v2951_v10 = vmul.f32 %v2881_v39, %v2881_v39  ;;  %v2672_v58 = vadd.f32 %v2617_v3, %v2444_v2  ;;  %v2832_v49 = vpop.f32.mrf.mxu0  ;;  %v2981_v40 = vadd.f32 %v2980_v38, %v2950_v57  ;;  %v2912_v11 = vadd.f32 %v2911_v8, %v2881_v39  ;;  %v5386_v8 = vld [vmem:[#allocation18_spill] sm:$0xff] }
 0x218   : > { %v3724_v31 = vpop.f32.mrf.mxu1  ;;  %v2886_v24 = vadd.f32 %v3757_v36, %v2674_v56 }
 0x219   : > { %v3761_v27 = vpop.f32.mrf.mxu0  ;;  %v2913_v41 = vadd.f32 %v2912_v11, %v2882_v18  ;;  %v2982_v52 = vadd.f32 %v2981_v40, %v2951_v10  ;;  %v2884_v16 = vadd.f32 %v2829_v17, %v2672_v58  ;;  %v2675_v32 = vadd.f32 %v3724_v31, %v5380_v43 }
 0x21a   : > { %v2620_v30 = vpop.f32.mrf.mxu1  ;;  %v2956_v61 = vmul.f32 %v2886_v24, %v2886_v24 }
 0x21b   : > { %v2673_v15 = vadd.f32 %v2620_v30, %v2445_v37  ;;  %v2983_v55 = vadd.f32 %v2982_v52, %v2952_v45  ;;  %v2914_v33 = vadd.f32 %v2913_v41, %v2883_v25  ;;  %v2845_v62 = vpop.f32.mrf.mxu0  ;;  %v2954_v12 = vmul.f32 %v2884_v16, %v2884_v16 }
 0x21c   : > { %v3727_v51 = vpop.f32.mrf.mxu1  ;;  %v2887_v9 = vadd.f32 %v3758_v0, %v2675_v32 }
 0x21d   : > { %v2885_v5 = vadd.f32 %v2832_v49, %v2673_v15  ;;  %v2915_v28 = vadd.f32 %v2914_v33, %v2884_v16  ;;  %v2984_v20 = vadd.f32 %v2983_v55, %v2953_v44  ;;  %v3762_v63 = vpop.f32.mrf.mxu0  ;;  %v2678_v2 = vadd.f32 %v3727_v51, %v5385_v47 }
 0x21e   : > { %v2633_v29 = vpop.f32.mrf.mxu1  ;;  %v2957_v1 = vmul.f32 %v2887_v9, %v2887_v9 }
 0x21f   : > { %v2955_v59 = vmul.f32 %v2885_v5, %v2885_v5  ;;  %v2676_v6 = vadd.f32 %v2633_v29, %v2448_v4  ;;  %v2985_v34 = vadd.f32 %v2984_v20, %v2954_v12  ;;  %v2916_v54 = vadd.f32 %v2915_v28, %v2885_v5  ;;  %v2848_v38 = vpop.f32.mrf.mxu0 }
 0x220   : > { %v3728_v17 = vpop.f32.mrf.mxu1  ;;  %v2890_v3 = vadd.f32 %v3761_v27, %v2678_v2 }
 0x221   : > { %v2917_v53 = vadd.f32 %v2916_v54, %v2886_v24  ;;  %v2986_v19 = vadd.f32 %v2985_v34, %v2955_v59  ;;  %v2888_v36 = vadd.f32 %v2845_v62, %v2676_v6  ;;  %v2679_v57 = vadd.f32 %v3728_v17, %v5386_v8 }
 0x222   : > { %v2636_v46 = vpop.f32.mrf.mxu1  ;;  %v2960_v50 = vmul.f32 %v2890_v3, %v2890_v3 }
 0x223   : > { %v2677_v26 = vadd.f32 %v2636_v46, %v2449_v42  ;;  %v2987_v39 = vadd.f32 %v2986_v19, %v2956_v61  ;;  %v2918_v18 = vadd.f32 %v2917_v53, %v2887_v9  ;;  %v2958_v58 = vmul.f32 %v2888_v36, %v2888_v36 }
 0x224   : > { %v2891_v11 = vadd.f32 %v3762_v63, %v2679_v57 }
 0x225   : > { %v2889_v0 = vadd.f32 %v2848_v38, %v2677_v26  ;;  %v2919_v10 = vadd.f32 %v2918_v18, %v2888_v36  ;;  %v2988_v49 = vadd.f32 %v2987_v39, %v2957_v1 }
 0x226   : > { %v2961_v14 = vmul.f32 %v2891_v11, %v2891_v11 }
 0x227   : > { %v2959_v40 = vmul.f32 %v2889_v0, %v2889_v0  ;;  %v2989_v25 = vadd.f32 %v2988_v49, %v2958_v58  ;;  %v2920_v31 = vadd.f32 %v2919_v10, %v2889_v0 }
 0x229   : > { %v2921_v37 = vadd.f32 %v2920_v31, %v2890_v3  ;;  %v2990_v48 = vadd.f32 %v2989_v25, %v2959_v40 }
 0x22b   : > { %v2922_v22 = vadd.f32 %v2921_v37, %v2891_v11  ;;  %v2991_v13 = vadd.f32 %v2990_v48, %v2960_v50 }
 0x22d   : > { %v2923_v56 = vrot.slane %v2922_v22, 4  ;;  %v2992_v45 = vadd.f32 %v2991_v13, %v2961_v14 }
 0x22f   : > { %v2924_v41 = vadd.f32 %v2923_v56, %v2922_v22  ;;  %v2993_v52 = vrot.slane %v2992_v45, 4 }
 0x231   : > { %v2925_v27 = vrot.slane %v2924_v41, 2  ;;  %v2994_v16 = vadd.f32 %v2993_v52, %v2992_v45 }
 0x233   : > { %v2926_v30 = vadd.f32 %v2925_v27, %v2924_v41  ;;  %v2995_v15 = vrot.slane %v2994_v16, 2 }
 0x235   : > { %v2927_v44 = vrot.slane %v2926_v30, 1  ;;  %v2996_v55 = vadd.f32 %v2995_v15, %v2994_v16 }
 0x237   : > { %v2928_v33 = vadd.f32 %v2927_v44, %v2926_v30  ;;  %v2997_v43 = vrot.slane %v2996_v55, 1 }
 0x239   : > { %2929 = vst [vmem:[%s172_s11] sm:$0x1] %v2928_v33  ;;  %v2998_v32 = vadd.f32 %v2997_v43, %v2996_v55 }
 0x23b   : > { %2999 = vst [vmem:[%s175_s16] sm:$0x1] %v2998_v32 }
 0x23c PF: > { %s14_s12 = sadd.s32 1, %s3808_s12  }
 0x23d   : > { %p11_p4 = scmp.ge.s32.totalorder %s14_s12, 4  }
 0x23f   :  { %13 = sbr.rel (!%p11_p4) target bundleno = 1 (0x1), region = 78 }

// kernel: conv2dn_forward.3
= control target key start
LH: loop header
LB: loop body
LE: loop exit
PB: predicated region body
PF: predicated region fallthrough
CT: control target
= control target key end

     0   :  { %s3848_s15 = smov 0   ;;  %s5425_s0 = inlined_call_operand.vmem [shape: bf16[2,18,18,4], index: 0, kind: input, shape index: {}]   ;;  %s5426_s1 = inlined_call_operand.vmem [shape: bf16[3,3,4,128], index: 1, kind: input, shape index: {}]   ;;  %s5427_s2 = inlined_call_operand.vmem [shape: f32[1,128], index: 2, kind: input, shape index: {}]   ;;  %s5428_s3 = inlined_call_operand.vmem [shape: f32[1,128], index: 3, kind: input, shape index: {}]   ;;  %s5429_s4 = inlined_call_operand.vmem [shape: f32[2,256,8], index: 4, kind: output, shape index: {}]  }
   0x1 LB: > { %s3080_s16 = sadd.s32 4294967295, %s3821_s15   ;;  %p3084_p0 = scmp.ge.s32.totalorder %s3821_s15, 1  ;;  %s3821_s15 = sphi %s3848_s15, %s14_s15  }
   0x2   : > { %p162_p1 = scmp.lt.s32.totalorder %s3821_s15, 3 }
   0x4   : > { %p163_p2 = pnand %p3084_p0, %p162_p1 }
   0x6   : > { %166 = sbr.rel (%p163_p2) target bundleno = 556 (0x22c), region = 36 }
   0xb   : > { %v3088_v0 = vld [vmem:[%s5426_s1 + $0x2] sm:$0x3]  ;;  %vm740_vm0 = vcmask 1041408   ;;  %p188_p3 = scmp.lt.s32.totalorder %s3080_s16, 1  ;;  %v253_v2 = vld [vmem:[%s5426_s1] sm:$0x3] }
   0xc   : > { %3779 = vmatprep.subr.msk.bf16.mxu1 %vm740_vm0, %v3088_v0  ;;  %3778 = vmatprep.subr.msk.bf16.mxu0 %vm740_vm0, %v3088_v0  ;;  %v742_v1 = vsel %vm740_vm0, %v3088_v0, 0  ;;  %v3169_v3 = vld [vmem:[%s5426_s1 + $0x4] sm:$0x3]  ;;  %vm254_vm1 = vsmask.f32 3328  ;;  %v3879_v4 = vsel %vm740_vm0, %v253_v2, 0 }
   0xd   : > { %3777 = vmatpush3.bf16.msra.mxu1 %v742_v1  ;;  %3471 = vmatpush3.bf16.msra.mxu0 %v742_v1  ;;  %s5633_s16 = smov (!%p188_p3, %s3080_s16), 1  ;;  %vm255_vm2 = vsmask.f32 7440  ;;  %v3882_v5 = vsel %vm740_vm0, %v3169_v3, 0  ;;  %vm691_vm3 = vcmask 31744   ;;  %v5473_v32 = vmov 0 }
   0xe   : > { %3780 = vmatprep.subr.msk.bf16.mxu1 %vm740_vm0, %v253_v2  ;;  %3781 = vmatprep.subr.msk.bf16.mxu0 %vm740_vm0, %v3169_v3  ;;  %s3788_s23 = smul.u32 216, %s5633_s16  ;;  %vm3921_vm4 = vmor %vm254_vm1, %vm255_vm2  ;;  %vm1213_vm5 = vcmask 1042432   ;;  %vm1214_vm6 = vcmask 1046532   ;;  %s3316_s17 = sshll.u32 %s5633_s16, 8  ;;  %vm2992_vm8 = vcmask 64512  }
   0xf   : > { %v5474_v32 = vsel %vm3921_vm4, 4294967295, %v5473_v32  ;;  %vm4244_vm7 = vmor %vm1213_vm5, %vm1214_vm6  ;;  %s5216_s21 = scalar_lea.vmem %s5429_s4, %s3316_s17 }
  0x10   : > { %s3876_s26 = scalar_lea.vmem %s5425_s0, %s3788_s23  ;;  %5475 = vst [vmem:[#allocation2_spill] sm:$0xff] %v5474_v32 }
  0x11   : > { %v3885_v6 = vld [vmem:[%s3876_s26] sm:$0xf]  ;;  %v3888_v7 = vld [vmem:[%s3876_s26 + $0x4] sm:$0xf]  ;;  %v3891_v8 = vld [vmem:[%s3876_s26 + $0x8] sm:$0x1] }
  0x12   : > { %v258_v9 = vshrl.u32 %v3885_v6, 16  ;;  %v261_v10 = vshll.u32 %v3885_v6, 16  ;;  %v267_v11 = vshll.u32 %v3888_v7, 16  ;;  %v271_v12 = vshrl.u32 %v3888_v7, 16  ;;  %v3898_v13 = vld [vmem:[%s3876_s26 + $0x60] sm:$0xf] }
  0x13   : > { %v277_v14 = vshll.u32 %v3891_v8, 16  ;;  %v3903_v16 = vld [vmem:[%s3876_s26 + $0x64] sm:$0xf]  ;;  %v3906_v17 = vld [vmem:[%s3876_s26 + $0x68] sm:$0x1]  ;;  %v450_v23 = vshrl.u32 %v3898_v13, 16 }
  0x14   : > { %v260_v18 = vrot.slane %v258_v9, 4  ;;  %v263_v19 = vrot.slane %v261_v10, 5  ;;  %v269_v20 = vrot.slane %v267_v11, 5  ;;  %v273_v21 = vrot.slane %v271_v12, 4  ;;  %v3914_v30 = vld [vmem:[%s3876_s26 + $0xc] sm:$0xf] }
  0x15   : > { %v279_v22 = vrot.slane %v277_v14, 5  ;;  %v453_v24 = vshll.u32 %v3898_v13, 16  ;;  %v459_v25 = vshll.u32 %v3903_v16, 16  ;;  %v463_v28 = vshrl.u32 %v3903_v16, 16  ;;  %v3917_v31 = vld [vmem:[%s3876_s26 + $0x10] sm:$0xf] }
  0x16   : > { %v264_v26 = vor.u32 %v263_v19, %v260_v18  ;;  %v274_v27 = vor.u32 %v273_v21, %v269_v20  ;;  %v469_v29 = vshll.u32 %v3906_v17, 16  ;;  %v452_v33 = vrot.slane %v450_v23, 4  ;;  %v3928_v42 = vld [vmem:[%s3876_s26 + $0x14] sm:$0x1]  ;;  %v3939_v54 = vld [vmem:[%s3876_s26 + $0x6c] sm:$0xf] }
  0x17   : > { %v455_v34 = vrot.slane %v453_v24, 5  ;;  %v461_v35 = vrot.slane %v459_v25, 5  ;;  %v465_v39 = vrot.slane %v463_v28, 4  ;;  %v282_v43 = vshrl.u32 %v3914_v30, 16  ;;  %5476 = vst [vmem:[#allocation3_spill] sm:$0xff] %v3939_v54 }
  0x18   : > { %v265_v37 = vrot.slane %v264_v26, 4  ;;  %v275_v38 = vrot.slane %v274_v27, 4  ;;  %v471_v40 = vrot.slane %v469_v29, 5  ;;  %v285_v44 = vshll.u32 %v3914_v30, 16  ;;  %v3943_v59 = vld [vmem:[%s3876_s26 + $0x70] sm:$0xf] }
  0x19   : > { %v456_v41 = vor.u32 %v455_v34, %v452_v33  ;;  %v291_v45 = vshll.u32 %v3917_v31, 16  ;;  %v466_v48 = vor.u32 %v465_v39, %v461_v35  ;;  %v295_v49 = vshrl.u32 %v3917_v31, 16  ;;  %v3951_v0 = vld [vmem:[%s3876_s26 + $0x74] sm:$0x1]  ;;  %v3957_v10 = vld [vmem:[%s3876_s26 + $0x18] sm:$0xf] }
  0x1a   : > { %v270_v46 = vsel %vm3921_vm4, %v265_v37, %v269_v20  ;;  %v280_v47 = vsel %vm3921_vm4, %v275_v38, %v279_v22  ;;  %v284_v52 = vrot.slane %v282_v43, 4  ;;  %v287_v53 = vrot.slane %v285_v44, 5  ;;  %5477 = vst [vmem:[#allocation4_spill] sm:$0xff] %v3951_v0  ;;  %v3966_v23 = vld [vmem:[%s3876_s26 + $0x1c] sm:$0xf] }
  0x1b   : > { %v3089_v50 = vcombine.low %v270_v46, %v280_v47  ;;  %v457_v51 = vrot.slane %v456_v41, 4  ;;  %v467_v55 = vrot.slane %v466_v48, 4  ;;  %v293_v56 = vrot.slane %v291_v45, 5  ;;  %v3973_v27 = vld [vmem:[%s3876_s26 + $0x20] sm:$0x1] }
  0x1c   : > { %v297_v57 = vrot.slane %v295_v49, 4  ;;  %v301_v58 = vshll.u32 %v3928_v42, 16  ;;  %v288_v61 = vor.u32 %v287_v53, %v284_v52  ;;  %v474_v9 = vshrl.u32 %v3939_v54, 16  ;;  %v3980_v37 = vld [vmem:[%s3876_s26 + $0x78] sm:$0xf] }
  0x1d   : > { %3472 = vmatprep.mubr.msk.bf16.mxu0 %vm691_vm3, %v3089_v50  ;;  %v462_v60 = vsel %vm3921_vm4, %v457_v51, %v461_v35  ;;  %v472_v1 = vsel %vm3921_vm4, %v467_v55, %v471_v40  ;;  %v477_v14 = vshll.u32 %v3939_v54, 16  ;;  %v483_v18 = vshll.u32 %v3943_v59, 16  ;;  %5479 = vst [vmem:[#allocation6_spill] sm:$0xff] %v3980_v37  ;;  %v3988_v43 = vld [vmem:[%s5426_s1 + $0x8] sm:$0x3] }
  0x1e   : > { %v298_v2 = vor.u32 %v297_v57, %v293_v56  ;;  %v303_v3 = vrot.slane %v301_v58, 5  ;;  %v3959_v11 = vcombine.low %v462_v60, %v472_v1  ;;  %v289_v12 = vrot.slane %v288_v61, 4  ;;  %v3993_v48 = vld [vmem:[%s3876_s26 + $0x7c] sm:$0xf]  ;;  %v4001_v58 = vld [vmem:[%s3876_s26 + $0x80] sm:$0x1] }
  0x1f   : > { %v476_v20 = vrot.slane %v474_v9, 4  ;;  %v487_v21 = vshrl.u32 %v3943_v59, 16  ;;  %v493_v22 = vshll.u32 %v3951_v0, 16  ;;  %v479_v25 = vrot.slane %v477_v14, 5  ;;  %5481 = vst [vmem:[#allocation8_spill] sm:$0xff] %v3993_v48  ;;  %5482 = vst [vmem:[#allocation9_spill] sm:$0xff] %v4001_v58 }
  0x20   : > { %5478 = vst [vmem:[#allocation5_spill] sm:$0xff] %v3959_v11  ;;  %v299_v19 = vrot.slane %v298_v2, 4  ;;  %3488 = vmatprep.mubr.msk.bf16.mxu1 %vm691_vm3, %v3959_v11  ;;  %v294_v24 = vsel %vm3921_vm4, %v289_v12, %v293_v56  ;;  %v485_v26 = vrot.slane %v483_v18, 5  ;;  %v306_v28 = vshrl.u32 %v3957_v10, 16  ;;  %v4015_v18 = vld [vmem:[%s3876_s26 + $0x28] sm:$0xf] }
  0x21   : > { %v489_v33 = vrot.slane %v487_v21, 4  ;;  %v495_v34 = vrot.slane %v493_v22, 5  ;;  %v309_v35 = vshll.u32 %v3957_v10, 16  ;;  %v480_v39 = vor.u32 %v479_v25, %v476_v20 }
  0x22   : > { %v304_v29 = vsel %vm3921_vm4, %v299_v19, %v303_v3  ;;  %v308_v40 = vrot.slane %v306_v28, 4  ;;  %v315_v41 = vshll.u32 %v3966_v23, 16  ;;  %v319_v46 = vshrl.u32 %v3966_v23, 16  ;;  %v4007_v3 = vld [vmem:[%s3876_s26 + $0x24] sm:$0xf] }
  0x23   : > { %v3982_v38 = vcombine.low %v294_v24, %v304_v29  ;;  %v490_v44 = vor.u32 %v489_v33, %v485_v26  ;;  %v311_v45 = vrot.slane %v309_v35, 5  ;;  %v325_v47 = vshll.u32 %v3973_v27, 16  ;;  %v4023_v24 = vld [vmem:[%s5426_s1 + $0x6] sm:$0x3]  ;;  %v4028_v29 = vld [vmem:[%s3876_s26 + $0x2c] sm:$0x1] }
  0x24   : > { %v481_v49 = vrot.slane %v480_v39, 4  ;;  %v317_v50 = vrot.slane %v315_v41, 5  ;;  %v498_v51 = vshrl.u32 %v3980_v37, 16  ;;  %v501_v52 = vshll.u32 %v3980_v37, 16  ;;  %v4036_v41 = vld [vmem:[%s3876_s26 + $0x84] sm:$0xf] }
  0x25   : > { %5480 = vst [vmem:[#allocation7_spill] sm:$0xff] %v3982_v38  ;;  %3473 = vmatmul.mubr.msk.bf16.vlgmr.msra.gmra.mxu0 %vm691_vm3, %v3982_v38  ;;  %v491_v53 = vrot.slane %v490_v44, 4  ;;  %v312_v55 = vor.u32 %v311_v45, %v308_v40  ;;  %v321_v56 = vrot.slane %v319_v46, 4  ;;  %v327_v57 = vrot.slane %v325_v47, 5  ;;  %v4183_v38 = vld [vmem:[%s3876_s26 + $0xb0] sm:$0x1] }
  0x26   : > { %3539 = vmatpush3.bf16.msra.mxu0 %v3882_v5  ;;  %v486_v60 = vsel %vm3921_vm4, %v481_v49, %v485_v26  ;;  %v500_v61 = vrot.slane %v498_v51, 4  ;;  %v503_v1 = vrot.slane %v501_v52, 5  ;;  %v507_v2 = vshll.u32 %v3993_v48, 16  ;;  %v4043_v49 = vld [vmem:[%s3876_s26 + $0x88] sm:$0xf]  ;;  %5494 = vst [vmem:[#allocation21_spill] sm:$0xff] %v4183_v38 }
  0x27   : > { %3783 = vmatprep.subr.msk.bf16.mxu0 %vm740_vm0, %v3988_v43  ;;  %v496_v5 = vsel %vm3921_vm4, %v491_v53, %v495_v34  ;;  %v313_v9 = vrot.slane %v312_v55, 4  ;;  %v322_v12 = vor.u32 %v321_v56, %v317_v50  ;;  %v511_v14 = vshrl.u32 %v3993_v48, 16  ;;  %v4205_v48 = vld [vmem:[%s3876_s26 + $0x5c] sm:$0x1] }
  0x28   : > { %v4017_v19 = vcombine.low %v486_v60, %v496_v5  ;;  %v504_v20 = vor.u32 %v503_v1, %v500_v61  ;;  %v509_v21 = vrot.slane %v507_v2, 5  ;;  %v517_v22 = vshll.u32 %v4001_v58, 16 }
  0x29   : > { %v318_v25 = vsel %vm3921_vm4, %v313_v9, %v317_v50  ;;  %v323_v26 = vrot.slane %v322_v12, 4  ;;  %v513_v28 = vrot.slane %v511_v14, 4  ;;  %v330_v33 = vshrl.u32 %v4007_v3, 16  ;;  %v4062_v9 = vld [vmem:[%s3876_s26 + $0x30] sm:$0xf] }
  0x2a   : > { %5483 = vst [vmem:[#allocation10_spill] sm:$0xff] %v4017_v19  ;;  %3489 = vmatmul.mubr.msk.bf16.vlgmr.msra.gmra.mxu1 %vm691_vm3, %v4017_v19  ;;  %v505_v34 = vrot.slane %v504_v20, 4  ;;  %v519_v35 = vrot.slane %v517_v22, 5  ;;  %v333_v39 = vshll.u32 %v4007_v3, 16  ;;  %v339_v40 = vshll.u32 %v4015_v18, 16 }
  0x2b   : > { %3505 = vmatpush3.bf16.msra.mxu1 %v3879_v4  ;;  %v328_v44 = vsel %vm3921_vm4, %v323_v26, %v327_v57  ;;  %v514_v45 = vor.u32 %v513_v28, %v509_v21  ;;  %v332_v46 = vrot.slane %v330_v33, 4  ;;  %v343_v47 = vshrl.u32 %v4015_v18, 16  ;;  %v4053_v57 = vld [vmem:[%s3876_s26 + $0x8c] sm:$0x1]  ;;  %v4067_v22 = vld [vmem:[%s3876_s26 + $0x34] sm:$0xf] }
  0x2c   : > { %v4045_v50 = vcombine.low %v318_v25, %v328_v44  ;;  %v510_v51 = vsel %vm3921_vm4, %v505_v34, %v509_v21  ;;  %v335_v52 = vrot.slane %v333_v39, 5  ;;  %v341_v53 = vrot.slane %v339_v40, 5  ;;  %3782 = vmatprep.subr.msk.bf16.mxu1 %vm740_vm0, %v4023_v24 }
  0x2d   : > { %v515_v4 = vrot.slane %v514_v45, 4  ;;  %v345_v55 = vrot.slane %v343_v47, 4  ;;  %v349_v56 = vshll.u32 %v4028_v29, 16  ;;  %v522_v60 = vshrl.u32 %v4036_v41, 16 }
  0x2e   : > { %5484 = vst [vmem:[#allocation11_spill] sm:$0xff] %v4045_v50  ;;  %3476 = vmatprep.mubr.msk.bf16.mxu0 %vm691_vm3, %v4045_v50  ;;  %v336_v61 = vor.u32 %v335_v52, %v332_v46  ;;  %v525_v1 = vshll.u32 %v4036_v41, 16  ;;  %v531_v2 = vshll.u32 %v4043_v49, 16  ;;  %v535_v5 = vshrl.u32 %v4043_v49, 16  ;;  %v4078_v46 = vld [vmem:[%s3876_s26 + $0x38] sm:$0x1] }
  0x2f   : > { %v520_v12 = vsel %vm3921_vm4, %v515_v4, %v519_v35  ;;  %v346_v14 = vor.u32 %v345_v55, %v341_v53  ;;  %v351_v20 = vrot.slane %v349_v56, 5  ;;  %v524_v21 = vrot.slane %v522_v60, 4  ;;  %v4083_v52 = vld [vmem:[%s3876_s26 + $0x90] sm:$0xf] }
  0x30   : > { %v4069_v25 = vcombine.low %v510_v51, %v520_v12  ;;  %v337_v26 = vrot.slane %v336_v61, 4  ;;  %v527_v28 = vrot.slane %v525_v1, 5  ;;  %v533_v33 = vrot.slane %v531_v2, 5  ;;  %v4088_v61 = vld [vmem:[%s3876_s26 + $0x94] sm:$0xf] }
  0x31   : > { %v347_v34 = vrot.slane %v346_v14, 4  ;;  %v537_v39 = vrot.slane %v535_v5, 4  ;;  %v541_v40 = vshll.u32 %v4053_v57, 16  ;;  %v354_v44 = vshrl.u32 %v4062_v9, 16 }
  0x32   : > { %5485 = vst [vmem:[#allocation12_spill] sm:$0xff] %v4069_v25  ;;  %3492 = vmatprep.mubr.msk.bf16.mxu1 %vm691_vm3, %v4069_v25  ;;  %v342_v35 = vsel %vm3921_vm4, %v337_v26, %v341_v53  ;;  %v528_v45 = vor.u32 %v527_v28, %v524_v21  ;;  %v357_v47 = vshll.u32 %v4062_v9, 16  ;;  %v363_v51 = vshll.u32 %v4067_v22, 16  ;;  %v4134_v25 = vld [vmem:[%s3876_s26 + $0xa0] sm:$0xf] }
  0x33   : > { %v352_v4 = vsel %vm3921_vm4, %v347_v34, %v351_v20  ;;  %v538_v55 = vor.u32 %v537_v39, %v533_v33  ;;  %v543_v56 = vrot.slane %v541_v40, 5  ;;  %v356_v60 = vrot.slane %v354_v44, 4  ;;  %v4100_v34 = vld [vmem:[%s3876_s26 + $0x98] sm:$0x1]  ;;  %v4105_v44 = vld [vmem:[%s3876_s26 + $0x3c] sm:$0xf] }
  0x34   : > { %v4090_v53 = vcombine.low %v342_v35, %v352_v4  ;;  %v529_v1 = vrot.slane %v528_v45, 4  ;;  %v359_v2 = vrot.slane %v357_v47, 5  ;;  %v365_v5 = vrot.slane %v363_v51, 5  ;;  %v4110_v4 = vld [vmem:[%s3876_s26 + $0x40] sm:$0xf] }
  0x35   : > { %v539_v12 = vrot.slane %v538_v55, 4  ;;  %v367_v14 = vshrl.u32 %v4067_v22, 16  ;;  %v373_v21 = vshll.u32 %v4078_v46, 16  ;;  %v546_v20 = vshrl.u32 %v4083_v52, 16 }
  0x36   : > { %5486 = vst [vmem:[#allocation13_spill] sm:$0xff] %v4090_v53  ;;  %3477 = vmatmul.mubr.msk.bf16.gmra.mxu0 %vm691_vm3, %v4090_v53  ;;  %v534_v26 = vsel %vm3921_vm4, %v529_v1, %v533_v33  ;;  %v360_v28 = vor.u32 %v359_v2, %v356_v60  ;;  %v549_v39 = vshll.u32 %v4083_v52, 16  ;;  %v555_v40 = vshll.u32 %v4088_v61, 16 }
  0x37   : > { %v544_v35 = vsel %vm3921_vm4, %v539_v12, %v543_v56  ;;  %v369_v45 = vrot.slane %v367_v14, 4  ;;  %v375_v47 = vrot.slane %v373_v21, 5  ;;  %v548_v51 = vrot.slane %v546_v20, 4  ;;  %v4122_v14 = vld [vmem:[%s3876_s26 + $0x44] sm:$0x1] }
  0x38   : > { %v4112_v33 = vcombine.low %v534_v26, %v544_v35  ;;  %v361_v55 = vrot.slane %v360_v28, 4  ;;  %v551_v60 = vrot.slane %v549_v39, 5  ;;  %v557_v1 = vrot.slane %v555_v40, 5  ;;  %v4127_v26 = vld [vmem:[%s3876_s26 + $0x9c] sm:$0xf] }
  0x39   : > { %v370_v2 = vor.u32 %v369_v45, %v365_v5  ;;  %v559_v36 = vshrl.u32 %v4088_v61, 16  ;;  %v565_v63 = vshll.u32 %v4100_v34, 16  ;;  %v378_v15 = vshrl.u32 %v4105_v44, 16 }
  0x3a   : > { %5487 = vst [vmem:[#allocation14_spill] sm:$0xff] %v4112_v33  ;;  %3493 = vmatmul.mubr.msk.bf16.gmra.mxu1 %vm691_vm3, %v4112_v33  ;;  %v366_v56 = vsel %vm3921_vm4, %v361_v55, %v365_v5  ;;  %v552_v12 = vor.u32 %v551_v60, %v548_v51  ;;  %v381_v21 = vshll.u32 %v4105_v44, 16  ;;  %v387_v20 = vshll.u32 %v4110_v4, 16 }
  0x3b   : > { %v371_v28 = vrot.slane %v370_v2, 4  ;;  %v561_v39 = vrot.slane %v559_v36, 4  ;;  %v567_v40 = vrot.slane %v565_v63, 5  ;;  %v380_v35 = vrot.slane %v378_v15, 4 }
  0x3c   : > { %v553_v45 = vrot.slane %v552_v12, 4  ;;  %v383_v62 = vrot.slane %v381_v21, 5  ;;  %v389_v33 = vrot.slane %v387_v20, 5  ;;  %v391_v5 = vshrl.u32 %v4110_v4, 16  ;;  %v4142_v21 = vld [vmem:[%s3876_s26 + $0xa4] sm:$0x1] }
  0x3d   : > { %v376_v51 = vsel %vm3921_vm4, %v371_v28, %v375_v47  ;;  %v562_v55 = vor.u32 %v561_v39, %v557_v1  ;;  %v397_v60 = vshll.u32 %v4122_v14, 16  ;;  %v570_v2 = vshrl.u32 %v4127_v26, 16  ;;  %5489 = vst [vmem:[#allocation16_spill] sm:$0xff] %v4142_v21  ;;  %v4145_v20 = vld [vmem:[%s3876_s26 + $0x48] sm:$0xf] }
  0x3e   : > { %v4137_v36 = vcombine.low %v366_v56, %v376_v51  ;;  %v558_v15 = vsel %vm3921_vm4, %v553_v45, %v557_v1  ;;  %v384_v63 = vor.u32 %v383_v62, %v380_v35  ;;  %v393_v12 = vrot.slane %v391_v5, 4 }
  0x3f   : > { %v563_v47 = vrot.slane %v562_v55, 4  ;;  %v399_v28 = vrot.slane %v397_v60, 5  ;;  %v572_v39 = vrot.slane %v570_v2, 4  ;;  %v573_v19 = vshll.u32 %v4127_v26, 16  ;;  %v4156_v55 = vld [vmem:[%s3876_s26 + $0x4c] sm:$0xf] }
  0x40   : > { %5488 = vst [vmem:[#allocation15_spill] sm:$0xff] %v4137_v36  ;;  %3480 = vmatprep.mubr.msk.bf16.mxu0 %vm691_vm3, %v4137_v36  ;;  %v385_v56 = vrot.slane %v384_v63, 4  ;;  %v394_v51 = vor.u32 %v393_v12, %v389_v33  ;;  %v579_v1 = vshll.u32 %v4134_v25, 16  ;;  %v583_v62 = vshrl.u32 %v4134_v25, 16  ;;  %v4164_v36 = vld [vmem:[%s3876_s26 + $0x50] sm:$0x1] }
  0x41   : > { %v568_v35 = vsel %vm3921_vm4, %v563_v47, %v567_v40  ;;  %v575_v45 = vrot.slane %v573_v19, 5  ;;  %v589_v5 = vshll.u32 %v4142_v21, 16  ;;  %v402_v60 = vshrl.u32 %v4145_v20, 16  ;;  %v4167_v47 = vld [vmem:[%s3876_s26 + $0xa8] sm:$0xf] }
  0x42   : > { %v4159_v2 = vcombine.low %v558_v15, %v568_v35  ;;  %v390_v63 = vsel %vm3921_vm4, %v385_v56, %v389_v33  ;;  %v395_v12 = vrot.slane %v394_v51, 4  ;;  %v581_v11 = vrot.slane %v579_v1, 5  ;;  %5491 = vst [vmem:[#allocation18_spill] sm:$0xff] %v4167_v47 }
  0x43   : > { %v576_v53 = vor.u32 %v575_v45, %v572_v39  ;;  %v585_v50 = vrot.slane %v583_v62, 4  ;;  %v591_v40 = vrot.slane %v589_v5, 5  ;;  %v404_v19 = vrot.slane %v402_v60, 4  ;;  %v4180_v45 = vld [vmem:[%s3876_s26 + $0xac] sm:$0xf] }
  0x44   : > { %5490 = vst [vmem:[#allocation17_spill] sm:$0xff] %v4159_v2  ;;  %3496 = vmatprep.mubr.msk.bf16.mxu1 %vm691_vm3, %v4159_v2  ;;  %v400_v15 = vsel %vm3921_vm4, %v395_v12, %v399_v28  ;;  %v405_v33 = vshll.u32 %v4145_v20, 16  ;;  %v411_v56 = vshll.u32 %v4156_v55, 16  ;;  %v415_v51 = vshrl.u32 %v4156_v55, 16  ;;  %5493 = vst [vmem:[#allocation20_spill] sm:$0xff] %v4180_v45 }
  0x45   : > { %v4176_v1 = vcombine.low %v390_v63, %v400_v15  ;;  %v577_v39 = vrot.slane %v576_v53, 4  ;;  %v586_v62 = vor.u32 %v585_v50, %v581_v11  ;;  %v421_v35 = vshll.u32 %v4164_v36, 16 }
  0x46   : > { %v407_v5 = vrot.slane %v405_v33, 5  ;;  %v413_v60 = vrot.slane %v411_v56, 5  ;;  %v417_v2 = vrot.slane %v415_v51, 4  ;;  %v594_v28 = vshrl.u32 %v4167_v47, 16  ;;  %v4193_v51 = vld [vmem:[%s3876_s26 + $0x54] sm:$0xf] }
  0x47   : > { %5492 = vst [vmem:[#allocation19_spill] sm:$0xff] %v4176_v1  ;;  %3481 = vmatmul.mubr.msk.bf16.gmra.mxu0 %vm691_vm3, %v4176_v1  ;;  %v582_v53 = vsel %vm3921_vm4, %v577_v39, %v581_v11  ;;  %v587_v50 = vrot.slane %v586_v62, 4  ;;  %v423_v63 = vrot.slane %v421_v35, 5  ;;  %v597_v12 = vshll.u32 %v4167_v47, 16  ;;  %v4200_v62 = vld [vmem:[%s3876_s26 + $0x58] sm:$0xf] }
  0x48   : > { %v408_v15 = vor.u32 %v407_v5, %v404_v19  ;;  %v418_v58 = vor.u32 %v417_v2, %v413_v60  ;;  %v596_v33 = vrot.slane %v594_v28, 4  ;;  %v603_v56 = vshll.u32 %v4180_v45, 16 }
  0x49   : > { %v592_v1 = vsel %vm3921_vm4, %v587_v50, %v591_v40  ;;  %v599_v37 = vrot.slane %v597_v12, 5  ;;  %v607_v11 = vshrl.u32 %v4180_v45, 16  ;;  %v613_v39 = vshll.u32 %v4183_v38, 16 }
  0x4a   : > { %v4202_v2 = vcombine.low %v582_v53, %v592_v1  ;;  %v409_v19 = vrot.slane %v408_v15, 4  ;;  %v419_v35 = vrot.slane %v418_v58, 4  ;;  %v605_v5 = vrot.slane %v603_v56, 5 }
  0x4b   : > { %v600_v28 = vor.u32 %v599_v37, %v596_v33  ;;  %v609_v0 = vrot.slane %v607_v11, 4  ;;  %v615_v54 = vrot.slane %v613_v39, 5  ;;  %v426_v40 = vshrl.u32 %v4193_v51, 16  ;;  %v4217_v37 = vld [vmem:[%s3876_s26 + $0xb4] sm:$0xf] }
  0x4c   : > { %5495 = vst [vmem:[#allocation22_spill] sm:$0xff] %v4202_v2  ;;  %3497 = vmatmul.mubr.msk.bf16.gmra.mxu1 %vm691_vm3, %v4202_v2  ;;  %v414_v50 = vsel %vm3921_vm4, %v409_v19, %v413_v60  ;;  %v424_v1 = vsel %vm3921_vm4, %v419_v35, %v423_v63  ;;  %v429_v58 = vshll.u32 %v4193_v51, 16  ;;  %v435_v53 = vshll.u32 %v4200_v62, 16  ;;  %5496 = vst [vmem:[#allocation23_spill] sm:$0xff] %v4217_v37  ;;  %v4222_v11 = vld [vmem:[%s3876_s26 + $0xb8] sm:$0xf] }
  0x4d   : > { %v4219_v12 = vcombine.low %v414_v50, %v424_v1  ;;  %v601_v15 = vrot.slane %v600_v28, 4  ;;  %v610_v33 = vor.u32 %v609_v0, %v605_v5  ;;  %v428_v56 = vrot.slane %v426_v40, 4 }
  0x4e   : > { %v431_v39 = vrot.slane %v429_v58, 5  ;;  %v437_v2 = vrot.slane %v435_v53, 5  ;;  %v439_v60 = vshrl.u32 %v4200_v62, 16  ;;  %v445_v63 = vshll.u32 %v4205_v48, 16  ;;  %v4233_v58 = vld [vmem:[%s3876_s26 + $0xbc] sm:$0x1] }
  0x4f   : > { %5497 = vst [vmem:[#allocation24_spill] sm:$0xff] %v4219_v12  ;;  %3484 = vmatprep.mubr.msk.bf16.mxu0 %vm691_vm3, %v4219_v12  ;;  %v606_v19 = vsel %vm3921_vm4, %v601_v15, %v605_v5  ;;  %v611_v35 = vrot.slane %v610_v33, 4  ;;  %v618_v28 = vshrl.u32 %v4217_v37, 16  ;;  %v621_v0 = vshll.u32 %v4217_v37, 16 }
  0x50   : > { %v432_v40 = vor.u32 %v431_v39, %v428_v56  ;;  %v441_v50 = vrot.slane %v439_v60, 4  ;;  %v447_v1 = vrot.slane %v445_v63, 5  ;;  %v627_v53 = vshll.u32 %v4222_v11, 16 }
  0x51   : > { %v616_v38 = vsel %vm3921_vm4, %v611_v35, %v615_v54  ;;  %v620_v47 = vrot.slane %v618_v28, 4  ;;  %v623_v12 = vrot.slane %v621_v0, 5  ;;  %v631_v45 = vshrl.u32 %v4222_v11, 16 }
  0x52   : > { %v4239_v5 = vcombine.low %v606_v19, %v616_v38  ;;  %v433_v15 = vrot.slane %v432_v40, 4  ;;  %v442_v33 = vor.u32 %v441_v50, %v437_v2  ;;  %v629_v21 = vrot.slane %v627_v53, 5 }
  0x53   : > { %v624_v37 = vor.u32 %v623_v12, %v620_v47  ;;  %v633_v56 = vrot.slane %v631_v45, 4  ;;  %v637_v39 = vshll.u32 %v4233_v58, 16  ;;  %v3153_v54 = vrot.slane %v3885_v6, 9 }
  0x54   : > { %3500 = vmatprep.mubr.msk.bf16.mxu1 %vm691_vm3, %v4239_v5  ;;  %v438_v38 = vsel %vm3921_vm4, %v433_v15, %v437_v2  ;;  %v443_v63 = vrot.slane %v442_v33, 4  ;;  %v1218_v47 = vrot.slane %v3888_v7, 5  ;;  %v4256_v45 = vcombine.low %v3914_v30, %v3917_v31 }
  0x55   : > { %v625_v12 = vrot.slane %v624_v37, 4  ;;  %v634_v19 = vor.u32 %v633_v56, %v629_v21  ;;  %v639_v35 = vrot.slane %v637_v39, 5  ;;  %v3154_v28 = vrot.slane %v3914_v30, 9 }
  0x56   : > { %v448_v0 = vsel %vm3921_vm4, %v443_v63, %v447_v1  ;;  %v1219_v40 = vsel %vm4244_vm7, %v3153_v54, %v1218_v47  ;;  %v1220_v50 = vrot.slane %v1218_v47, 4  ;;  %v5500_v2 = vrot.slane %v3917_v31, 5 }
  0x57   : > { %v4265_v15 = vcombine.low %v438_v38, %v448_v0  ;;  %v630_v33 = vsel %vm3921_vm4, %v625_v12, %v629_v21  ;;  %v635_v37 = vrot.slane %v634_v19, 4  ;;  %v5502_v1 = vrot.slane %v3891_v8, 5 }
  0x58   : > { %v1227_v53 = vrot.slane %v5500_v2, 4  ;;  %v5501_v56 = vmov %v5500_v2  ;;  %v5503_v54 = vrot.slane %v3928_v42, 5  ;;  %v4283_v63 = vcombine.low %v3957_v10, %v3966_v23 }
  0x59   : > { %v1226_v30 = vsel %vm4244_vm7, %v3154_v28, %v5501_v56  ;;  %v1222_v39 = vsel %vm4244_vm7, %v1220_v50, %v5502_v1  ;;  %v3155_v21 = vrot.slane %v3957_v10, 9  ;;  %3485 = vmatmul.mubr.msk.bf16.gmra.mxu0 %vm691_vm3, %v4265_v15  ;;  %v640_v8 = vsel %vm3921_vm4, %v635_v37, %v639_v35 }
  0x5a   : > { %v1229_v38 = vsel %vm4244_vm7, %v1227_v53, %v5503_v54  ;;  %v3170_v31 = vcombine.low %v1219_v40, %v1222_v39  ;;  %v1232_v42 = vrot.slane %v3966_v23, 5  ;;  %v4293_v12 = vcombine.low %v630_v33, %v640_v8 }
  0x5b   : > { %v4290_v47 = vcombine.low %v1226_v30, %v1229_v38  ;;  %v1235_v19 = vrot.slane %v3973_v27, 5  ;;  %v1239_v0 = vrot.slane %v4015_v18, 5  ;;  %v3156_v35 = vrot.slane %v4007_v3, 9 }
  0x5c   : > { %5504 = vst [vmem:[#allocation25_spill] sm:$0xff] %v4293_v12  ;;  %3540 = vmatprep.mubr.msk.bf16.mxu0 %vm691_vm3, %v3170_v31  ;;  %v1233_v10 = vsel %vm4244_vm7, %v3155_v21, %v1232_v42  ;;  %v1234_v28 = vrot.slane %v1232_v42, 4  ;;  %3501 = vmatmul.mubr.msk.bf16.gmra.mxu1 %vm691_vm3, %v4293_v12  ;;  %v3157_v40 = vrot.slane %v4062_v9, 9  ;;  %v1246_v23 = vrot.slane %v4067_v22, 5 }
  0x5d   : > { %v5505_v27 = vcombine.low %v3885_v6, %v3888_v7  ;;  %v1241_v2 = vrot.slane %v1239_v0, 4  ;;  %v1242_v53 = vrot.slane %v4028_v29, 5  ;;  %v1249_v33 = vrot.slane %v4078_v46, 5  ;;  %v4328_v46 = vld [vmem:[%s5426_s1 + $0xc] sm:$0x3] }
  0x5e   : > { %v1236_v50 = vsel %vm4244_vm7, %v1234_v28, %v1235_v19  ;;  %v1248_v56 = vrot.slane %v1246_v23, 4  ;;  %v1861_v30 = vsel %vm740_vm0, %v3988_v43, 0  ;;  %v1253_v1 = vrot.slane %v4110_v4, 5  ;;  %v4345_v19 = vld [vmem:[%s5426_s1 + $0xa] sm:$0x3] }
  0x5f   : > { %3506 = vmatprep.mubr.msk.bf16.mxu1 %vm691_vm3, %v5505_v27  ;;  %v4313_v37 = vcombine.low %v1233_v10, %v1236_v50  ;;  %v1633_v6 = vsel %vm740_vm0, %v4023_v24, 0  ;;  %v1240_v7 = vsel %vm4244_vm7, %v3156_v35, %v1239_v0  ;;  %v1247_v39 = vsel %vm4244_vm7, %v3157_v40, %v1246_v23 }
  0x60   : > { %v1260_v29 = vrot.slane %v4156_v55, 5  ;;  %v1243_v43 = vsel %vm4244_vm7, %v1241_v2, %v1242_v53  ;;  %v1250_v24 = vsel %vm4244_vm7, %v1248_v56, %v1249_v33  ;;  %v3158_v54 = vrot.slane %v4105_v44, 9 }
  0x61   : > { %3541 = vmatmul.mubr.msk.bf16.vlgmr.msra.gmra.mxu0 %vm691_vm3, %v4290_v47  ;;  %v1256_v38 = vrot.slane %v4122_v14, 5  ;;  %v1255_v21 = vrot.slane %v1253_v1, 4  ;;  %v3159_v8 = vrot.slane %v4145_v20, 9  ;;  %v1263_v42 = vrot.slane %v4164_v36, 5 }
  0x62   : > { %3607 = vmatpush3.bf16.msra.mxu0 %v1861_v30  ;;  %3544 = vmatprep.mubr.msk.bf16.mxu0 %vm691_vm3, %v4313_v37  ;;  %v1262_v31 = vrot.slane %v1260_v29, 4  ;;  %v4353_v14 = vcombine.low %v1240_v7, %v1243_v43  ;;  %v4355_v10 = vcombine.low %v1247_v39, %v1250_v24  ;;  %v1254_v36 = vsel %vm4244_vm7, %v3158_v54, %v1253_v1 }
  0x63   : > { %3785 = vmatprep.subr.msk.bf16.mxu0 %vm740_vm0, %v4328_v46  ;;  %v1257_v28 = vsel %vm4244_vm7, %v1255_v21, %v1256_v38  ;;  %v1261_v0 = vsel %vm4244_vm7, %v3159_v8, %v1260_v29  ;;  %v1267_v40 = vrot.slane %v4200_v62, 5  ;;  %v1277_v23 = vrot.slane %v3906_v17, 5  ;;  %v5506_v8 = vld [vmem:[#allocation16_spill] sm:$0xff] }
  0x64   : > { %3507 = vmatmul.mubr.msk.bf16.vlgmr.msra.gmra.mxu1 %vm691_vm3, %v4256_v45  ;;  %v1264_v35 = vsel %vm4244_vm7, %v1262_v31, %v1263_v42  ;;  %v3160_v27 = vrot.slane %v4193_v51, 9  ;;  %v3161_v50 = vrot.slane %v3898_v13, 9  ;;  %v1274_v2 = vrot.slane %v3903_v16, 5  ;;  %v5507_v42 = vld [vmem:[#allocation20_spill] sm:$0xff] }
  0x65   : > { %3573 = vmatpush3.bf16.msra.mxu1 %v1633_v6  ;;  %3510 = vmatprep.mubr.msk.bf16.mxu1 %vm691_vm3, %v4283_v63  ;;  %v4374_v53 = vcombine.low %v4007_v3, %v4015_v18  ;;  %v4378_v33 = vcombine.low %v4062_v9, %v4067_v22  ;;  %v4382_v56 = vcombine.low %v4105_v44, %v4110_v4  ;;  %v1270_v3 = vrot.slane %v4205_v48, 5 }
  0x66   : > { %3784 = vmatprep.subr.msk.bf16.mxu1 %vm740_vm0, %v4345_v19  ;;  %v4386_v17 = vcombine.low %v4145_v20, %v4156_v55  ;;  %v4390_v30 = vcombine.low %v1254_v36, %v1257_v28  ;;  %v4392_v1 = vcombine.low %v1261_v0, %v1264_v35  ;;  %v4397_v18 = vcombine.low %v4036_v41, %v4043_v49  ;;  %v5508_v36 = vld [vmem:[#allocation18_spill] sm:$0xff] }
  0x67   : > { %v1269_v9 = vrot.slane %v1267_v40, 4  ;;  %v3164_v22 = vrot.slane %v4036_v41, 9  ;;  %v1295_v44 = vrot.slane %v4043_v49, 5  ;;  %v1298_v4 = vrot.slane %v4053_v57, 5 }
  0x68   : > { %v1268_v20 = vsel %vm4244_vm7, %v3160_v27, %v1267_v40  ;;  %v1275_v48 = vsel %vm4244_vm7, %v3161_v50, %v1274_v2  ;;  %v1276_v55 = vrot.slane %v1274_v2, 4  ;;  %v4410_v6 = vcombine.low %v4083_v52, %v4088_v61  ;;  %v5509_v40 = vld [vmem:[#allocation21_spill] sm:$0xff] }
  0x69   : > { %3545 = vmatmul.mubr.msk.bf16.gmra.mxu0 %vm691_vm3, %v4353_v14  ;;  %v1296_v41 = vsel %vm4244_vm7, %v3164_v22, %v1295_v44  ;;  %v1297_v49 = vrot.slane %v1295_v44, 4  ;;  %v3165_v57 = vrot.slane %v4083_v52, 9  ;;  %v1302_v7 = vrot.slane %v4088_v61, 5 }
  0x6a   : > { %3548 = vmatprep.mubr.msk.bf16.mxu0 %vm691_vm3, %v4355_v10  ;;  %v1281_v39 = vrot.slane %v3943_v59, 5  ;;  %v1305_v29 = vrot.slane %v4100_v34, 5  ;;  %v4424_v43 = vcombine.low %v4127_v26, %v4134_v25  ;;  %v3166_v24 = vrot.slane %v4127_v26, 9 }
  0x6b   : > { %v1271_v54 = vsel %vm4244_vm7, %v1269_v9, %v1270_v3  ;;  %v1299_v52 = vsel %vm4244_vm7, %v1297_v49, %v1298_v4  ;;  %v1303_v61 = vsel %vm4244_vm7, %v3165_v57, %v1302_v7  ;;  %v1304_v38 = vrot.slane %v1302_v7, 4  ;;  %v5510_v3 = vld [vmem:[#allocation23_spill] sm:$0xff]  ;;  %v5511_v57 = vld [vmem:[#allocation8_spill] sm:$0xff] }
  0x6c   : > { %3511 = vmatmul.mubr.msk.bf16.gmra.mxu1 %vm691_vm3, %v4374_v53  ;;  %v4433_v21 = vcombine.low %v1296_v41, %v1299_v52  ;;  %v1309_v34 = vrot.slane %v4134_v25, 5  ;;  %v1312_v31 = vrot.slane %v5506_v8, 5  ;;  %v4439_v28 = vcombine.low %v5508_v36, %v5507_v42 }
  0x6d   : > { %3514 = vmatprep.mubr.msk.bf16.mxu1 %vm691_vm3, %v4378_v33  ;;  %v1306_v26 = vsel %vm4244_vm7, %v1304_v38, %v1305_v29  ;;  %v3167_v0 = vrot.slane %v5508_v36, 9  ;;  %v1316_v35 = vrot.slane %v5507_v42, 5  ;;  %v1319_v27 = vrot.slane %v5509_v40, 5  ;;  %v5513_v42 = vld [vmem:[#allocation4_spill] sm:$0xff] }
  0x6e   : > { %v4448_v50 = vcombine.low %v1303_v61, %v1306_v26  ;;  %v1310_v25 = vsel %vm4244_vm7, %v3166_v24, %v1309_v34  ;;  %v1311_v2 = vrot.slane %v1309_v34, 4  ;;  %v4454_v9 = vcombine.low %v5510_v3, %v4222_v11 }
  0x6f   : > { %v1317_v22 = vsel %vm4244_vm7, %v3167_v0, %v1316_v35  ;;  %v1318_v44 = vrot.slane %v1316_v35, 4  ;;  %v3168_v4 = vrot.slane %v5510_v3, 9  ;;  %v1323_v41 = vrot.slane %v4222_v11, 5  ;;  %v5514_v0 = vld [vmem:[#allocation6_spill] sm:$0xff] }
  0x70   : > { %v1278_v49 = vsel %vm4244_vm7, %v1276_v55, %v1277_v23  ;;  %v1288_v7 = vrot.slane %v5511_v57, 5  ;;  %v1313_v29 = vsel %vm4244_vm7, %v1311_v2, %v1312_v31  ;;  %v1326_v24 = vrot.slane %v4233_v58, 5  ;;  %v5512_v55 = vld [vmem:[#allocation3_spill] sm:$0xff] }
  0x71   : > { %3549 = vmatmul.mubr.msk.bf16.gmra.mxu0 %vm691_vm3, %v4390_v30  ;;  %v4470_v52 = vcombine.low %v1310_v25, %v1313_v29  ;;  %v1320_v61 = vsel %vm4244_vm7, %v1318_v44, %v1319_v27  ;;  %v1324_v11 = vsel %vm4244_vm7, %v3168_v4, %v1323_v41  ;;  %v1325_v38 = vrot.slane %v1323_v41, 4  ;;  %v5515_v27 = vld [vmem:[#allocation9_spill] sm:$0xff]  ;;  %v4557_v4 = vld [vmem:[%s3876_s26 + $0xc0] sm:$0xf]  ;;  %v249_v41 = vld [vmem:[%s3876_s26 + $0xc8] sm:$0x1] }
  0x72   : > { %3552 = vmatprep.mubr.msk.bf16.mxu0 %vm691_vm3, %v4392_v1  ;;  %v4478_v23 = vcombine.low %v1268_v20, %v1271_v54  ;;  %v3162_v34 = vrot.slane %v5512_v55, 9  ;;  %v4481_v58 = vcombine.low %v1317_v22, %v1320_v61  ;;  %v4483_v8 = vcombine.low %v1275_v48, %v1278_v49  ;;  %v5516_v61 = vld [vmem:[#allocation7_spill] sm:$0xff] }
  0x73   : > { %v1283_v31 = vrot.slane %v1281_v39, 4  ;;  %v1284_v36 = vrot.slane %v5513_v42, 5  ;;  %v1327_v26 = vsel %vm4244_vm7, %v1325_v38, %v1326_v24  ;;  %v3163_v35 = vrot.slane %v5514_v0, 9  ;;  %v5518_v42 = vld [vmem:[#allocation13_spill] sm:$0xff] }
  0x74   : > { %3515 = vmatmul.mubr.msk.bf16.gmra.mxu1 %vm691_vm3, %v4382_v56  ;;  %v1290_v40 = vrot.slane %v1288_v7, 4  ;;  %v1291_v25 = vrot.slane %v5515_v27, 5  ;;  %v4490_v2 = vcombine.low %v1324_v11, %v1327_v26  ;;  %v4494_v20 = vcombine.low %v4193_v51, %v4200_v62  ;;  %v5522_v26 = vld [vmem:[#allocation5_spill] sm:$0xff] }
  0x75   : > { %3518 = vmatprep.mubr.msk.bf16.mxu1 %vm691_vm3, %v4386_v17  ;;  %v4500_v48 = vcombine.low %v3898_v13, %v3903_v16  ;;  %v1282_v54 = vsel %vm4244_vm7, %v3162_v34, %v1281_v39  ;;  %v1285_v3 = vsel %vm4244_vm7, %v1283_v31, %v1284_v36  ;;  %v1289_v51 = vsel %vm4244_vm7, %v3163_v35, %v1288_v7  ;;  %v5517_v34 = vld [vmem:[#allocation11_spill] sm:$0xff]  ;;  %v5521_v36 = vld [vmem:[#allocation24_spill] sm:$0xff] }
  0x76   : > { %v1292_v62 = vsel %vm4244_vm7, %v1290_v40, %v1291_v25  ;;  %v4516_v13 = vcombine.low %v1282_v54, %v1285_v3  ;;  %v4522_v39 = vcombine.low %v5512_v55, %v3943_v59  ;;  %v4528_v22 = vcombine.low %v5514_v0, %v5511_v57  ;;  %v4551_v59 = vld [vmem:[%s3876_s26 + $0xc4] sm:$0xf]  ;;  %v3294_v55 = vld [vmem:[%s5426_s1 + $0x10] sm:$0x3] }
  0x77   : > { %v4518_v16 = vcombine.low %v1289_v51, %v1292_v62  ;;  %v2059_v44 = vrot.slane %v4551_v59, 5  ;;  %v3238_v49 = vrot.slane %v4557_v4, 9  ;;  %v2062_v7 = vrot.slane %v249_v41, 5  ;;  %v5523_v0 = vld [vmem:[#allocation10_spill] sm:$0xff]  ;;  %v5524_v35 = vld [vmem:[#allocation12_spill] sm:$0xff] }
  0x78   : > { %v2279_v38 = vsel %vm740_vm0, %v4328_v46, 0  ;;  %v2073_v31 = vsel %vm740_vm0, %v4345_v19, 0  ;;  %v5519_v46 = vld [vmem:[#allocation15_spill] sm:$0xff]  ;;  %v5525_v40 = vld [vmem:[#allocation14_spill] sm:$0xff]  ;;  %v1829_v27 = vshrl.u32 %v4557_v4, 16  ;;  %v1832_v25 = vshll.u32 %v4557_v4, 16 }
  0x79   : > { %3553 = vmatmul.mubr.msk.bf16.gmra.mxu0 %vm691_vm3, %v4478_v23  ;;  %v2061_v57 = vrot.slane %v2059_v44, 4  ;;  %v2060_v29 = vsel %vm4244_vm7, %v3238_v49, %v2059_v44  ;;  %v5520_v19 = vld [vmem:[#allocation19_spill] sm:$0xff]  ;;  %v1842_v54 = vshrl.u32 %v4551_v59, 16  ;;  %v1838_v3 = vshll.u32 %v4551_v59, 16 }
  0x7a   : > { %3556 = vmatprep.mubr.msk.bf16.mxu0 %vm691_vm3, %v4483_v8  ;;  %v1831_v51 = vrot.slane %v1829_v27, 4  ;;  %v1834_v62 = vrot.slane %v1832_v25, 5 }
  0x7b   : > { %v2063_v24 = vsel %vm4244_vm7, %v2061_v57, %v2062_v7  ;;  %v1840_v44 = vrot.slane %v1838_v3, 5  ;;  %v1844_v49 = vrot.slane %v1842_v54, 4  ;;  %v5526_v57 = vld [vmem:[#allocation17_spill] sm:$0xff]  ;;  %v5527_v7 = vld [vmem:[#allocation22_spill] sm:$0xff]  ;;  %v3203_v3 = vcombine.low %v4557_v4, %v4551_v59 }
  0x7c   : > { %3519 = vmatmul.mubr.msk.bf16.gmra.mxu1 %vm691_vm3, %v4494_v20  ;;  %v4569_v11 = vcombine.low %v2060_v29, %v2063_v24  ;;  %v1835_v29 = vor.u32 %v1834_v62, %v1831_v51  ;;  %v2719_v51 = vsel %vm740_vm0, %v3294_v55, 0 }
  0x7d   : > { %3522 = vmatprep.mubr.msk.bf16.mxu1 %vm691_vm3, %v4500_v48  ;;  %v1845_v24 = vor.u32 %v1844_v49, %v1840_v44 }
  0x81   : > { %3557 = vmatmul.mubr.msk.bf16.gmra.mxu0 %vm691_vm3, %v4516_v13 }
  0x82   : > { %3560 = vmatprep.mubr.msk.bf16.mxu0 %vm691_vm3, %v4518_v16 }
  0x84   : > { %3523 = vmatmul.mubr.msk.bf16.gmra.mxu1 %vm691_vm3, %v4522_v39 }
  0x85   : > { %3526 = vmatprep.mubr.msk.bf16.mxu1 %vm691_vm3, %v4528_v22 }
  0x89   : > { %3561 = vmatmul.mubr.msk.bf16.gmra.mxu0 %vm691_vm3, %v4433_v21 }
  0x8a   : > { %3564 = vmatprep.mubr.msk.bf16.mxu0 %vm691_vm3, %v4448_v50 }
  0x8c   : > { %3527 = vmatmul.mubr.msk.bf16.gmra.mxu1 %vm691_vm3, %v4397_v18 }
  0x8d   : > { %3530 = vmatprep.mubr.msk.bf16.mxu1 %vm691_vm3, %v4410_v6 }
  0x91   : > { %3565 = vmatmul.mubr.msk.bf16.gmra.mxu0 %vm691_vm3, %v4470_v52 }
  0x92   : > { %3568 = vmatprep.mubr.msk.bf16.mxu0 %vm691_vm3, %v4481_v58 }
  0x94   : > { %3531 = vmatmul.mubr.msk.bf16.gmra.mxu1 %vm691_vm3, %v4424_v43 }
  0x95   : > { %3534 = vmatprep.mubr.msk.bf16.mxu1 %vm691_vm3, %v4439_v28 }
  0x99   : > { %3569 = vmatmul.mubr.msk.bf16.gmra.mxu0 %vm691_vm3, %v4490_v2 }
  0x9a   : > { %3608 = vmatprep.mubr.msk.bf16.mxu0 %vm691_vm3, %v5516_v61  ;;  %v1848_v61 = vshll.u32 %v249_v41, 16 }
  0x9c   : > { %3535 = vmatmul.mubr.msk.bf16.gmra.mxu1 %vm691_vm3, %v4454_v9  ;;  %v1850_v27 = vrot.slane %v1848_v61, 5  ;;  %v4761_v61 = vld [vmem:[%s3876_s26 + $0xd0] sm:$0xf] }
  0x9d   : > { %3574 = vmatprep.mubr.msk.bf16.mxu1 %vm691_vm3, %v4256_v45  ;;  %v3275_v45 = vld [vmem:[%s5426_s1 + $0xe] sm:$0x3] }
  0x9e   : > { %v2507_v62 = vsel %vm740_vm0, %v3275_v45, 0 }
  0xa1   : > { %3609 = vmatmul.mubr.msk.bf16.vlgmr.msra.gmra.mxu0 %vm691_vm3, %v5517_v34 }
  0xa2   : > { %3675 = vmatpush3.bf16.msra.mxu0 %v2279_v38  ;;  %3612 = vmatprep.mubr.msk.bf16.mxu0 %vm691_vm3, %v5518_v42  ;;  %v1836_v38 = vrot.slane %v1835_v29, 4 }
  0xa3   : > { %3787 = vmatprep.subr.msk.bf16.mxu0 %vm740_vm0, %v3294_v55 }
  0xa4   : > { %3575 = vmatmul.mubr.msk.bf16.vlgmr.msra.gmra.mxu1 %vm691_vm3, %v4283_v63  ;;  %v1841_v25 = vsel %vm3921_vm4, %v1836_v38, %v1840_v44 }
  0xa5   : > { %3641 = vmatpush3.bf16.msra.mxu1 %v2073_v31  ;;  %3578 = vmatprep.mubr.msk.bf16.mxu1 %vm691_vm3, %v4374_v53  ;;  %v1846_v31 = vrot.slane %v1845_v24, 4 }
  0xa6   : > { %3786 = vmatprep.subr.msk.bf16.mxu1 %vm740_vm0, %v3275_v45 }
  0xa7   : > { %v1851_v41 = vsel %vm3921_vm4, %v1846_v31, %v1850_v27 }
  0xa8   : > { %v4651_v54 = vcombine.low %v1841_v25, %v1851_v41 }
  0xa9   : > { %3613 = vmatmul.mubr.msk.bf16.gmra.mxu0 %vm691_vm3, %v5519_v46 }
  0xaa   : > { %3616 = vmatprep.mubr.msk.bf16.mxu0 %vm691_vm3, %v5520_v19  ;;  %5528 = vst [vmem:[#allocation16_spill] sm:$0xff] %v4651_v54 }
  0xac   : > { %3579 = vmatmul.mubr.msk.bf16.gmra.mxu1 %vm691_vm3, %v4378_v33 }
  0xad   : > { %3582 = vmatprep.mubr.msk.bf16.mxu1 %vm691_vm3, %v4382_v56 }
  0xb1   : > { %3617 = vmatmul.mubr.msk.bf16.gmra.mxu0 %vm691_vm3, %v5521_v36 }
  0xb2   : > { %3620 = vmatprep.mubr.msk.bf16.mxu0 %vm691_vm3, %v4265_v15 }
  0xb4   : > { %3583 = vmatmul.mubr.msk.bf16.gmra.mxu1 %vm691_vm3, %v4386_v17 }
  0xb5   : > { %3586 = vmatprep.mubr.msk.bf16.mxu1 %vm691_vm3, %v4494_v20 }
  0xb9   : > { %3621 = vmatmul.mubr.msk.bf16.gmra.mxu0 %vm691_vm3, %v5522_v26 }
  0xba   : > { %3624 = vmatprep.mubr.msk.bf16.mxu0 %vm691_vm3, %v5523_v0 }
  0xbc   : > { %3587 = vmatmul.mubr.msk.bf16.gmra.mxu1 %vm691_vm3, %v4500_v48 }
  0xbd   : > { %3590 = vmatprep.mubr.msk.bf16.mxu1 %vm691_vm3, %v4522_v39 }
  0xc1   : > { %3625 = vmatmul.mubr.msk.bf16.gmra.mxu0 %vm691_vm3, %v5524_v35 }
  0xc2   : > { %3628 = vmatprep.mubr.msk.bf16.mxu0 %vm691_vm3, %v5525_v40 }
  0xc4   : > { %3591 = vmatmul.mubr.msk.bf16.gmra.mxu1 %vm691_vm3, %v4528_v22 }
  0xc5   : > { %3594 = vmatprep.mubr.msk.bf16.mxu1 %vm691_vm3, %v4397_v18 }
  0xc9   : > { %3629 = vmatmul.mubr.msk.bf16.gmra.mxu0 %vm691_vm3, %v5526_v57 }
  0xca   : > { %3632 = vmatprep.mubr.msk.bf16.mxu0 %vm691_vm3, %v5527_v7 }
  0xcc   : > { %3595 = vmatmul.mubr.msk.bf16.gmra.mxu1 %vm691_vm3, %v4410_v6 }
  0xcd   : > { %3598 = vmatprep.mubr.msk.bf16.mxu1 %vm691_vm3, %v4424_v43 }
  0xd1   : > { %3633 = vmatmul.mubr.msk.bf16.gmra.mxu0 %vm691_vm3, %v4239_v5 }
  0xd2   : > { %3636 = vmatprep.mubr.msk.bf16.mxu0 %vm691_vm3, %v4293_v12 }
  0xd4   : > { %3599 = vmatmul.mubr.msk.bf16.gmra.mxu1 %vm691_vm3, %v4439_v28 }
  0xd5   : > { %3602 = vmatprep.mubr.msk.bf16.mxu1 %vm691_vm3, %v4454_v9 }
  0xd9   : > { %3637 = vmatmul.mubr.msk.bf16.gmra.mxu0 %vm691_vm3, %v4651_v54 }
  0xda   : > { %3676 = vmatprep.mubr.msk.bf16.mxu0 %vm691_vm3, %v4283_v63 }
  0xdc   : > { %3603 = vmatmul.mubr.msk.bf16.gmra.mxu1 %vm691_vm3, %v3203_v3 }
  0xdd   : > { %3642 = vmatprep.mubr.msk.bf16.mxu1 %vm691_vm3, %v4290_v47 }
  0xe1   : > { %3677 = vmatmul.mubr.msk.bf16.vlgmr.msra.gmra.mxu0 %vm691_vm3, %v4374_v53 }
  0xe2   : > { %3743 = vmatpush3.bf16.msra.mxu0 %v2719_v51  ;;  %3680 = vmatprep.mubr.msk.bf16.mxu0 %vm691_vm3, %v4378_v33 }
  0xe4   : > { %3643 = vmatmul.mubr.msk.bf16.vlgmr.msra.gmra.mxu1 %vm691_vm3, %v4313_v37 }
  0xe5   : > { %3709 = vmatpush3.bf16.msra.mxu1 %v2507_v62  ;;  %3646 = vmatprep.mubr.msk.bf16.mxu1 %vm691_vm3, %v4353_v14  ;;  %v4674_v63 = vpop.f32.mrf.mxu0 }
  0xe7   : > { %v4684_v53 = vpop.f32.mrf.mxu0 }
  0xe9   : > { %3681 = vmatmul.mubr.msk.bf16.gmra.mxu0 %vm691_vm3, %v4382_v56  ;;  %v4690_v56 = vpop.f32.mrf.mxu0 }
  0xea   : > { %3684 = vmatprep.mubr.msk.bf16.mxu0 %vm691_vm3, %v4386_v17  ;;  %v4680_v47 = vpop.f32.mrf.mxu1 }
  0xeb   : > { %v4700_v59 = vpop.f32.mrf.mxu0 }
  0xec   : > { %3647 = vmatmul.mubr.msk.bf16.gmra.mxu1 %vm691_vm3, %v4355_v10  ;;  %v4686_v33 = vpop.f32.mrf.mxu1 }
  0xed   : > { %3650 = vmatprep.mubr.msk.bf16.mxu1 %vm691_vm3, %v4390_v30 }
  0xee   : > { %v4696_v17 = vpop.f32.mrf.mxu1 }
  0xf0   : > { %v4702_v4 = vpop.f32.mrf.mxu1 }
  0xf1   : > { %3685 = vmatmul.mubr.msk.bf16.gmra.mxu0 %vm691_vm3, %v4494_v20 }
  0xf2   : > { %3688 = vmatprep.mubr.msk.bf16.mxu0 %vm691_vm3, %v4500_v48 }
  0xf4   : > { %3651 = vmatmul.mubr.msk.bf16.gmra.mxu1 %vm691_vm3, %v4392_v1 }
  0xf5   : > { %3654 = vmatprep.mubr.msk.bf16.mxu1 %vm691_vm3, %v4478_v23 }
  0xf6   : > { %v4706_v20 = vpop.f32.mrf.mxu0 }
  0xf8   : > { %v4716_v55 = vpop.f32.mrf.mxu0 }
  0xf9   : > { %3689 = vmatmul.mubr.msk.bf16.gmra.mxu0 %vm691_vm3, %v4522_v39 }
  0xfa   : > { %3692 = vmatprep.mubr.msk.bf16.mxu0 %vm691_vm3, %v4528_v22  ;;  %v4712_v48 = vpop.f32.mrf.mxu1  ;;  %v4722_v39 = vpop.f32.mrf.mxu0 }
  0xfc   : > { %3655 = vmatmul.mubr.msk.bf16.gmra.mxu1 %vm691_vm3, %v4483_v8  ;;  %v4718_v45 = vpop.f32.mrf.mxu1  ;;  %v4732_v44 = vpop.f32.mrf.mxu0 }
  0xfd   : > { %3658 = vmatprep.mubr.msk.bf16.mxu1 %vm691_vm3, %v4516_v13 }
  0xfe   : > { %v4728_v22 = vpop.f32.mrf.mxu1 }
 0x100   : > { %v4734_v49 = vpop.f32.mrf.mxu1 }
 0x101   : > { %3693 = vmatmul.mubr.msk.bf16.gmra.mxu0 %vm691_vm3, %v4397_v18 }
 0x102   : > { %3696 = vmatprep.mubr.msk.bf16.mxu0 %vm691_vm3, %v4410_v6 }
 0x104   : > { %3659 = vmatmul.mubr.msk.bf16.gmra.mxu1 %vm691_vm3, %v4518_v16 }
 0x105   : > { %3662 = vmatprep.mubr.msk.bf16.mxu1 %vm691_vm3, %v4433_v21 }
 0x107   : > { %v4738_v18 = vpop.f32.mrf.mxu0 }
 0x109   : > { %3697 = vmatmul.mubr.msk.bf16.gmra.mxu0 %vm691_vm3, %v4424_v43  ;;  %v4748_v29 = vpop.f32.mrf.mxu0 }
 0x10a   : > { %3700 = vmatprep.mubr.msk.bf16.mxu0 %vm691_vm3, %v4439_v28  ;;  %v4758_v28 = vld [vmem:[%s3876_s26 + $0xcc] sm:$0xf] }
 0x10b   : > { %v4754_v43 = vpop.f32.mrf.mxu0 }
 0x10c   : > { %3663 = vmatmul.mubr.msk.bf16.gmra.mxu1 %vm691_vm3, %v4448_v50  ;;  %v4744_v6 = vpop.f32.mrf.mxu1 }
 0x10d   : > { %5529 = vst [vmem:[#allocation20_spill] sm:$0xff] %v4744_v6  ;;  %3666 = vmatprep.mubr.msk.bf16.mxu1 %vm691_vm3, %v4470_v52  ;;  %v4767_v31 = vpop.f32.mrf.mxu0 }
 0x10e   : > { %v4750_v24 = vpop.f32.mrf.mxu1 }
 0x10f   : > { %5530 = vst [vmem:[#allocation18_spill] sm:$0xff] %v4750_v24 }
 0x110   : > { %v4765_v38 = vpop.f32.mrf.mxu1 }
 0x111   : > { %3701 = vmatmul.mubr.msk.bf16.gmra.mxu0 %vm691_vm3, %v4454_v9  ;;  %5531 = vst [vmem:[#allocation21_spill] sm:$0xff] %v4765_v38  ;;  %v3258_v9 = vcombine.low %v4758_v28, %v4761_v61 }
 0x112   : > { %3704 = vmatprep.mubr.msk.bf16.mxu0 %vm691_vm3, %v3203_v3  ;;  %v4773_v27 = vpop.f32.mrf.mxu1 }
 0x113   : > { %5532 = vst [vmem:[#allocation23_spill] sm:$0xff] %v4773_v27 }
 0x114   : > { %3667 = vmatmul.mubr.msk.bf16.gmra.mxu1 %vm691_vm3, %v4481_v58 }
 0x115   : > { %3670 = vmatprep.mubr.msk.bf16.mxu1 %vm691_vm3, %v4490_v2 }
 0x119   : > { %v4775_v25 = vpop.f32.mrf.mxu0  ;;  %3705 = vmatmul.mubr.msk.bf16.gmra.mxu0 %vm691_vm3, %v3258_v9 }
 0x11a   : > { %3744 = vmatprep.mubr.msk.bf16.mxu0 %vm691_vm3, %v4313_v37 }
 0x11b   : > { %v4780_v41 = vpop.f32.mrf.mxu0 }
 0x11c   : > { %v4782_v3 = vpop.f32.mrf.mxu1  ;;  %3671 = vmatmul.mubr.msk.bf16.gmra.mxu1 %vm691_vm3, %v4569_v11 }
 0x11d   : > { %5533 = vst [vmem:[#allocation8_spill] sm:$0xff] %v4782_v3  ;;  %v4786_v51 = vpop.f32.mrf.mxu0  ;;  %3710 = vmatprep.mubr.msk.bf16.mxu1 %vm691_vm3, %v5517_v34 }
 0x11e   : > { %v4790_v62 = vpop.f32.mrf.mxu1 }
 0x11f   : > { %5534 = vst [vmem:[#allocation3_spill] sm:$0xff] %v4790_v62  ;;  %v4792_v27 = vpop.f32.mrf.mxu0 }
 0x120   : > { %v4794_v9 = vpop.f32.mrf.mxu1 }
 0x121   : > { %5535 = vst [vmem:[#allocation4_spill] sm:$0xff] %v4794_v9  ;;  %v3542_v38 = vpop.f32.mrf.mxu0  ;;  %3745 = vmatmul.mubr.msk.bf16.vlgmr.msra.gmra.mxu0 %vm691_vm3, %v4353_v14 }
 0x122   : > { %v4798_v37 = vpop.f32.mrf.mxu1  ;;  %3748 = vmatprep.mubr.msk.bf16.mxu0 %vm691_vm3, %v4355_v10 }
 0x123   : > { %5536 = vst [vmem:[#allocation6_spill] sm:$0xff] %v4798_v37  ;;  %v1463_v3 = vpop.f32.mrf.mxu0 }
 0x124   : > { %v3508_v24 = vpop.f32.mrf.mxu1  ;;  %3711 = vmatmul.mubr.msk.bf16.vlgmr.msra.gmra.mxu1 %vm691_vm3, %v5518_v42 }
 0x125   : > { %v1079_v34 = vadd.f32 %v3508_v24, %v4674_v63  ;;  %v3543_v62 = vpop.f32.mrf.mxu0  ;;  %3714 = vmatprep.mubr.msk.bf16.mxu1 %vm691_vm3, %v5519_v46 }
 0x126   : > { %v1070_v9 = vpop.f32.mrf.mxu1 }
 0x127   : > { %v4807_v54 = vadd.f32 %v3542_v38, %v1079_v34  ;;  %v1071_v14 = vadd.f32 %v1070_v9, %v4684_v53  ;;  %v1466_v37 = vpop.f32.mrf.mxu0 }
 0x128   : > { %v3509_v6 = vpop.f32.mrf.mxu1 }
 0x129   : > { %v4810_v32 = vadd.f32 %v1463_v3, %v1071_v14  ;;  %v1082_v10 = vadd.f32 %v3509_v6, %v4690_v56  ;;  %v3546_v12 = vpop.f32.mrf.mxu0  ;;  %3749 = vmatmul.mubr.msk.bf16.gmra.mxu0 %vm691_vm3, %v4390_v30 }
 0x12a   : > { %v1073_v42 = vpop.f32.mrf.mxu1  ;;  %3752 = vmatprep.mubr.msk.bf16.mxu0 %vm691_vm3, %v4392_v1 }
 0x12b   : > { %v4817_v46 = vadd.f32 %v3543_v62, %v1082_v10  ;;  %v1074_v63 = vadd.f32 %v1073_v42, %v4700_v59  ;;  %v1479_v24 = vpop.f32.mrf.mxu0 }
 0x12c   : > { %v3512_v53 = vpop.f32.mrf.mxu1  ;;  %3715 = vmatmul.mubr.msk.bf16.gmra.mxu1 %vm691_vm3, %v5520_v19 }
 0x12d   : > { %v4822_v38 = vadd.f32 %v1466_v37, %v1074_v63  ;;  %v1095_v56 = vadd.f32 %v3512_v53, %v4706_v20  ;;  %v3547_v6 = vpop.f32.mrf.mxu0  ;;  %3718 = vmatprep.mubr.msk.bf16.mxu1 %vm691_vm3, %v5521_v36 }
 0x12e   : > { %v1086_v30 = vpop.f32.mrf.mxu1 }
 0x12f   : > { %v4827_v3 = vadd.f32 %v3546_v12, %v1095_v56  ;;  %v1087_v1 = vadd.f32 %v1086_v30, %v4716_v55  ;;  %v1482_v62 = vpop.f32.mrf.mxu0 }
 0x130   : > { %v3513_v59 = vpop.f32.mrf.mxu1 }
 0x131   : > { %v4830_v9 = vadd.f32 %v1479_v24, %v1087_v1  ;;  %v1098_v34 = vadd.f32 %v3513_v59, %v4722_v39  ;;  %v3550_v19 = vpop.f32.mrf.mxu0  ;;  %3753 = vmatmul.mubr.msk.bf16.gmra.mxu0 %vm691_vm3, %v4478_v23 }
 0x132   : > { %v1089_v20 = vpop.f32.mrf.mxu1  ;;  %3756 = vmatprep.mubr.msk.bf16.mxu0 %vm691_vm3, %v4483_v8 }
 0x133   : > { %v4837_v36 = vadd.f32 %v3547_v6, %v1098_v34  ;;  %v1090_v12 = vadd.f32 %v1089_v20, %v4732_v44  ;;  %v1495_v37 = vpop.f32.mrf.mxu0 }
 0x134   : > { %v3516_v55 = vpop.f32.mrf.mxu1  ;;  %3719 = vmatmul.mubr.msk.bf16.gmra.mxu1 %vm691_vm3, %v4265_v15 }
 0x135   : > { %v4842_v14 = vadd.f32 %v1482_v62, %v1090_v12  ;;  %v1111_v39 = vadd.f32 %v3516_v55, %v4738_v18  ;;  %v3551_v10 = vpop.f32.mrf.mxu0  ;;  %3722 = vmatprep.mubr.msk.bf16.mxu1 %vm691_vm3, %v5522_v26 }
 0x136   : > { %v1102_v23 = vpop.f32.mrf.mxu1 }
 0x137   : > { %v4847_v42 = vadd.f32 %v3550_v19, %v1111_v39  ;;  %v1103_v8 = vadd.f32 %v1102_v23, %v4748_v29  ;;  %v1498_v63 = vpop.f32.mrf.mxu0 }
 0x138   : > { %v3517_v44 = vpop.f32.mrf.mxu1 }
 0x139   : > { %v4850_v24 = vadd.f32 %v1495_v37, %v1103_v8  ;;  %v1114_v53 = vadd.f32 %v3517_v44, %v4754_v43  ;;  %v3554_v15 = vpop.f32.mrf.mxu0  ;;  %3757 = vmatmul.mubr.msk.bf16.gmra.mxu0 %vm691_vm3, %v4516_v13  ;;  %v2478_v37 = vshll.u32 %v4758_v28, 16 }
 0x13a   : > { %v1105_v18 = vpop.f32.mrf.mxu1  ;;  %3760 = vmatprep.mubr.msk.bf16.mxu0 %vm691_vm3, %v4518_v16 }
 0x13b   : > { %v4857_v26 = vadd.f32 %v3551_v10, %v1114_v53  ;;  %v1106_v56 = vadd.f32 %v1105_v18, %v4767_v31  ;;  %v1511_v6 = vpop.f32.mrf.mxu0  ;;  %v2480_v44 = vrot.slane %v2478_v37, 5 }
 0x13c   : > { %v3520_v29 = vpop.f32.mrf.mxu1  ;;  %3723 = vmatmul.mubr.msk.bf16.gmra.mxu1 %vm691_vm3, %v5523_v0 }
 0x13d   : > { %v4862_v30 = vadd.f32 %v1498_v63, %v1106_v56  ;;  %v1127_v43 = vadd.f32 %v3520_v29, %v4775_v25  ;;  %v3555_v1 = vpop.f32.mrf.mxu0  ;;  %3726 = vmatprep.mubr.msk.bf16.mxu1 %vm691_vm3, %v5524_v35 }
 0x13e   : > { %v1118_v13 = vpop.f32.mrf.mxu1 }
 0x13f   : > { %v4867_v62 = vadd.f32 %v3554_v15, %v1127_v43  ;;  %v1119_v16 = vadd.f32 %v1118_v13, %v4780_v41  ;;  %v1514_v59 = vpop.f32.mrf.mxu0  ;;  %v2475_v41 = vshrl.u32 %v4758_v28, 16 }
 0x140   : > { %v3521_v31 = vpop.f32.mrf.mxu1 }
 0x141   : > { %v4870_v34 = vadd.f32 %v1511_v6, %v1119_v16  ;;  %v1130_v19 = vadd.f32 %v3521_v31, %v4786_v51  ;;  %v3558_v0 = vpop.f32.mrf.mxu0  ;;  %3761 = vmatmul.mubr.msk.bf16.gmra.mxu0 %vm691_vm3, %v4433_v21  ;;  %v2484_v51 = vshll.u32 %v4761_v61, 16  ;;  %v2488_v21 = vshrl.u32 %v4761_v61, 16 }
 0x142   : > { %v1121_v25 = vpop.f32.mrf.mxu1  ;;  %3764 = vmatprep.mubr.msk.bf16.mxu0 %vm691_vm3, %v4448_v50 }
 0x143   : > { %v4877_v35 = vadd.f32 %v3555_v1, %v1130_v19  ;;  %v1122_v20 = vadd.f32 %v1121_v25, %v4792_v27  ;;  %v1527_v12 = vpop.f32.mrf.mxu0  ;;  %v2486_v15 = vrot.slane %v2484_v51, 5  ;;  %v2490_v18 = vrot.slane %v2488_v21, 4 }
 0x144   : > { %v3524_v55 = vpop.f32.mrf.mxu1  ;;  %3727 = vmatmul.mubr.msk.bf16.gmra.mxu1 %vm691_vm3, %v5525_v40  ;;  %v2477_v40 = vrot.slane %v2475_v41, 4  ;;  %v3293_v19 = vrot.slane %v4758_v28, 9 }
 0x145   : > { %v4886_v39 = vadd.f32 %v1514_v59, %v1122_v20  ;;  %v1143_v50 = vadd.f32 %v3524_v55, %v4680_v47  ;;  %v3559_v10 = vpop.f32.mrf.mxu0  ;;  %3730 = vmatprep.mubr.msk.bf16.mxu1 %vm691_vm3, %v5526_v57  ;;  %v2705_v57 = vrot.slane %v4761_v61, 5 }
 0x146   : > { %v1134_v27 = vpop.f32.mrf.mxu1 }
 0x147   : > { %v4891_v23 = vadd.f32 %v3558_v0, %v1143_v50  ;;  %v1135_v8 = vadd.f32 %v1134_v27, %v4686_v33  ;;  %v1530_v63 = vpop.f32.mrf.mxu0  ;;  %v252_v33 = vld [vmem:[%s3876_s26 + $0xd4] sm:$0x1] }
 0x148   : > { %v3525_v53 = vpop.f32.mrf.mxu1  ;;  %v2494_v31 = vshll.u32 %v252_v33, 16  ;;  %v2708_v25 = vrot.slane %v252_v33, 5 }
 0x149   : > { %v4894_v56 = vadd.f32 %v1527_v12, %v1135_v8  ;;  %v1146_v47 = vadd.f32 %v3525_v53, %v4696_v17  ;;  %v3562_v6 = vpop.f32.mrf.mxu0  ;;  %3765 = vmatmul.mubr.msk.bf16.gmra.mxu0 %vm691_vm3, %v4470_v52  ;;  %v2481_v17 = vor.u32 %v2480_v44, %v2477_v40 }
 0x14a   : > { %v1137_v29 = vpop.f32.mrf.mxu1  ;;  %3768 = vmatprep.mubr.msk.bf16.mxu0 %vm691_vm3, %v4481_v58  ;;  %v2491_v58 = vor.u32 %v2490_v18, %v2486_v15  ;;  %v2496_v28 = vrot.slane %v2494_v31, 5 }
 0x14b   : > { %v4903_v43 = vadd.f32 %v3559_v10, %v1146_v47  ;;  %v1138_v1 = vadd.f32 %v1137_v29, %v4702_v4  ;;  %v1543_v13 = vpop.f32.mrf.mxu0  ;;  %v2707_v4 = vrot.slane %v2705_v57, 4  ;;  %v2482_v37 = vrot.slane %v2481_v17, 4  ;;  %v5540_v47 = vld [vmem:[#allocation16_spill] sm:$0xff]  ;;  %v5541_v29 = vld [vmem:[#allocation18_spill] sm:$0xff]  ;;  %v5542_v17 = vld [vmem:[#allocation21_spill] sm:$0xff] }
 0x14c   : > { %v3528_v16 = vpop.f32.mrf.mxu1  ;;  %3731 = vmatmul.mubr.msk.bf16.gmra.mxu1 %vm691_vm3, %v5527_v7 }
 0x14d   : > { %v4908_v59 = vadd.f32 %v1530_v63, %v1138_v1  ;;  %v1159_v52 = vadd.f32 %v3528_v16, %v4712_v48  ;;  %v3563_v61 = vpop.f32.mrf.mxu0  ;;  %3734 = vmatprep.mubr.msk.bf16.mxu1 %vm691_vm3, %v4239_v5  ;;  %v2492_v5 = vrot.slane %v2491_v58, 4  ;;  %v2709_v50 = vsel %vm4244_vm7, %v2707_v4, %v2708_v25  ;;  %v5537_v63 = vld [vmem:[#allocation25_spill] sm:$0xff] }
 0x14e   : > { %v1150_v0 = vpop.f32.mrf.mxu1  ;;  %v2487_v40 = vsel %vm3921_vm4, %v2482_v37, %v2486_v15 }
 0x14f   : > { %v4914_v20 = vadd.f32 %v3562_v6, %v1159_v52  ;;  %v1151_v7 = vadd.f32 %v1150_v0, %v4718_v45  ;;  %v1546_v12 = vpop.f32.mrf.mxu0  ;;  %v2706_v45 = vsel %vm4244_vm7, %v3293_v19, %v2705_v57  ;;  %v2497_v60 = vsel %vm3921_vm4, %v2492_v5, %v2496_v28  ;;  %v5543_v19 = vld [vmem:[#allocation23_spill] sm:$0xff] }
 0x150   : > { %v3529_v41 = vpop.f32.mrf.mxu1  ;;  %v3276_v15 = vcombine.low %v2487_v40, %v2497_v60  ;;  %v5545_v5 = vld [vmem:[#allocation3_spill] sm:$0xff]  ;;  %v5547_v40 = vld [vmem:[#allocation6_spill] sm:$0xff] }
 0x151   : > { %v4917_v55 = vadd.f32 %v1543_v13, %v1151_v7  ;;  %v1162_v48 = vadd.f32 %v3529_v41, %v4728_v22  ;;  %v3566_v51 = vpop.f32.mrf.mxu0  ;;  %3769 = vmatmul.mubr.msk.bf16.gmra.mxu0 %vm691_vm3, %v4490_v2 }
 0x152   : > { %v1153_v21 = vpop.f32.mrf.mxu1  ;;  %3772 = vmatprep.mubr.msk.bf16.mxu0 %vm691_vm3, %v4569_v11  ;;  %v5539_v11 = vld [vmem:[#allocation20_spill] sm:$0xff] }
 0x153   : > { %v4928_v10 = vadd.f32 %v3563_v61, %v1162_v48  ;;  %v1154_v22 = vadd.f32 %v1153_v21, %v4734_v49  ;;  %v1559_v27 = vpop.f32.mrf.mxu0  ;;  %v3295_v49 = vcombine.low %v2706_v45, %v2709_v50 }
 0x154   : > { %v3532_v8 = vpop.f32.mrf.mxu1  ;;  %3735 = vmatmul.mubr.msk.bf16.gmra.mxu1 %vm691_vm3, %v5537_v63 }
 0x155   : > { %v4935_v44 = vadd.f32 %v1546_v12, %v1154_v22  ;;  %v1175_v53 = vadd.f32 %v3532_v8, %v5539_v11  ;;  %v3567_v18 = vpop.f32.mrf.mxu0  ;;  %3738 = vmatprep.mubr.msk.bf16.mxu1 %vm691_vm3, %v5540_v47  ;;  %v5544_v12 = vld [vmem:[#allocation8_spill] sm:$0xff] }
 0x156   : > { %v1166_v6 = vpop.f32.mrf.mxu1  ;;  %v5546_v22 = vld [vmem:[#allocation4_spill] sm:$0xff] }
 0x157   : > { %v4942_v57 = vadd.f32 %v3566_v51, %v1175_v53  ;;  %v1167_v33 = vadd.f32 %v1166_v6, %v5541_v29  ;;  %v1562_v1 = vpop.f32.mrf.mxu0 }
 0x158   : > { %v3533_v13 = vpop.f32.mrf.mxu1 }
 0x159   : > { %v4945_v16 = vadd.f32 %v1559_v27, %v1167_v33  ;;  %v1178_v52 = vadd.f32 %v3533_v13, %v5542_v17  ;;  %v3570_v61 = vpop.f32.mrf.mxu0  ;;  %3773 = vmatmul.mubr.msk.bf16.gmra.mxu0 %vm691_vm3, %v3295_v49 }
 0x15a   : > { %v1169_v58 = vpop.f32.mrf.mxu1 }
 0x15b   : > { %v4949_v31 = vadd.f32 %v3567_v18, %v1178_v52  ;;  %v1170_v0 = vadd.f32 %v1169_v58, %v5543_v19  ;;  %v1575_v4 = vpop.f32.mrf.mxu0 }
 0x15c   : > { %v3536_v25 = vpop.f32.mrf.mxu1  ;;  %3739 = vmatmul.mubr.msk.bf16.gmra.mxu1 %vm691_vm3, %v3276_v15 }
 0x15d   : > { %v4953_v7 = vadd.f32 %v1562_v1, %v1170_v0  ;;  %v1191_v41 = vadd.f32 %v3536_v25, %v5544_v12  ;;  %v3571_v37 = vpop.f32.mrf.mxu0 }
 0x15e   : > { %v1182_v48 = vpop.f32.mrf.mxu1 }
 0x15f   : > { %v4956_v51 = vadd.f32 %v3570_v61, %v1191_v41  ;;  %v1183_v28 = vadd.f32 %v1182_v48, %v5545_v5  ;;  %v1578_v21 = vpop.f32.mrf.mxu0 }
 0x160   : > { %v3537_v45 = vpop.f32.mrf.mxu1 }
 0x161   : > { %v4959_v50 = vadd.f32 %v1575_v4, %v1183_v28  ;;  %v1194_v27 = vadd.f32 %v3537_v45, %v5546_v22  ;;  %v3610_v8 = vpop.f32.mrf.mxu0 }
 0x162   : > { %v1185_v63 = vpop.f32.mrf.mxu1 }
 0x163   : > { %v4962_v2 = vadd.f32 %v3571_v37, %v1194_v27  ;;  %v1186_v11 = vadd.f32 %v1185_v63, %v5547_v40  ;;  %v1897_v53 = vpop.f32.mrf.mxu0 }
 0x164   : > { %v3576_v18 = vpop.f32.mrf.mxu1 }
 0x165   : > { %v4965_v47 = vadd.f32 %v1578_v21, %v1186_v11  ;;  %v1798_v60 = vadd.f32 %v3576_v18, %v4807_v54  ;;  %v3611_v49 = vpop.f32.mrf.mxu0 }
 0x166   : > { %v1669_v6 = vpop.f32.mrf.mxu1 }
 0x167   : > { %v4968_v29 = vadd.f32 %v3610_v8, %v1798_v60  ;;  %v1796_v33 = vadd.f32 %v1669_v6, %v4810_v32  ;;  %v1900_v1 = vpop.f32.mrf.mxu0 }
 0x168   : > { %v3577_v13 = vpop.f32.mrf.mxu1 }
 0x169   : > { %v4971_v15 = vadd.f32 %v1897_v53, %v1796_v33  ;;  %v1799_v17 = vadd.f32 %v3577_v13, %v4817_v46  ;;  %v3614_v52 = vpop.f32.mrf.mxu0 }
 0x16a   : > { %v1672_v61 = vpop.f32.mrf.mxu1 }
 0x16b   : > { %v4974_v58 = vadd.f32 %v3611_v49, %v1799_v17  ;;  %v1797_v19 = vadd.f32 %v1672_v61, %v4822_v38  ;;  %v1913_v0 = vpop.f32.mrf.mxu0 }
 0x16c   : > { %v3580_v54 = vpop.f32.mrf.mxu1 }
 0x16d   : > { %v4977_v4 = vadd.f32 %v1900_v1, %v1797_v19  ;;  %v1802_v25 = vadd.f32 %v3580_v54, %v4827_v3  ;;  %v3615_v12 = vpop.f32.mrf.mxu0 }
 0x16e   : > { %v1685_v32 = vpop.f32.mrf.mxu1 }
 0x16f   : > { %v4980_v41 = vadd.f32 %v3614_v52, %v1802_v25  ;;  %v1800_v37 = vadd.f32 %v1685_v32, %v4830_v9  ;;  %v1916_v48 = vpop.f32.mrf.mxu0 }
 0x170   : > { %v3581_v46 = vpop.f32.mrf.mxu1 }
 0x171   : > { %v4983_v5 = vadd.f32 %v1913_v0, %v1800_v37  ;;  %v1803_v28 = vadd.f32 %v3581_v46, %v4837_v36  ;;  %v3618_v21 = vpop.f32.mrf.mxu0 }
 0x172   : > { %v1688_v38 = vpop.f32.mrf.mxu1 }
 0x173   : > { %v4986_v45 = vadd.f32 %v3615_v12, %v1803_v28  ;;  %v1801_v22 = vadd.f32 %v1688_v38, %v4842_v14  ;;  %v1929_v27 = vpop.f32.mrf.mxu0 }
 0x174   : > { %v3584_v3 = vpop.f32.mrf.mxu1 }
 0x175   : > { %v4989_v8 = vadd.f32 %v1916_v48, %v1801_v22  ;;  %v1806_v63 = vadd.f32 %v3584_v3, %v4847_v42  ;;  %v3619_v40 = vpop.f32.mrf.mxu0 }
 0x176   : > { %v1701_v9 = vpop.f32.mrf.mxu1 }
 0x177   : > { %v4992_v11 = vadd.f32 %v3618_v21, %v1806_v63  ;;  %v1804_v53 = vadd.f32 %v1701_v9, %v4850_v24  ;;  %v1932_v18 = vpop.f32.mrf.mxu0 }
 0x178   : > { %v3585_v36 = vpop.f32.mrf.mxu1 }
 0x179   : > { %v4995_v60 = vadd.f32 %v1929_v27, %v1804_v53  ;;  %v1807_v49 = vadd.f32 %v3585_v36, %v4857_v26  ;;  %v3622_v6 = vpop.f32.mrf.mxu0 }
 0x17a   : > { %v1704_v14 = vpop.f32.mrf.mxu1 }
 0x17b   : > { %v4998_v33 = vadd.f32 %v3619_v40, %v1807_v49  ;;  %v1805_v1 = vadd.f32 %v1704_v14, %v4862_v30  ;;  %v1945_v13 = vpop.f32.mrf.mxu0 }
 0x17c   : > { %v3588_v42 = vpop.f32.mrf.mxu1 }
 0x17d   : > { %v5001_v17 = vadd.f32 %v1932_v18, %v1805_v1  ;;  %v1810_v52 = vadd.f32 %v3588_v42, %v4867_v62  ;;  %v3623_v61 = vpop.f32.mrf.mxu0 }
 0x17e   : > { %v1717_v24 = vpop.f32.mrf.mxu1 }
 0x17f   : > { %v5004_v19 = vadd.f32 %v3622_v6, %v1810_v52  ;;  %v1808_v0 = vadd.f32 %v1717_v24, %v4870_v34  ;;  %v1948_v54 = vpop.f32.mrf.mxu0 }
 0x180   : > { %v3589_v26 = vpop.f32.mrf.mxu1 }
 0x181   : > { %v5007_v25 = vadd.f32 %v1945_v13, %v1808_v0  ;;  %v1811_v12 = vadd.f32 %v3589_v26, %v4877_v35  ;;  %v3626_v32 = vpop.f32.mrf.mxu0 }
 0x182   : > { %v1720_v30 = vpop.f32.mrf.mxu1 }
 0x183   : > { %v5010_v37 = vadd.f32 %v3623_v61, %v1811_v12  ;;  %v1809_v48 = vadd.f32 %v1720_v30, %v4886_v39  ;;  %v1961_v46 = vpop.f32.mrf.mxu0 }
 0x184   : > { %v3592_v62 = vpop.f32.mrf.mxu1 }
 0x185   : > { %v5013_v28 = vadd.f32 %v1948_v54, %v1809_v48  ;;  %v1814_v21 = vadd.f32 %v3592_v62, %v4891_v23  ;;  %v3627_v38 = vpop.f32.mrf.mxu0 }
 0x186   : > { %v1733_v34 = vpop.f32.mrf.mxu1 }
 0x187   : > { %v5016_v22 = vadd.f32 %v3626_v32, %v1814_v21  ;;  %v1812_v27 = vadd.f32 %v1733_v34, %v4894_v56  ;;  %v1964_v3 = vpop.f32.mrf.mxu0 }
 0x188   : > { %v3593_v35 = vpop.f32.mrf.mxu1 }
 0x189   : > { %v5019_v63 = vadd.f32 %v1961_v46, %v1812_v27  ;;  %v1815_v40 = vadd.f32 %v3593_v35, %v4903_v43  ;;  %v3630_v9 = vpop.f32.mrf.mxu0 }
 0x18a   : > { %v1736_v39 = vpop.f32.mrf.mxu1 }
 0x18b   : > { %v5022_v53 = vadd.f32 %v3627_v38, %v1815_v40  ;;  %v1813_v18 = vadd.f32 %v1736_v39, %v4908_v59  ;;  %v1977_v36 = vpop.f32.mrf.mxu0 }
 0x18c   : > { %v3596_v23 = vpop.f32.mrf.mxu1 }
 0x18d   : > { %5548 = vst [vmem:[#allocation9_spill] sm:$0xff] %v5022_v53  ;;  %v5025_v49 = vadd.f32 %v1964_v3, %v1813_v18  ;;  %v1818_v6 = vadd.f32 %v3596_v23, %v4914_v20  ;;  %v3631_v14 = vpop.f32.mrf.mxu0 }
 0x18e   : > { %v1749_v56 = vpop.f32.mrf.mxu1 }
 0x18f   : > { %5549 = vst [vmem:[#allocation7_spill] sm:$0xff] %v5025_v49  ;;  %v5028_v1 = vadd.f32 %v3630_v9, %v1818_v6  ;;  %v1816_v13 = vadd.f32 %v1749_v56, %v4917_v55  ;;  %v1980_v42 = vpop.f32.mrf.mxu0 }
 0x190   : > { %v3597_v43 = vpop.f32.mrf.mxu1 }
 0x191   : > { %5550 = vst [vmem:[#allocation11_spill] sm:$0xff] %v5028_v1  ;;  %v5031_v52 = vadd.f32 %v1977_v36, %v1816_v13  ;;  %v1819_v61 = vadd.f32 %v3597_v43, %v4928_v10  ;;  %v3634_v24 = vpop.f32.mrf.mxu0 }
 0x192   : > { %v1752_v59 = vpop.f32.mrf.mxu1 }
 0x193   : > { %5551 = vst [vmem:[#allocation13_spill] sm:$0xff] %v5031_v52  ;;  %v5034_v0 = vadd.f32 %v3631_v14, %v1819_v61  ;;  %v1817_v54 = vadd.f32 %v1752_v59, %v4935_v44  ;;  %v1993_v26 = vpop.f32.mrf.mxu0 }
 0x194   : > { %v3600_v20 = vpop.f32.mrf.mxu1 }
 0x195   : > { %5552 = vst [vmem:[#allocation15_spill] sm:$0xff] %v5034_v0  ;;  %v5037_v12 = vadd.f32 %v1980_v42, %v1817_v54  ;;  %v1822_v32 = vadd.f32 %v3600_v20, %v4942_v57  ;;  %v3635_v30 = vpop.f32.mrf.mxu0 }
 0x196   : > { %v1765_v55 = vpop.f32.mrf.mxu1 }
 0x197   : > { %5553 = vst [vmem:[#allocation19_spill] sm:$0xff] %v5037_v12  ;;  %v5040_v48 = vadd.f32 %v3634_v24, %v1822_v32  ;;  %v1820_v46 = vadd.f32 %v1765_v55, %v4945_v16  ;;  %v1996_v62 = vpop.f32.mrf.mxu0 }
 0x198   : > { %v3601_v10 = vpop.f32.mrf.mxu1 }
 0x199   : > { %5554 = vst [vmem:[#allocation24_spill] sm:$0xff] %v5040_v48  ;;  %v5043_v21 = vadd.f32 %v1993_v26, %v1820_v46  ;;  %v1823_v38 = vadd.f32 %v3601_v10, %v4949_v31  ;;  %v3638_v34 = vpop.f32.mrf.mxu0 }
 0x19a   : > { %v1768_v44 = vpop.f32.mrf.mxu1 }
 0x19b   : > { %5555 = vst [vmem:[#allocation5_spill] sm:$0xff] %v5043_v21  ;;  %v5046_v27 = vadd.f32 %v3635_v30, %v1823_v38  ;;  %v1821_v3 = vadd.f32 %v1768_v44, %v4953_v7  ;;  %v2009_v35 = vpop.f32.mrf.mxu0 }
 0x19c   : > { %v3604_v57 = vpop.f32.mrf.mxu1 }
 0x19d   : > { %5556 = vst [vmem:[#allocation10_spill] sm:$0xff] %v5046_v27  ;;  %v5049_v40 = vadd.f32 %v1996_v62, %v1821_v3  ;;  %v1826_v9 = vadd.f32 %v3604_v57, %v4956_v51  ;;  %v3639_v39 = vpop.f32.mrf.mxu0 }
 0x19e   : > { %v1781_v16 = vpop.f32.mrf.mxu1 }
 0x19f   : > { %5557 = vst [vmem:[#allocation12_spill] sm:$0xff] %v5049_v40  ;;  %v5052_v18 = vadd.f32 %v3638_v34, %v1826_v9  ;;  %v1824_v36 = vadd.f32 %v1781_v16, %v4959_v50  ;;  %v2012_v23 = vpop.f32.mrf.mxu0 }
 0x1a0   : > { %v3605_v31 = vpop.f32.mrf.mxu1 }
 0x1a1   : > { %5558 = vst [vmem:[#allocation14_spill] sm:$0xff] %v5052_v18  ;;  %v5055_v6 = vadd.f32 %v2009_v35, %v1824_v36  ;;  %v1827_v14 = vadd.f32 %v3605_v31, %v4962_v2  ;;  %v5058_v56 = vpop.f32.mrf.mxu0 }
 0x1a2   : > { %v1784_v7 = vpop.f32.mrf.mxu1 }
 0x1a3   : > { %5559 = vst [vmem:[#allocation17_spill] sm:$0xff] %v5055_v6  ;;  %v5060_v13 = vadd.f32 %v3639_v39, %v1827_v14  ;;  %v1825_v42 = vadd.f32 %v1784_v7, %v4965_v47  ;;  %v5063_v51 = vpop.f32.mrf.mxu0 }
 0x1a4   : > { %v3644_v43 = vpop.f32.mrf.mxu1 }
 0x1a5   : > { %5560 = vst [vmem:[#allocation22_spill] sm:$0xff] %v5060_v13  ;;  %v5065_v61 = vadd.f32 %v2012_v23, %v1825_v42  ;;  %v5067_v24 = vpop.f32.mrf.mxu0 }
 0x1a6   : > { %v2109_v50 = vpop.f32.mrf.mxu1 }
 0x1a7   : > { %5561 = vst [vmem:[#allocation25_spill] sm:$0xff] %v5065_v61  ;;  %v5069_v59 = vpop.f32.mrf.mxu0 }
 0x1a8   : > { %v3645_v54 = vpop.f32.mrf.mxu1 }
 0x1a9   : > { %v5071_v26 = vpop.f32.mrf.mxu0 }
 0x1aa   : > { %v5073_v2 = vpop.f32.mrf.mxu1 }
 0x1ab   : > { %v5075_v20 = vpop.f32.mrf.mxu0 }
 0x1ac   : > { %v5077_v32 = vpop.f32.mrf.mxu1 }
 0x1ad   : > { %v5079_v47 = vpop.f32.mrf.mxu0 }
 0x1ae   : > { %v5081_v30 = vpop.f32.mrf.mxu1 }
 0x1af   : > { %v5083_v55 = vpop.f32.mrf.mxu0 }
 0x1b0   : > { %v5085_v46 = vpop.f32.mrf.mxu1 }
 0x1b1   : > { %v5087_v62 = vpop.f32.mrf.mxu0 }
 0x1b2   : > { %v5089_v10 = vpop.f32.mrf.mxu1 }
 0x1b3   : > { %v5091_v38 = vpop.f32.mrf.mxu0 }
 0x1b4   : > { %v5093_v34 = vpop.f32.mrf.mxu1 }
 0x1b5   : > { %v5095_v44 = vpop.f32.mrf.mxu0 }
 0x1b6   : > { %v5097_v3 = vpop.f32.mrf.mxu1 }
 0x1b7   : > { %v5099_v35 = vpop.f32.mrf.mxu0 }
 0x1b8   : > { %v5101_v57 = vpop.f32.mrf.mxu1 }
 0x1b9   : > { %v5103_v9 = vpop.f32.mrf.mxu0 }
 0x1ba   : > { %v5105_v39 = vpop.f32.mrf.mxu1 }
 0x1bb   : > { %v5107_v16 = vpop.f32.mrf.mxu0 }
 0x1bc   : > { %v5109_v36 = vpop.f32.mrf.mxu1 }
 0x1bd   : > { %v5111_v23 = vpop.f32.mrf.mxu0 }
 0x1be   : > { %v5113_v31 = vpop.f32.mrf.mxu1 }
 0x1bf   : > { %v5115_v14 = vpop.f32.mrf.mxu0 }
 0x1c0   : > { %v5117_v7 = vpop.f32.mrf.mxu1 }
 0x1c1   : > { %v5119_v42 = vpop.f32.mrf.mxu0 }
 0x1c2   : > { %v5121_v61 = vpop.f32.mrf.mxu1 }
 0x1c3   : > { %v5123_v13 = vpop.f32.mrf.mxu0 }
 0x1c4   : > { %5562 = vst [vmem:[#allocation2_spill] sm:$0xff] %v5123_v13  ;;  %v5125_v6 = vpop.f32.mrf.mxu1 }
 0x1c5   : > { %v5127_v18 = vpop.f32.mrf.mxu0 }
 0x1c6   : > { %5563 = vst [vmem:[#allocation20_spill] sm:$0xff] %v5127_v18  ;;  %v5129_v40 = vpop.f32.mrf.mxu1 }
 0x1c7   : > { %v5131_v27 = vpop.f32.mrf.mxu0 }
 0x1c8   : > { %5564 = vst [vmem:[#allocation16_spill] sm:$0xff] %v5131_v27  ;;  %v5133_v21 = vpop.f32.mrf.mxu1 }
 0x1c9   : > { %5565 = vst [vmem:[#allocation18_spill] sm:$0xff] %v5133_v21  ;;  %v5135_v48 = vpop.f32.mrf.mxu0 }
 0x1ca   : > { %5566 = vst [vmem:[#allocation21_spill] sm:$0xff] %v5135_v48  ;;  %v5137_v12 = vpop.f32.mrf.mxu1 }
 0x1cb   : > { %5567 = vst [vmem:[#allocation23_spill] sm:$0xff] %v5137_v12  ;;  %v5139_v0 = vpop.f32.mrf.mxu0 }
 0x1cc   : > { %5568 = vst [vmem:[#allocation8_spill] sm:$0xff] %v5139_v0  ;;  %v5141_v52 = vpop.f32.mrf.mxu1 }
 0x1cd   : > { %5569 = vst [vmem:[#allocation3_spill] sm:$0xff] %v5141_v52  ;;  %v5143_v1 = vpop.f32.mrf.mxu0 }
 0x1ce   : > { %5570 = vst [vmem:[#allocation4_spill] sm:$0xff] %v5143_v1  ;;  %v5145_v49 = vpop.f32.mrf.mxu1 }
 0x1cf   : > { %5571 = vst [vmem:[#allocation6_spill] sm:$0xff] %v5145_v49  ;;  %v5147_v13 = vpop.f32.mrf.mxu0 }
 0x1d0   : > { %5572 = vst [vmem:[#allocation26_spill] sm:$0xff] %v5147_v13  ;;  %v5149_v18 = vpop.f32.mrf.mxu1 }
 0x1d1   : > { %5573 = vst [vmem:[#allocation27_spill] sm:$0xff] %v5149_v18  ;;  %v5151_v53 = vpop.f32.mrf.mxu0 }
 0x1d2   : > { %5574 = vst [vmem:[#allocation28_spill] sm:$0xff] %v5151_v53  ;;  %v5153_v27 = vpop.f32.mrf.mxu1 }
 0x1d3   : > { %5575 = vst [vmem:[#allocation29_spill] sm:$0xff] %v5153_v27  ;;  %v5155_v21 = vpop.f32.mrf.mxu0 }
 0x1d4   : > { %5576 = vst [vmem:[#allocation30_spill] sm:$0xff] %v5155_v21  ;;  %v5157_v48 = vpop.f32.mrf.mxu1 }
 0x1d5   : > { %5577 = vst [vmem:[#allocation31_spill] sm:$0xff] %v5157_v48  ;;  %v5159_v12 = vpop.f32.mrf.mxu0 }
 0x1d6   : > { %5578 = vst [vmem:[#allocation32_spill] sm:$0xff] %v5159_v12  ;;  %v5161_v0 = vpop.f32.mrf.mxu1  ;;  %v2238_v12 = vadd.f32 %v3644_v43, %v4968_v29  ;;  %v2237_v29 = vadd.f32 %v5073_v2, %v4977_v4  ;;  %v2240_v4 = vadd.f32 %v5081_v30, %v4983_v5 }
 0x1d7   : > { %5579 = vst [vmem:[#allocation33_spill] sm:$0xff] %v5161_v0  ;;  %v5163_v52 = vpop.f32.mrf.mxu0 }
 0x1d8   : > { %5580 = vst [vmem:[#allocation34_spill] sm:$0xff] %v5163_v52  ;;  %v5165_v1 = vpop.f32.mrf.mxu1  ;;  %v2236_v52 = vadd.f32 %v2109_v50, %v4971_v15  ;;  %v5197_v15 = vld [vmem:[%s5427_s2] ss:$0 sm:$0xff] }
 0x1d9   : > { %5581 = vst [vmem:[#allocation35_spill] sm:$0xff] %v5165_v1  ;;  %v5167_v49 = vpop.f32.mrf.mxu0 }
 0x1da   : > { %5582 = vst [vmem:[#allocation36_spill] sm:$0xff] %v5167_v49  ;;  %v5169_v13 = vpop.f32.mrf.mxu1 }
 0x1db   : > { %5583 = vst [vmem:[#allocation37_spill] sm:$0xff] %v5169_v13  ;;  %v5171_v18 = vpop.f32.mrf.mxu0 }
 0x1dc   : > { %5584 = vst [vmem:[#allocation38_spill] sm:$0xff] %v5171_v18  ;;  %v5173_v53 = vpop.f32.mrf.mxu1  ;;  %v2444_v18 = vadd.f32 %v5058_v56, %v2238_v12 }
 0x1dd   : > { %5585 = vst [vmem:[#allocation39_spill] sm:$0xff] %v5173_v53  ;;  %v5175_v27 = vpop.f32.mrf.mxu0  ;;  %v2239_v53 = vadd.f32 %v3645_v54, %v4974_v58 }
 0x1de   : > { %5586 = vst [vmem:[#allocation40_spill] sm:$0xff] %v5175_v27  ;;  %v5177_v21 = vpop.f32.mrf.mxu1 }
 0x1df   : > { %5587 = vst [vmem:[#allocation41_spill] sm:$0xff] %v5177_v21  ;;  %v5180_v48 = vpop.f32.mrf.mxu0  ;;  %v2442_v21 = vadd.f32 %v5063_v51, %v2236_v52  ;;  %v2445_v58 = vadd.f32 %v5067_v24, %v2239_v53 }
 0x1e0   : > { %5588 = vst [vmem:[#allocation42_spill] sm:$0xff] %v5180_v48  ;;  %v5182_v0 = vpop.f32.mrf.mxu1 }
 0x1e1   : > { %5589 = vst [vmem:[#allocation43_spill] sm:$0xff] %v5182_v0  ;;  %v3746_v49 = vpop.f32.mrf.mxu0  ;;  %v2242_v0 = vadd.f32 %v5077_v32, %v4980_v41 }
 0x1e2   : > { %v5185_v1 = vpop.f32.mrf.mxu1 }
 0x1e3   : > { %v2755_v13 = vpop.f32.mrf.mxu0 }
 0x1e4   : > { %v3712_v27 = vpop.f32.mrf.mxu1 }
 0x1e5   : > { %v2672_v43 = vadd.f32 %v3712_v27, %v2444_v18  ;;  %v3747_v48 = vpop.f32.mrf.mxu0  ;;  %v5206_v27 = vld [vmem:[%s5428_s3] ss:$0 sm:$0xff]  ;;  %v2443_v18 = vadd.f32 %v5069_v59, %v2237_v29 }
 0x1e6   : > { %v2543_v12 = vpop.f32.mrf.mxu1 }
 0x1e7   : > { %v2884_v56 = vadd.f32 %v3746_v49, %v2672_v43  ;;  %v2670_v50 = vadd.f32 %v2543_v12, %v2442_v21  ;;  %v2758_v52 = vpop.f32.mrf.mxu0  ;;  %v2448_v49 = vadd.f32 %v5071_v26, %v2242_v0  ;;  %v2243_v21 = vadd.f32 %v5085_v46, %v4986_v45 }
 0x1e8   : > { %v3713_v41 = vpop.f32.mrf.mxu1  ;;  %v2446_v0 = vadd.f32 %v5075_v20, %v2240_v4  ;;  %v2241_v45 = vadd.f32 %v5089_v10, %v4989_v8 }
 0x1e9   : > { %v2923_v51 = vmul.f32 %v5197_v15, %v2884_v56  ;;  %v2882_v54 = vadd.f32 %v2755_v13, %v2670_v50  ;;  %v2673_v2 = vadd.f32 %v3713_v41, %v2445_v58  ;;  %v3750_v53 = vpop.f32.mrf.mxu0  ;;  %v2246_v56 = vadd.f32 %v5093_v34, %v4992_v11 }
 0x1ea   : > { %v2546_v5 = vpop.f32.mrf.mxu1 }
 0x1eb   : > { %v2962_v24 = vadd.f32 %v5206_v27, %v2923_v51  ;;  %v2921_v59 = vmul.f32 %v5197_v15, %v2882_v54  ;;  %v2885_v13 = vadd.f32 %v3747_v48, %v2673_v2  ;;  %v2671_v32 = vadd.f32 %v2546_v5, %v2443_v18  ;;  %v2771_v30 = vpop.f32.mrf.mxu0 }
 0x1ec   : > { %v3716_v26 = vpop.f32.mrf.mxu1  ;;  %v2449_v48 = vadd.f32 %v5079_v47, %v2243_v21  ;;  %v2244_v18 = vadd.f32 %v5097_v3, %v4995_v60 }
 0x1ed   : > { %2995 = vst.msk [vmem:[%s5216_s21 + $0x10] sm:$0xff] %vm2992_vm8, %v2962_v24  ;;  %v2960_v46 = vadd.f32 %v5206_v27, %v2921_v59  ;;  %v2924_v29 = vmul.f32 %v5197_v15, %v2885_v13  ;;  %v2883_v43 = vadd.f32 %v2758_v52, %v2671_v32  ;;  %v2676_v12 = vadd.f32 %v3716_v26, %v2448_v49  ;;  %v3751_v58 = vpop.f32.mrf.mxu0 }
 0x1ee   : > { %v2559_v20 = vpop.f32.mrf.mxu1  ;;  %v2447_v52 = vadd.f32 %v5083_v55, %v2241_v45  ;;  %v2247_v49 = vadd.f32 %v5101_v57, %v4998_v33  ;;  %v2450_v59 = vadd.f32 %v5091_v38, %v2244_v18  ;;  %v2245_v13 = vadd.f32 %v5105_v39, %v5001_v17 }
 0x1ef   : > { %2993 = vst.msk [vmem:[%s5216_s21] sm:$0xff] %vm2992_vm8, %v2960_v46  ;;  %v2963_v8 = vadd.f32 %v5206_v27, %v2924_v29  ;;  %v2922_v10 = vmul.f32 %v5197_v15, %v2883_v43  ;;  %v2888_v50 = vadd.f32 %v3750_v53, %v2676_v12  ;;  %v2674_v4 = vadd.f32 %v2559_v20, %v2446_v0  ;;  %v2774_v41 = vpop.f32.mrf.mxu0 }
 0x1f0   : > { %v3717_v47 = vpop.f32.mrf.mxu1  ;;  %v2452_v53 = vadd.f32 %v5087_v62, %v2246_v56  ;;  %v2453_v45 = vadd.f32 %v5095_v44, %v2247_v49  ;;  %v2250_v26 = vadd.f32 %v5109_v36, %v5004_v19  ;;  %v2451_v12 = vadd.f32 %v5099_v35, %v2245_v13  ;;  %v5591_v13 = vld [vmem:[#allocation18_spill] sm:$0xff] }
 0x1f1   : > { %2996 = vst.msk [vmem:[%s5216_s21 + $0x18] sm:$0xff] %vm2992_vm8, %v2963_v8  ;;  %v2961_v11 = vadd.f32 %v5206_v27, %v2922_v10  ;;  %v2927_v34 = vmul.f32 %v5197_v15, %v2888_v50  ;;  %v2886_v51 = vadd.f32 %v2771_v30, %v2674_v4  ;;  %v2677_v54 = vadd.f32 %v3717_v47, %v2449_v48  ;;  %v3754_v2 = vpop.f32.mrf.mxu0 }
 0x1f2   : > { %v2562_v55 = vpop.f32.mrf.mxu1  ;;  %v2456_v8 = vadd.f32 %v5103_v9, %v2250_v26  ;;  %v2251_v10 = vadd.f32 %v5117_v7, %v5010_v37  ;;  %v2249_v18 = vadd.f32 %v5121_v61, %v5013_v28  ;;  %v5594_v26 = vld [vmem:[#allocation23_spill] sm:$0xff] }
 0x1f3   : > { %2994 = vst.msk [vmem:[%s5216_s21 + $0x8] sm:$0xff] %vm2992_vm8, %v2961_v11  ;;  %v2966_v60 = vadd.f32 %v5206_v27, %v2927_v34  ;;  %v2925_v3 = vmul.f32 %v5197_v15, %v2886_v51  ;;  %v2889_v21 = vadd.f32 %v3751_v58, %v2677_v54  ;;  %v2675_v5 = vadd.f32 %v2562_v55, %v2447_v52  ;;  %v2787_v24 = vpop.f32.mrf.mxu0 }
 0x1f4   : > { %v3720_v62 = vpop.f32.mrf.mxu1  ;;  %v2248_v58 = vadd.f32 %v5113_v31, %v5007_v25  ;;  %v2457_v51 = vadd.f32 %v5111_v23, %v2251_v10  ;;  %v2254_v54 = vadd.f32 %v5125_v6, %v5016_v22  ;;  %v2455_v55 = vadd.f32 %v5115_v14, %v2249_v18 }
 0x1f5   : > { %2999 = vst.msk [vmem:[%s5216_s21 + $0x30] sm:$0xff] %vm2992_vm8, %v2966_v60  ;;  %v2964_v33 = vadd.f32 %v5206_v27, %v2925_v3  ;;  %v2928_v57 = vmul.f32 %v5197_v15, %v2889_v21  ;;  %v2887_v32 = vadd.f32 %v2774_v41, %v2675_v5  ;;  %v2680_v30 = vadd.f32 %v3720_v62, %v2452_v53  ;;  %v3755_v0 = vpop.f32.mrf.mxu0 }
 0x1f6   : > { %v2575_v38 = vpop.f32.mrf.mxu1  ;;  %v2454_v52 = vadd.f32 %v5107_v16, %v2248_v58  ;;  %v2252_v60 = vadd.f32 %v5129_v40, %v5019_v63 }
 0x1f7   : > { %2997 = vst.msk [vmem:[%s5216_s21 + $0x20] sm:$0xff] %vm2992_vm8, %v2964_v33  ;;  %v2967_v17 = vadd.f32 %v5206_v27, %v2928_v57  ;;  %v2926_v39 = vmul.f32 %v5197_v15, %v2887_v32  ;;  %v2892_v46 = vadd.f32 %v3754_v2, %v2680_v30  ;;  %v2678_v29 = vadd.f32 %v2575_v38, %v2450_v59  ;;  %v2790_v43 = vpop.f32.mrf.mxu0  ;;  %v5590_v59 = vld [vmem:[#allocation9_spill] sm:$0xff]  ;;  %v5592_v30 = vld [vmem:[#allocation2_spill] sm:$0xff] }
 0x1f8   : > { %v3721_v44 = vpop.f32.mrf.mxu1  ;;  %v2255_v62 = vadd.f32 %v5591_v13, %v5590_v59 }
 0x1f9   : > { %3000 = vst.msk [vmem:[%s5216_s21 + $0x38] sm:$0xff] %vm2992_vm8, %v2967_v17  ;;  %v2965_v19 = vadd.f32 %v5206_v27, %v2926_v39  ;;  %v2931_v36 = vmul.f32 %v5197_v15, %v2892_v46  ;;  %v2890_v48 = vadd.f32 %v2787_v24, %v2678_v29  ;;  %v2681_v56 = vadd.f32 %v3721_v44, %v2453_v45  ;;  %v3758_v20 = vpop.f32.mrf.mxu0  ;;  %v5593_v45 = vld [vmem:[#allocation7_spill] sm:$0xff] }
 0x1fa   : > { %v2578_v35 = vpop.f32.mrf.mxu1  ;;  %v2460_v24 = vadd.f32 %v5119_v42, %v2254_v54  ;;  %v2253_v38 = vadd.f32 %v5594_v26, %v5593_v45  ;;  %v5596_v44 = vld [vmem:[#allocation11_spill] sm:$0xff] }
 0x1fb   : > { %2998 = vst.msk [vmem:[%s5216_s21 + $0x28] sm:$0xff] %vm2992_vm8, %v2965_v19  ;;  %v2970_v25 = vadd.f32 %v5206_v27, %v2931_v36  ;;  %v2929_v31 = vmul.f32 %v5197_v15, %v2890_v48  ;;  %v2893_v50 = vadd.f32 %v3755_v0, %v2681_v56  ;;  %v2679_v4 = vadd.f32 %v2578_v35, %v2451_v12  ;;  %v2803_v41 = vpop.f32.mrf.mxu0  ;;  %v5595_v12 = vld [vmem:[#allocation20_spill] sm:$0xff]  ;;  %v5597_v19 = vld [vmem:[#allocation3_spill] sm:$0xff] }
 0x1fc   : > { %v3724_v9 = vpop.f32.mrf.mxu1  ;;  %v2458_v0 = vadd.f32 %v5592_v30, %v2252_v60  ;;  %v2461_v58 = vadd.f32 %v5595_v12, %v2255_v62  ;;  %v2258_v36 = vadd.f32 %v5597_v19, %v5596_v44  ;;  %v5603_v54 = vld [vmem:[#allocation27_spill] sm:$0xff]  ;;  %v5604_v60 = vld [vmem:[#allocation8_spill] sm:$0xff] }
 0x1fd   : > { %3003 = vst.msk [vmem:[%s5216_s21 + $0x50] sm:$0xff] %vm2992_vm8, %v2970_v25  ;;  %v2968_v37 = vadd.f32 %v5206_v27, %v2929_v31  ;;  %v2932_v7 = vmul.f32 %v5197_v15, %v2893_v50  ;;  %v2891_v47 = vadd.f32 %v2790_v43, %v2679_v4  ;;  %v2684_v11 = vadd.f32 %v3724_v9, %v2456_v8  ;;  %v3759_v34 = vpop.f32.mrf.mxu0  ;;  %v5598_v25 = vld [vmem:[#allocation16_spill] sm:$0xff]  ;;  %v5599_v50 = vld [vmem:[#allocation13_spill] sm:$0xff]  ;;  %v5600_v4 = vld [vmem:[#allocation6_spill] sm:$0xff] }
 0x1fe   : > { %v2591_v16 = vpop.f32.mrf.mxu1  ;;  %v2459_v31 = vadd.f32 %v5598_v25, %v2253_v38 }
 0x1ff   : > { %3001 = vst.msk [vmem:[%s5216_s21 + $0x40] sm:$0xff] %vm2992_vm8, %v2968_v37  ;;  %v2971_v28 = vadd.f32 %v5206_v27, %v2932_v7  ;;  %v2930_v61 = vmul.f32 %v5197_v15, %v2891_v47  ;;  %v2896_v2 = vadd.f32 %v3758_v20, %v2684_v11  ;;  %v2682_v53 = vadd.f32 %v2591_v16, %v2454_v52  ;;  %v2806_v49 = vpop.f32.mrf.mxu0  ;;  %v5601_v11 = vld [vmem:[#allocation21_spill] sm:$0xff] }
 0x200   : > { %v3725_v23 = vpop.f32.mrf.mxu1 }
 0x201   : > { %3004 = vst.msk [vmem:[%s5216_s21 + $0x58] sm:$0xff] %vm2992_vm8, %v2971_v28  ;;  %v2969_v22 = vadd.f32 %v5206_v27, %v2930_v61  ;;  %v2935_v6 = vmul.f32 %v5197_v15, %v2896_v2  ;;  %v2894_v3 = vadd.f32 %v2803_v41, %v2682_v53  ;;  %v2685_v21 = vadd.f32 %v3725_v23, %v2457_v51  ;;  %v3762_v5 = vpop.f32.mrf.mxu0  ;;  %v5602_v51 = vld [vmem:[#allocation15_spill] sm:$0xff] }
 0x202   : > { %v2594_v14 = vpop.f32.mrf.mxu1  ;;  %v2256_v41 = vadd.f32 %v5600_v4, %v5599_v50  ;;  %v2259_v16 = vadd.f32 %v5603_v54, %v5602_v51 }
 0x203   : > { %3002 = vst.msk [vmem:[%s5216_s21 + $0x48] sm:$0xff] %vm2992_vm8, %v2969_v22  ;;  %v2974_v63 = vadd.f32 %v5206_v27, %v2935_v6  ;;  %v2933_v40 = vmul.f32 %v5197_v15, %v2894_v3  ;;  %v2897_v33 = vadd.f32 %v3759_v34, %v2685_v21  ;;  %v2683_v57 = vadd.f32 %v2594_v14, %v2455_v55  ;;  %v2819_v32 = vpop.f32.mrf.mxu0  ;;  %v5605_v22 = vld [vmem:[#allocation19_spill] sm:$0xff]  ;;  %v5606_v6 = vld [vmem:[#allocation29_spill] sm:$0xff]  ;;  %v5607_v14 = vld [vmem:[#allocation4_spill] sm:$0xff] }
 0x204   : > { %v3728_v42 = vpop.f32.mrf.mxu1  ;;  %v2464_v34 = vadd.f32 %v5601_v11, %v2258_v36  ;;  %v2462_v23 = vadd.f32 %v5604_v60, %v2256_v41  ;;  %v2257_v3 = vadd.f32 %v5606_v6, %v5605_v22 }
 0x205   : > { %3007 = vst.msk [vmem:[%s5216_s21 + $0x70] sm:$0xff] %vm2992_vm8, %v2974_v63  ;;  %v2972_v17 = vadd.f32 %v5206_v27, %v2933_v40  ;;  %v2936_v39 = vmul.f32 %v5197_v15, %v2897_v33  ;;  %v2895_v46 = vadd.f32 %v2806_v49, %v2683_v57  ;;  %v2688_v29 = vadd.f32 %v3728_v42, %v2460_v24  ;;  %v3763_v43 = vpop.f32.mrf.mxu0  ;;  %v5608_v40 = vld [vmem:[#allocation24_spill] sm:$0xff]  ;;  %v5609_v33 = vld [vmem:[#allocation31_spill] sm:$0xff]  ;;  %v5610_v42 = vld [vmem:[#allocation26_spill] sm:$0xff] }
 0x206   : > { %v2607_v48 = vpop.f32.mrf.mxu1  ;;  %v2465_v63 = vadd.f32 %v5607_v14, %v2259_v16  ;;  %v2262_v57 = vadd.f32 %v5609_v33, %v5608_v40 }
 0x207   : > { %3005 = vst.msk [vmem:[%s5216_s21 + $0x60] sm:$0xff] %vm2992_vm8, %v2972_v17  ;;  %v2975_v56 = vadd.f32 %v5206_v27, %v2936_v39  ;;  %v2934_v20 = vmul.f32 %v5197_v15, %v2895_v46  ;;  %v2900_v8 = vadd.f32 %v3762_v5, %v2688_v29  ;;  %v2686_v10 = vadd.f32 %v2607_v48, %v2458_v0  ;;  %v2822_v35 = vpop.f32.mrf.mxu0  ;;  %v5611_v39 = vld [vmem:[#allocation5_spill] sm:$0xff]  ;;  %v5613_v48 = vld [vmem:[#allocation28_spill] sm:$0xff] }
 0x208   : > { %v3729_v52 = vpop.f32.mrf.mxu1  ;;  %v2463_v17 = vadd.f32 %v5610_v42, %v2257_v3  ;;  %v5612_v46 = vld [vmem:[#allocation33_spill] sm:$0xff] }
 0x209   : > { %3008 = vst.msk [vmem:[%s5216_s21 + $0x78] sm:$0xff] %vm2992_vm8, %v2975_v56  ;;  %v2973_v18 = vadd.f32 %v5206_v27, %v2934_v20  ;;  %v2939_v9 = vmul.f32 %v5197_v15, %v2900_v8  ;;  %v2898_v37 = vadd.f32 %v2819_v32, %v2686_v10  ;;  %v2689_v7 = vadd.f32 %v3729_v52, %v2461_v58  ;;  %v3766_v47 = vpop.f32.mrf.mxu0  ;;  %v5614_v20 = vld [vmem:[#allocation10_spill] sm:$0xff]  ;;  %v5615_v8 = vld [vmem:[#allocation35_spill] sm:$0xff] }
 0x20a   : > { %v2610_v28 = vpop.f32.mrf.mxu1  ;;  %v2260_v29 = vadd.f32 %v5612_v46, %v5611_v39  ;;  %v2468_v56 = vadd.f32 %v5613_v48, %v2262_v57  ;;  %v2263_v10 = vadd.f32 %v5615_v8, %v5614_v20  ;;  %v5616_v52 = vld [vmem:[#allocation30_spill] sm:$0xff]  ;;  %v5630_v8 = vld [vmem:[#allocation40_spill] sm:$0xff] }
 0x20b   : > { %3006 = vst.msk [vmem:[%s5216_s21 + $0x68] sm:$0xff] %vm2992_vm8, %v2973_v18  ;;  %v2978_v61 = vadd.f32 %v5206_v27, %v2939_v9  ;;  %v2937_v2 = vmul.f32 %v5197_v15, %v2898_v37  ;;  %v2901_v53 = vadd.f32 %v3763_v43, %v2689_v7  ;;  %v2687_v49 = vadd.f32 %v2610_v28, %v2459_v31  ;;  %v2835_v55 = vpop.f32.mrf.mxu0  ;;  %v5617_v9 = vld [vmem:[#allocation12_spill] sm:$0xff]  ;;  %v5618_v37 = vld [vmem:[#allocation37_spill] sm:$0xff] }
 0x20c   : > { %v3732_v21 = vpop.f32.mrf.mxu1  ;;  %v2466_v18 = vadd.f32 %v5616_v52, %v2260_v29  ;;  %v2261_v7 = vadd.f32 %v5618_v37, %v5617_v9  ;;  %v5619_v28 = vld [vmem:[#allocation32_spill] sm:$0xff]  ;;  %v5628_v29 = vld [vmem:[#allocation38_spill] sm:$0xff] }
 0x20d   : > { %3011 = vst.msk [vmem:[%s5216_s21 + $0x90] sm:$0xff] %vm2992_vm8, %v2978_v61  ;;  %v2976_v5 = vadd.f32 %v5206_v27, %v2937_v2  ;;  %v2940_v24 = vmul.f32 %v5197_v15, %v2901_v53  ;;  %v2899_v59 = vadd.f32 %v2822_v35, %v2687_v49  ;;  %v2692_v13 = vadd.f32 %v3732_v21, %v2464_v34  ;;  %v3767_v62 = vpop.f32.mrf.mxu0  ;;  %v5620_v2 = vld [vmem:[#allocation14_spill] sm:$0xff]  ;;  %v5621_v53 = vld [vmem:[#allocation39_spill] sm:$0xff] }
 0x20e   : > { %v2623_v32 = vpop.f32.mrf.mxu1  ;;  %v2469_v61 = vadd.f32 %v5619_v28, %v2263_v10  ;;  %v2266_v49 = vadd.f32 %v5621_v53, %v5620_v2  ;;  %v5622_v21 = vld [vmem:[#allocation34_spill] sm:$0xff] }
 0x20f   : > { %3009 = vst.msk [vmem:[%s5216_s21 + $0x80] sm:$0xff] %vm2992_vm8, %v2976_v5  ;;  %v2979_v30 = vadd.f32 %v5206_v27, %v2940_v24  ;;  %v2938_v0 = vmul.f32 %v5197_v15, %v2899_v59  ;;  %v2904_v45 = vadd.f32 %v3766_v47, %v2692_v13  ;;  %v2690_v26 = vadd.f32 %v2623_v32, %v2462_v23  ;;  %v2838_v38 = vpop.f32.mrf.mxu0  ;;  %v5623_v24 = vld [vmem:[#allocation17_spill] sm:$0xff]  ;;  %v5625_v32 = vld [vmem:[#allocation36_spill] sm:$0xff] }
 0x210   : > { %v3733_v43 = vpop.f32.mrf.mxu1  ;;  %v2467_v5 = vadd.f32 %v5622_v21, %v2261_v7  ;;  %v5624_v59 = vld [vmem:[#allocation41_spill] sm:$0xff] }
 0x211   : > { %3012 = vst.msk [vmem:[%s5216_s21 + $0x98] sm:$0xff] %vm2992_vm8, %v2979_v30  ;;  %v2977_v12 = vadd.f32 %v5206_v27, %v2938_v0  ;;  %v2943_v58 = vmul.f32 %v5197_v15, %v2904_v45  ;;  %v2902_v44 = vadd.f32 %v2835_v55, %v2690_v26  ;;  %v2693_v19 = vadd.f32 %v3733_v43, %v2465_v63  ;;  %v3770_v36 = vpop.f32.mrf.mxu0  ;;  %v5626_v0 = vld [vmem:[#allocation22_spill] sm:$0xff]  ;;  %v5627_v45 = vld [vmem:[#allocation43_spill] sm:$0xff] }
 0x212   : > { %v2626_v35 = vpop.f32.mrf.mxu1  ;;  %v2264_v13 = vadd.f32 %v5624_v59, %v5623_v24  ;;  %v2472_v30 = vadd.f32 %v5625_v32, %v2266_v49  ;;  %v2267_v26 = vadd.f32 %v5627_v45, %v5626_v0 }
 0x213   : > { %3010 = vst.msk [vmem:[%s5216_s21 + $0x88] sm:$0xff] %vm2992_vm8, %v2977_v12  ;;  %v2982_v25 = vadd.f32 %v5206_v27, %v2943_v58  ;;  %v2941_v31 = vmul.f32 %v5197_v15, %v2902_v44  ;;  %v2905_v50 = vadd.f32 %v3767_v62, %v2693_v19  ;;  %v2691_v4 = vadd.f32 %v2626_v35, %v2463_v17  ;;  %v2851_v41 = vpop.f32.mrf.mxu0  ;;  %v5629_v12 = vld [vmem:[#allocation25_spill] sm:$0xff] }
 0x214   : > { %v3736_v47 = vpop.f32.mrf.mxu1  ;;  %v2470_v43 = vadd.f32 %v5628_v29, %v2264_v13  ;;  %v2265_v58 = vadd.f32 %v5185_v1, %v5629_v12  ;;  %v2473_v10 = vadd.f32 %v5630_v8, %v2267_v26 }
 0x215   : > { %3015 = vst.msk [vmem:[%s5216_s21 + $0xb0] sm:$0xff] %vm2992_vm8, %v2982_v25  ;;  %v2980_v11 = vadd.f32 %v5206_v27, %v2941_v31  ;;  %v2944_v34 = vmul.f32 %v5197_v15, %v2905_v50  ;;  %v2903_v51 = vadd.f32 %v2838_v38, %v2691_v4  ;;  %v2696_v54 = vadd.f32 %v3736_v47, %v2468_v56  ;;  %v3771_v16 = vpop.f32.mrf.mxu0  ;;  %v5631_v4 = vld [vmem:[#allocation42_spill] sm:$0xff] }
 0x216   : > { %v2639_v55 = vpop.f32.mrf.mxu1 }
 0x217   : > { %3013 = vst.msk [vmem:[%s5216_s21 + $0xa0] sm:$0xff] %vm2992_vm8, %v2980_v11  ;;  %v2983_v60 = vadd.f32 %v5206_v27, %v2944_v34  ;;  %v2942_v23 = vmul.f32 %v5197_v15, %v2903_v51  ;;  %v2908_v22 = vadd.f32 %v3770_v36, %v2696_v54  ;;  %v2694_v6 = vadd.f32 %v2639_v55, %v2466_v18  ;;  %v2854_v3 = vpop.f32.mrf.mxu0 }
 0x218   : > { %v3737_v62 = vpop.f32.mrf.mxu1 }
 0x219   : > { %3016 = vst.msk [vmem:[%s5216_s21 + $0xb8] sm:$0xff] %vm2992_vm8, %v2983_v60  ;;  %v2981_v14 = vadd.f32 %v5206_v27, %v2942_v23  ;;  %v2947_v63 = vmul.f32 %v5197_v15, %v2908_v22  ;;  %v2906_v40 = vadd.f32 %v2851_v41, %v2694_v6  ;;  %v2697_v33 = vadd.f32 %v3737_v62, %v2469_v61  ;;  %v3774_v57 = vpop.f32.mrf.mxu0 }
 0x21a   : > { %v2642_v38 = vpop.f32.mrf.mxu1  ;;  %v2471_v41 = vadd.f32 %v5631_v4, %v2265_v58 }
 0x21b   : > { %3014 = vst.msk [vmem:[%s5216_s21 + $0xa8] sm:$0xff] %vm2992_vm8, %v2981_v14  ;;  %v2986_v42 = vadd.f32 %v5206_v27, %v2947_v63  ;;  %v2945_v17 = vmul.f32 %v5197_v15, %v2906_v40  ;;  %v2909_v39 = vadd.f32 %v3771_v16, %v2697_v33  ;;  %v2695_v46 = vadd.f32 %v2642_v38, %v2467_v5  ;;  %v2867_v19 = vpop.f32.mrf.mxu0 }
 0x21c   : > { %v3740_v44 = vpop.f32.mrf.mxu1 }
 0x21d   : > { %3019 = vst.msk [vmem:[%s5216_s21 + $0xd0] sm:$0xff] %vm2992_vm8, %v2986_v42  ;;  %v2984_v36 = vadd.f32 %v5206_v27, %v2945_v17  ;;  %v2948_v48 = vmul.f32 %v5197_v15, %v2909_v39  ;;  %v2907_v56 = vadd.f32 %v2854_v3, %v2695_v46  ;;  %v2700_v20 = vadd.f32 %v3740_v44, %v2472_v30  ;;  %v3775_v18 = vpop.f32.mrf.mxu0 }
 0x21e   : > { %v2655_v35 = vpop.f32.mrf.mxu1 }
 0x21f   : > { %3017 = vst.msk [vmem:[%s5216_s21 + $0xc0] sm:$0xff] %vm2992_vm8, %v2984_v36  ;;  %v2987_v25 = vadd.f32 %v5206_v27, %v2948_v48  ;;  %v2946_v1 = vmul.f32 %v5197_v15, %v2907_v56  ;;  %v2912_v31 = vadd.f32 %v3774_v57, %v2700_v20  ;;  %v2698_v50 = vadd.f32 %v2655_v35, %v2470_v43  ;;  %v2870_v28 = vpop.f32.mrf.mxu0 }
 0x220   : > { %v3741_v52 = vpop.f32.mrf.mxu1 }
 0x221   : > { %3020 = vst.msk [vmem:[%s5216_s21 + $0xd8] sm:$0xff] %vm2992_vm8, %v2987_v25  ;;  %v2985_v9 = vadd.f32 %v5206_v27, %v2946_v1  ;;  %v2951_v37 = vmul.f32 %v5197_v15, %v2912_v31  ;;  %v2910_v7 = vadd.f32 %v2867_v19, %v2698_v50  ;;  %v2701_v47 = vadd.f32 %v3741_v52, %v2473_v10 }
 0x222   : > { %v2658_v11 = vpop.f32.mrf.mxu1 }
 0x223   : > { %3018 = vst.msk [vmem:[%s5216_s21 + $0xc8] sm:$0xff] %vm2992_vm8, %v2985_v9  ;;  %v2990_v34 = vadd.f32 %v5206_v27, %v2951_v37  ;;  %v2949_v51 = vmul.f32 %v5197_v15, %v2910_v7  ;;  %v2913_v54 = vadd.f32 %v3775_v18, %v2701_v47  ;;  %v2699_v16 = vadd.f32 %v2658_v11, %v2471_v41 }
 0x225   : > { %3023 = vst.msk [vmem:[%s5216_s21 + $0xf0] sm:$0xff] %vm2992_vm8, %v2990_v34  ;;  %v2988_v61 = vadd.f32 %v5206_v27, %v2949_v51  ;;  %v2952_v2 = vmul.f32 %v5197_v15, %v2913_v54  ;;  %v2911_v53 = vadd.f32 %v2870_v28, %v2699_v16 }
 0x227   : > { %3021 = vst.msk [vmem:[%s5216_s21 + $0xe0] sm:$0xff] %vm2992_vm8, %v2988_v61  ;;  %v2991_v49 = vadd.f32 %v5206_v27, %v2952_v2  ;;  %v2950_v55 = vmul.f32 %v5197_v15, %v2911_v53 }
 0x229   : > { %3024 = vst.msk [vmem:[%s5216_s21 + $0xf8] sm:$0xff] %vm2992_vm8, %v2991_v49  ;;  %v2989_v60 = vadd.f32 %v5206_v27, %v2950_v55 }
 0x22b   : > { %3022 = vst.msk [vmem:[%s5216_s21 + $0xe8] sm:$0xff] %vm2992_vm8, %v2989_v60 }
 0x22c PF: > { %s14_s15 = sadd.s32 1, %s3821_s15  }
 0x22d   : > { %p11_p4 = scmp.ge.s32.totalorder %s14_s15, 4  }
 0x22f   :  { %13 = sbr.rel (!%p11_p4) target bundleno = 1 (0x1), region = 74 }

</bundles_post_ra>
